<compile_context>
chip_gen: v7x
topology: tpu7x:2x2x1
jax: 0.10.0
libtpu: 0.0.40
codegen_flags: <defaults>
</compile_context>

<pallas_src>
import jax
import jax.numpy as jnp
from jax.experimental import pallas as pl
from jax.experimental.pallas import tpu as pltpu

# ----------------------------- hparams (small) -----------------------------
INPUT_SIZE = 32          # input_size
HIDDEN = 32              # hparams.model.lstm.hidden_size
NUM_LAYERS = 2           # hparams.model.lstm.num_layers
NUM_DIRS = 2             # bidirectional=True
EMO_DIM = 32             # hparams.model.emotion_embedding_size
ASSEMBLE = "concat"      # hparams.model.lstm.output_assemble_type
CONCAT_DIM = HIDDEN * NUM_LAYERS * NUM_DIRS     # 128

BATCH = 2
SEQ = 8


# ----------------------------- fused Pallas kernel -----------------------------
def _emotion_embedding_kernel(
    x_ref,                         # (S, B, I)  time-major padded input
    lens_ref,                      # (B, 1)     int32 valid lengths
    wih_l0f, whh_l0f, b_l0f,       # layer 0, forward   (I,4H) (H,4H) (1,4H)
    wih_l0b, whh_l0b, b_l0b,       # layer 0, backward
    wih_l1f, whh_l1f, b_l1f,       # layer 1, forward   (2H,4H) (H,4H) (1,4H)
    wih_l1b, whh_l1b, b_l1b,       # layer 1, backward
    emo_w_ref, emo_b_ref,          # final Linear       (4H, E) (1, E)
    out_ref,                       # (B, E)
    seq_f_ref, seq_b_ref,          # VMEM scratch (S, B, H): layer-0 outputs
):
    f32 = jnp.float32
    S, B, _ = x_ref.shape
    H = HIDDEN
    lens = lens_ref[...]                              # (B, 1) int32, loaded once

    def run_direction(x_gates, whh_ref, reverse, out_seq_ref):
        """One LSTM direction.  x_gates(t) -> (B,4H) input-gate contribution."""
        whh = whh_ref[...]                            # hoisted: loaded once

        def step(i, carry):
            h, c = carry
            t = (S - 1 - i) if reverse else i
            g = x_gates(t) + jnp.dot(h, whh, preferred_element_type=f32)  # (B,4H)
            # PyTorch gate order: i, f, g, o
            i_g = jax.nn.sigmoid(g[:, 0 * H:1 * H])
            f_g = jax.nn.sigmoid(g[:, 1 * H:2 * H])
            g_g = jnp.tanh(g[:, 2 * H:3 * H])
            o_g = jax.nn.sigmoid(g[:, 3 * H:4 * H])
            c_new = f_g * c + i_g * g_g
            h_new = o_g * jnp.tanh(c_new)
            valid = lens > t                          # (B,1) packed-seq masking
            h = jnp.where(valid, h_new, h)
            c = jnp.where(valid, c_new, c)
            if out_seq_ref is not None:
                out_seq_ref[t] = h                    # layer-0 output for layer 1
            return (h, c)

        zeros = jnp.zeros((B, H), f32)
        h_fin, _ = jax.lax.fori_loop(0, S, step, (zeros, zeros), unroll=True)
        return h_fin                                  # h_n of this (layer, dir)

    # ------------------------- layer 0 (reads x) -------------------------
    w0f, w0b = wih_l0f[...], wih_l0b[...]
    bias0f = jnp.broadcast_to(b_l0f[...], (B, 4 * H))   # hoisted broadcasts
    bias0b = jnp.broadcast_to(b_l0b[...], (B, 4 * H))
    h_l0f = run_direction(
        lambda t: jnp.dot(x_ref[t], w0f, preferred_element_type=f32) + bias0f,
        whh_l0f, reverse=False, out_seq_ref=seq_f_ref)
    h_l0b = run_direction(
        lambda t: jnp.dot(x_ref[t], w0b, preferred_element_type=f32) + bias0b,
        whh_l0b, reverse=True, out_seq_ref=seq_b_ref)

    # --------------- layer 1 (reads layer-0 fwd/bwd outputs) ---------------
    w1f, w1b = wih_l1f[...], wih_l1b[...]             # (2H, 4H)
    bias1f = jnp.broadcast_to(b_l1f[...], (B, 4 * H))
    bias1b = jnp.broadcast_to(b_l1b[...], (B, 4 * H))

    def l1_gates(w, bias):
        # input = concat([fwd, bwd], -1) @ w  ==  fwd @ w[:H] + bwd @ w[H:]
        wt, wb = w[0:H, :], w[H:2 * H, :]
        return lambda t: (jnp.dot(seq_f_ref[t], wt, preferred_element_type=f32)
                          + jnp.dot(seq_b_ref[t], wb, preferred_element_type=f32)
                          + bias)

    h_l1f = run_direction(l1_gates(w1f, bias1f), whh_l1f, reverse=False,
                          out_seq_ref=None)
    h_l1b = run_direction(l1_gates(w1b, bias1b), whh_l1b, reverse=True,
                          out_seq_ref=None)

    # ---- assemble 'concat' of h_n + ReLU + Dropout(eval) + Linear epilogue ----
    #   torch.concat([h_n[i] for i in range(h_n.shape[0])], axis=1)
    #   concat(a,b,c,d) @ W == a@W[0:H] + b@W[H:2H] + c@W[2H:3H] + d@W[3H:4H]
    ew = emo_w_ref[...]                               # (CONCAT_DIM, E)
    relu = lambda v: jnp.maximum(v, 0.0)
    out = (jnp.dot(relu(h_l0f), ew[0 * H:1 * H, :], preferred_element_type=f32)
           + jnp.dot(relu(h_l0b), ew[1 * H:2 * H, :], preferred_element_type=f32)
           + jnp.dot(relu(h_l1f), ew[2 * H:3 * H, :], preferred_element_type=f32)
           + jnp.dot(relu(h_l1b), ew[3 * H:4 * H, :], preferred_element_type=f32)
           + emo_b_ref[...])
    out_ref[...] = out.astype(out_ref.dtype)


def emotion_embedding_forward(params, x, lengths):
    """x: (B, S, input_size) padded, batch-first; lengths: (B,) int32."""
    B, S, _ = x.shape
    x_t = jnp.transpose(x, (1, 0, 2)).astype(jnp.float32)    # time-major (S,B,I)
    lens2 = lengths.reshape(B, 1).astype(jnp.int32)

    args = [x_t, lens2]
    for layer in params["lstm"]:
        for d in layer:                                      # fwd then bwd
            args += [d["w_ih"], d["w_hh"], d["b"]]
    args += [params["emo_w"], params["emo_b"]]

    return pl.pallas_call(
        _emotion_embedding_kernel,
        out_shape=jax.ShapeDtypeStruct((B, EMO_DIM), jnp.float32),
        scratch_shapes=[
            pltpu.VMEM((S, B, HIDDEN), jnp.float32),   # layer-0 forward outputs
            pltpu.VMEM((S, B, HIDDEN), jnp.float32),   # layer-0 backward outputs
        ],
        compiler_params=pltpu.CompilerParams(vmem_limit_bytes=32 * 1024 * 1024),
    )(*args)


# ----------------------------- parameters -----------------------------
def init_params(key):
    def normal(k, shape):
        return 0.1 * jax.random.normal(k, shape, dtype=jnp.float32)

    keys = iter(jax.random.split(key, 64))
    lstm = []
    for l in range(NUM_LAYERS):
        in_dim = INPUT_SIZE if l == 0 else NUM_DIRS * HIDDEN
        dirs = []
        for _ in range(NUM_DIRS):
            w_ih = normal(next(keys), (in_dim, 4 * HIDDEN))        # x @ W_ih
            w_hh = normal(next(keys), (HIDDEN, 4 * HIDDEN))        # h @ W_hh
            b_ih = normal(next(keys), (4 * HIDDEN,))
            b_hh = normal(next(keys), (4 * HIDDEN,))
            dirs.append({"w_ih": w_ih, "w_hh": w_hh,
                         "b": (b_ih + b_hh).reshape(1, 4 * HIDDEN)})
        lstm.append(dirs)
    emo_w = normal(next(keys), (CONCAT_DIM, EMO_DIM))
    emo_b = jnp.zeros((1, EMO_DIM), jnp.float32)
    return {"lstm": lstm, "emo_w": emo_w, "emo_b": emo_b}


# ----------------------------- pure-JAX reference -----------------------------
def reference_forward(params, x, lengths):
    B, S, _ = x.shape
    H = HIDDEN

    def run_dir(inp, p, reverse):
        h = jnp.zeros((B, H), jnp.float32)
        c = jnp.zeros((B, H), jnp.float32)
        outs = [None] * S
        order = range(S - 1, -1, -1) if reverse else range(S)
        for t in order:
            g = (jnp.dot(inp[:, t, :], p["w_ih"])
                 + jnp.dot(h, p["w_hh"]) + p["b"][0])
            i_g = jax.nn.sigmoid(g[:, 0:H])
            f_g = jax.nn.sigmoid(g[:, H:2 * H])
            g_g = jnp.tanh(g[:, 2 * H:3 * H])
            o_g = jax.nn.sigmoid(g[:, 3 * H:4 * H])
            c_new = f_g * c + i_g * g_g
            h_new = o_g * jnp.tanh(c_new)
            valid = (lengths > t)[:, None]
            h = jnp.where(valid, h_new, h)
            c = jnp.where(valid, c_new, c)
            outs[t] = h
        return jnp.stack(outs, axis=1), h

    seq = x.astype(jnp.float32)
    h_n = []
    for layer in params["lstm"]:
        pf, pb = layer
        of, hf = run_dir(seq, pf, reverse=False)
        ob, hb = run_dir(seq, pb, reverse=True)
        h_n += [hf, hb]
        seq = jnp.concatenate([of, ob], axis=-1)
    hcat = jnp.concatenate(h_n, axis=1)                     # 'concat' assemble
    y = jnp.dot(jnp.maximum(hcat, 0.0), params["emo_w"]) + params["emo_b"][0]
    return y


# ----------------------------- main -----------------------------
if __name__ == "__main__":
    key = jax.random.PRNGKey(0)
    pkey, xkey = jax.random.split(key)
    params = init_params(pkey)

    x = jax.random.normal(xkey, (BATCH, SEQ, INPUT_SIZE), dtype=jnp.float32)
    lengths = jnp.array([SEQ, 5], dtype=jnp.int32)          # padded + lengths

    out = emotion_embedding_forward(params, x, lengths)
    out = jax.block_until_ready(out)
    assert out.shape == (BATCH, EMO_DIM)

    with jax.default_matmul_precision("highest"):
        ref = reference_forward(params, x, lengths)
    ref = jax.block_until_ready(ref)
    max_err = float(jnp.max(jnp.abs(out - ref)))
    assert jnp.allclose(out, ref, atol=2e-3, rtol=2e-3), max_err

    print("KERNEL_OK")
</pallas_src>

<mosaic_0001>
module attributes {stable_mosaic.version = 11 : i64} {
  func.func @_emotion_embedding_kernel(%arg0: memref<8x2x32xf32, #tpu.memory_space<vmem>>, %arg1: memref<2x1xi32, #tpu.memory_space<vmem>>, %arg2: memref<32x128xf32, #tpu.memory_space<vmem>>, %arg3: memref<32x128xf32, #tpu.memory_space<vmem>>, %arg4: memref<1x128xf32, #tpu.memory_space<vmem>>, %arg5: memref<32x128xf32, #tpu.memory_space<vmem>>, %arg6: memref<32x128xf32, #tpu.memory_space<vmem>>, %arg7: memref<1x128xf32, #tpu.memory_space<vmem>>, %arg8: memref<64x128xf32, #tpu.memory_space<vmem>>, %arg9: memref<32x128xf32, #tpu.memory_space<vmem>>, %arg10: memref<1x128xf32, #tpu.memory_space<vmem>>, %arg11: memref<64x128xf32, #tpu.memory_space<vmem>>, %arg12: memref<32x128xf32, #tpu.memory_space<vmem>>, %arg13: memref<1x128xf32, #tpu.memory_space<vmem>>, %arg14: memref<128x32xf32, #tpu.memory_space<vmem>>, %arg15: memref<1x32xf32, #tpu.memory_space<vmem>>, %arg16: memref<2x32xf32, #tpu.memory_space<vmem>>, %arg17: memref<8x2x32xf32, #tpu.memory_space<vmem>>, %arg18: memref<8x2x32xf32, #tpu.memory_space<vmem>>) attributes {dimension_semantics = [], scalar_prefetch = 0 : i64, scratch_operands = 2 : i64, tpu.core_type = #tpu.core_type<tc>} {
    %c0 = arith.constant 0 : index
    %c0_0 = arith.constant 0 : index
    %0 = vector.load %arg1[%c0, %c0_0] : memref<2x1xi32, #tpu.memory_space<vmem>>, vector<2x1xi32>
    %c0_1 = arith.constant 0 : index
    %c0_2 = arith.constant 0 : index
    %1 = vector.load %arg2[%c0_1, %c0_2] : memref<32x128xf32, #tpu.memory_space<vmem>>, vector<32x128xf32>
    %c0_3 = arith.constant 0 : index
    %c0_4 = arith.constant 0 : index
    %2 = vector.load %arg5[%c0_3, %c0_4] : memref<32x128xf32, #tpu.memory_space<vmem>>, vector<32x128xf32>
    %c0_5 = arith.constant 0 : index
    %c0_6 = arith.constant 0 : index
    %3 = vector.load %arg4[%c0_5, %c0_6] : memref<1x128xf32, #tpu.memory_space<vmem>>, vector<1x128xf32>
    %4 = vector.shape_cast %3 : vector<1x128xf32> to vector<1x128xf32>
    %5 = vector.broadcast %4 : vector<1x128xf32> to vector<2x128xf32>
    %c0_7 = arith.constant 0 : index
    %c0_8 = arith.constant 0 : index
    %6 = vector.load %arg7[%c0_7, %c0_8] : memref<1x128xf32, #tpu.memory_space<vmem>>, vector<1x128xf32>
    %7 = vector.shape_cast %6 : vector<1x128xf32> to vector<1x128xf32>
    %8 = vector.broadcast %7 : vector<1x128xf32> to vector<2x128xf32>
    %c0_9 = arith.constant 0 : index
    %c0_10 = arith.constant 0 : index
    %9 = vector.load %arg3[%c0_9, %c0_10] : memref<32x128xf32, #tpu.memory_space<vmem>>, vector<32x128xf32>
    %cst = arith.constant 0.000000e+00 : f32
    %10 = vector.broadcast %cst : f32 to vector<2x32xf32>
    %c0_i32 = arith.constant 0 : i32
    %11 = arith.index_cast %c0_i32 : i32 to index
    %c0_11 = arith.constant 0 : index
    %c0_12 = arith.constant 0 : index
    %12 = vector.load %arg0[%11, %c0_11, %c0_12] : memref<8x2x32xf32, #tpu.memory_space<vmem>>, vector<1x2x32xf32>
    %13 = vector.shape_cast %12 : vector<1x2x32xf32> to vector<2x32xf32>
    %cst_13 = arith.constant dense<0.000000e+00> : vector<2x128xf32>
    %14 = tpu.matmul %13, %1, %cst_13 {dimension_numbers = #tpu.dot_dimension_numbers<[1], [0], [0], [1], [0, 0, 1, 1], [], []>} : vector<2x32xf32>, vector<32x128xf32>, vector<2x128xf32> -> vector<2x128xf32>
    %15 = arith.addf %14, %5 : vector<2x128xf32>
    %cst_14 = arith.constant dense<0.000000e+00> : vector<2x128xf32>
    %16 = tpu.matmul %10, %9, %cst_14 {dimension_numbers = #tpu.dot_dimension_numbers<[1], [0], [0], [1], [0, 0, 1, 1], [], []>} : vector<2x32xf32>, vector<32x128xf32>, vector<2x128xf32> -> vector<2x128xf32>
    %17 = arith.addf %15, %16 : vector<2x128xf32>
    %18 = vector.extract_strided_slice %17 {offsets = [0, 0], sizes = [2, 32], strides = [1, 1]} : vector<2x128xf32> to vector<2x32xf32>
    %19 = arith.negf %18 : vector<2x32xf32>
    %20 = math.exp %19 : vector<2x32xf32>
    %cst_15 = arith.constant 1.000000e+00 : f32
    %21 = vector.broadcast %cst_15 : f32 to vector<2x32xf32>
    %22 = arith.addf %21, %20 : vector<2x32xf32>
    %23 = arith.divf %21, %22 : vector<2x32xf32>
    %24 = vector.extract_strided_slice %17 {offsets = [0, 32], sizes = [2, 32], strides = [1, 1]} : vector<2x128xf32> to vector<2x32xf32>
    %25 = arith.negf %24 : vector<2x32xf32>
    %26 = math.exp %25 : vector<2x32xf32>
    %cst_16 = arith.constant 1.000000e+00 : f32
    %27 = vector.broadcast %cst_16 : f32 to vector<2x32xf32>
    %28 = arith.addf %27, %26 : vector<2x32xf32>
    %29 = arith.divf %27, %28 : vector<2x32xf32>
    %30 = vector.extract_strided_slice %17 {offsets = [0, 64], sizes = [2, 32], strides = [1, 1]} : vector<2x128xf32> to vector<2x32xf32>
    %31 = math.tanh %30 : vector<2x32xf32>
    %32 = vector.extract_strided_slice %17 {offsets = [0, 96], sizes = [2, 32], strides = [1, 1]} : vector<2x128xf32> to vector<2x32xf32>
    %33 = arith.negf %32 : vector<2x32xf32>
    %34 = math.exp %33 : vector<2x32xf32>
    %cst_17 = arith.constant 1.000000e+00 : f32
    %35 = vector.broadcast %cst_17 : f32 to vector<2x32xf32>
    %36 = arith.addf %35, %34 : vector<2x32xf32>
    %37 = arith.divf %35, %36 : vector<2x32xf32>
    %38 = arith.mulf %29, %10 : vector<2x32xf32>
    %39 = arith.mulf %23, %31 : vector<2x32xf32>
    %40 = arith.addf %38, %39 : vector<2x32xf32>
    %41 = math.tanh %40 : vector<2x32xf32>
    %42 = arith.mulf %37, %41 : vector<2x32xf32>
    %43 = vector.broadcast %c0_i32 : i32 to vector<2x1xi32>
    %44 = arith.cmpi sgt, %0, %43 : vector<2x1xi32>
    %45 = vector.shape_cast %44 : vector<2x1xi1> to vector<2x1xi1>
    %46 = vector.broadcast %45 : vector<2x1xi1> to vector<2x32xi1>
    %47 = arith.select %46, %42, %10 : vector<2x32xi1>, vector<2x32xf32>
    %48 = vector.shape_cast %44 : vector<2x1xi1> to vector<2x1xi1>
    %49 = vector.broadcast %48 : vector<2x1xi1> to vector<2x32xi1>
    %50 = arith.select %49, %40, %10 : vector<2x32xi1>, vector<2x32xf32>
    %51 = arith.index_cast %c0_i32 : i32 to index
    %c0_18 = arith.constant 0 : index
    %c0_19 = arith.constant 0 : index
    %52 = vector.load %arg17[%51, %c0_18, %c0_19] : memref<8x2x32xf32, #tpu.memory_space<vmem>>, vector<1x2x32xf32>
    %53 = vector.shape_cast %52 : vector<1x2x32xf32> to vector<2x32xf32>
    %54 = vector.shape_cast %47 : vector<2x32xf32> to vector<1x2x32xf32>
    tpu.vector_store %arg17[%51, %c0_18, %c0_19], %54 {strides = array<i32>} : memref<8x2x32xf32, #tpu.memory_space<vmem>>, vector<1x2x32xf32>,
    %c1_i32 = arith.constant 1 : i32
    %55 = arith.index_cast %c1_i32 : i32 to index
    %c0_20 = arith.constant 0 : index
    %c0_21 = arith.constant 0 : index
    %56 = vector.load %arg0[%55, %c0_20, %c0_21] : memref<8x2x32xf32, #tpu.memory_space<vmem>>, vector<1x2x32xf32>
    %57 = vector.shape_cast %56 : vector<1x2x32xf32> to vector<2x32xf32>
    %cst_22 = arith.constant dense<0.000000e+00> : vector<2x128xf32>
    %58 = tpu.matmul %57, %1, %cst_22 {dimension_numbers = #tpu.dot_dimension_numbers<[1], [0], [0], [1], [0, 0, 1, 1], [], []>} : vector<2x32xf32>, vector<32x128xf32>, vector<2x128xf32> -> vector<2x128xf32>
    %59 = arith.addf %58, %5 : vector<2x128xf32>
    %cst_23 = arith.constant dense<0.000000e+00> : vector<2x128xf32>
    %60 = tpu.matmul %47, %9, %cst_23 {dimension_numbers = #tpu.dot_dimension_numbers<[1], [0], [0], [1], [0, 0, 1, 1], [], []>} : vector<2x32xf32>, vector<32x128xf32>, vector<2x128xf32> -> vector<2x128xf32>
    %61 = arith.addf %59, %60 : vector<2x128xf32>
    %62 = vector.extract_strided_slice %61 {offsets = [0, 0], sizes = [2, 32], strides = [1, 1]} : vector<2x128xf32> to vector<2x32xf32>
    %63 = arith.negf %62 : vector<2x32xf32>
    %64 = math.exp %63 : vector<2x32xf32>
    %cst_24 = arith.constant 1.000000e+00 : f32
    %65 = vector.broadcast %cst_24 : f32 to vector<2x32xf32>
    %66 = arith.addf %65, %64 : vector<2x32xf32>
    %67 = arith.divf %65, %66 : vector<2x32xf32>
    %68 = vector.extract_strided_slice %61 {offsets = [0, 32], sizes = [2, 32], strides = [1, 1]} : vector<2x128xf32> to vector<2x32xf32>
    %69 = arith.negf %68 : vector<2x32xf32>
    %70 = math.exp %69 : vector<2x32xf32>
    %cst_25 = arith.constant 1.000000e+00 : f32
    %71 = vector.broadcast %cst_25 : f32 to vector<2x32xf32>
    %72 = arith.addf %71, %70 : vector<2x32xf32>
    %73 = arith.divf %71, %72 : vector<2x32xf32>
    %74 = vector.extract_strided_slice %61 {offsets = [0, 64], sizes = [2, 32], strides = [1, 1]} : vector<2x128xf32> to vector<2x32xf32>
    %75 = math.tanh %74 : vector<2x32xf32>
    %76 = vector.extract_strided_slice %61 {offsets = [0, 96], sizes = [2, 32], strides = [1, 1]} : vector<2x128xf32> to vector<2x32xf32>
    %77 = arith.negf %76 : vector<2x32xf32>
    %78 = math.exp %77 : vector<2x32xf32>
    %cst_26 = arith.constant 1.000000e+00 : f32
    %79 = vector.broadcast %cst_26 : f32 to vector<2x32xf32>
    %80 = arith.addf %79, %78 : vector<2x32xf32>
    %81 = arith.divf %79, %80 : vector<2x32xf32>
    %82 = arith.mulf %73, %50 : vector<2x32xf32>
    %83 = arith.mulf %67, %75 : vector<2x32xf32>
    %84 = arith.addf %82, %83 : vector<2x32xf32>
    %85 = math.tanh %84 : vector<2x32xf32>
    %86 = arith.mulf %81, %85 : vector<2x32xf32>
    %87 = vector.broadcast %c1_i32 : i32 to vector<2x1xi32>
    %88 = arith.cmpi sgt, %0, %87 : vector<2x1xi32>
    %89 = vector.shape_cast %88 : vector<2x1xi1> to vector<2x1xi1>
    %90 = vector.broadcast %89 : vector<2x1xi1> to vector<2x32xi1>
    %91 = arith.select %90, %86, %47 : vector<2x32xi1>, vector<2x32xf32>
    %92 = vector.shape_cast %88 : vector<2x1xi1> to vector<2x1xi1>
    %93 = vector.broadcast %92 : vector<2x1xi1> to vector<2x32xi1>
    %94 = arith.select %93, %84, %50 : vector<2x32xi1>, vector<2x32xf32>
    %95 = arith.index_cast %c1_i32 : i32 to index
    %c0_27 = arith.constant 0 : index
    %c0_28 = arith.constant 0 : index
    %96 = vector.load %arg17[%95, %c0_27, %c0_28] : memref<8x2x32xf32, #tpu.memory_space<vmem>>, vector<1x2x32xf32>
    %97 = vector.shape_cast %96 : vector<1x2x32xf32> to vector<2x32xf32>
    %98 = vector.shape_cast %91 : vector<2x32xf32> to vector<1x2x32xf32>
    tpu.vector_store %arg17[%95, %c0_27, %c0_28], %98 {strides = array<i32>} : memref<8x2x32xf32, #tpu.memory_space<vmem>>, vector<1x2x32xf32>,
    %c2_i32 = arith.constant 2 : i32
    %99 = arith.index_cast %c2_i32 : i32 to index
    %c0_29 = arith.constant 0 : index
    %c0_30 = arith.constant 0 : index
    %100 = vector.load %arg0[%99, %c0_29, %c0_30] : memref<8x2x32xf32, #tpu.memory_space<vmem>>, vector<1x2x32xf32>
    %101 = vector.shape_cast %100 : vector<1x2x32xf32> to vector<2x32xf32>
    %cst_31 = arith.constant dense<0.000000e+00> : vector<2x128xf32>
    %102 = tpu.matmul %101, %1, %cst_31 {dimension_numbers = #tpu.dot_dimension_numbers<[1], [0], [0], [1], [0, 0, 1, 1], [], []>} : vector<2x32xf32>, vector<32x128xf32>, vector<2x128xf32> -> vector<2x128xf32>
    %103 = arith.addf %102, %5 : vector<2x128xf32>
    %cst_32 = arith.constant dense<0.000000e+00> : vector<2x128xf32>
    %104 = tpu.matmul %91, %9, %cst_32 {dimension_numbers = #tpu.dot_dimension_numbers<[1], [0], [0], [1], [0, 0, 1, 1], [], []>} : vector<2x32xf32>, vector<32x128xf32>, vector<2x128xf32> -> vector<2x128xf32>
    %105 = arith.addf %103, %104 : vector<2x128xf32>
    %106 = vector.extract_strided_slice %105 {offsets = [0, 0], sizes = [2, 32], strides = [1, 1]} : vector<2x128xf32> to vector<2x32xf32>
    %107 = arith.negf %106 : vector<2x32xf32>
    %108 = math.exp %107 : vector<2x32xf32>
    %cst_33 = arith.constant 1.000000e+00 : f32
    %109 = vector.broadcast %cst_33 : f32 to vector<2x32xf32>
    %110 = arith.addf %109, %108 : vector<2x32xf32>
    %111 = arith.divf %109, %110 : vector<2x32xf32>
    %112 = vector.extract_strided_slice %105 {offsets = [0, 32], sizes = [2, 32], strides = [1, 1]} : vector<2x128xf32> to vector<2x32xf32>
    %113 = arith.negf %112 : vector<2x32xf32>
    %114 = math.exp %113 : vector<2x32xf32>
    %cst_34 = arith.constant 1.000000e+00 : f32
    %115 = vector.broadcast %cst_34 : f32 to vector<2x32xf32>
    %116 = arith.addf %115, %114 : vector<2x32xf32>
    %117 = arith.divf %115, %116 : vector<2x32xf32>
    %118 = vector.extract_strided_slice %105 {offsets = [0, 64], sizes = [2, 32], strides = [1, 1]} : vector<2x128xf32> to vector<2x32xf32>
    %119 = math.tanh %118 : vector<2x32xf32>
    %120 = vector.extract_strided_slice %105 {offsets = [0, 96], sizes = [2, 32], strides = [1, 1]} : vector<2x128xf32> to vector<2x32xf32>
    %121 = arith.negf %120 : vector<2x32xf32>
    %122 = math.exp %121 : vector<2x32xf32>
    %cst_35 = arith.constant 1.000000e+00 : f32
    %123 = vector.broadcast %cst_35 : f32 to vector<2x32xf32>
    %124 = arith.addf %123, %122 : vector<2x32xf32>
    %125 = arith.divf %123, %124 : vector<2x32xf32>
    %126 = arith.mulf %117, %94 : vector<2x32xf32>
    %127 = arith.mulf %111, %119 : vector<2x32xf32>
    %128 = arith.addf %126, %127 : vector<2x32xf32>
    %129 = math.tanh %128 : vector<2x32xf32>
    %130 = arith.mulf %125, %129 : vector<2x32xf32>
    %131 = vector.broadcast %c2_i32 : i32 to vector<2x1xi32>
    %132 = arith.cmpi sgt, %0, %131 : vector<2x1xi32>
    %133 = vector.shape_cast %132 : vector<2x1xi1> to vector<2x1xi1>
    %134 = vector.broadcast %133 : vector<2x1xi1> to vector<2x32xi1>
    %135 = arith.select %134, %130, %91 : vector<2x32xi1>, vector<2x32xf32>
    %136 = vector.shape_cast %132 : vector<2x1xi1> to vector<2x1xi1>
    %137 = vector.broadcast %136 : vector<2x1xi1> to vector<2x32xi1>
    %138 = arith.select %137, %128, %94 : vector<2x32xi1>, vector<2x32xf32>
    %139 = arith.index_cast %c2_i32 : i32 to index
    %c0_36 = arith.constant 0 : index
    %c0_37 = arith.constant 0 : index
    %140 = vector.load %arg17[%139, %c0_36, %c0_37] : memref<8x2x32xf32, #tpu.memory_space<vmem>>, vector<1x2x32xf32>
    %141 = vector.shape_cast %140 : vector<1x2x32xf32> to vector<2x32xf32>
    %142 = vector.shape_cast %135 : vector<2x32xf32> to vector<1x2x32xf32>
    tpu.vector_store %arg17[%139, %c0_36, %c0_37], %142 {strides = array<i32>} : memref<8x2x32xf32, #tpu.memory_space<vmem>>, vector<1x2x32xf32>,
    %c3_i32 = arith.constant 3 : i32
    %143 = arith.index_cast %c3_i32 : i32 to index
    %c0_38 = arith.constant 0 : index
    %c0_39 = arith.constant 0 : index
    %144 = vector.load %arg0[%143, %c0_38, %c0_39] : memref<8x2x32xf32, #tpu.memory_space<vmem>>, vector<1x2x32xf32>
    %145 = vector.shape_cast %144 : vector<1x2x32xf32> to vector<2x32xf32>
    %cst_40 = arith.constant dense<0.000000e+00> : vector<2x128xf32>
    %146 = tpu.matmul %145, %1, %cst_40 {dimension_numbers = #tpu.dot_dimension_numbers<[1], [0], [0], [1], [0, 0, 1, 1], [], []>} : vector<2x32xf32>, vector<32x128xf32>, vector<2x128xf32> -> vector<2x128xf32>
    %147 = arith.addf %146, %5 : vector<2x128xf32>
    %cst_41 = arith.constant dense<0.000000e+00> : vector<2x128xf32>
    %148 = tpu.matmul %135, %9, %cst_41 {dimension_numbers = #tpu.dot_dimension_numbers<[1], [0], [0], [1], [0, 0, 1, 1], [], []>} : vector<2x32xf32>, vector<32x128xf32>, vector<2x128xf32> -> vector<2x128xf32>
    %149 = arith.addf %147, %148 : vector<2x128xf32>
    %150 = vector.extract_strided_slice %149 {offsets = [0, 0], sizes = [2, 32], strides = [1, 1]} : vector<2x128xf32> to vector<2x32xf32>
    %151 = arith.negf %150 : vector<2x32xf32>
    %152 = math.exp %151 : vector<2x32xf32>
    %cst_42 = arith.constant 1.000000e+00 : f32
    %153 = vector.broadcast %cst_42 : f32 to vector<2x32xf32>
    %154 = arith.addf %153, %152 : vector<2x32xf32>
    %155 = arith.divf %153, %154 : vector<2x32xf32>
    %156 = vector.extract_strided_slice %149 {offsets = [0, 32], sizes = [2, 32], strides = [1, 1]} : vector<2x128xf32> to vector<2x32xf32>
    %157 = arith.negf %156 : vector<2x32xf32>
    %158 = math.exp %157 : vector<2x32xf32>
    %cst_43 = arith.constant 1.000000e+00 : f32
    %159 = vector.broadcast %cst_43 : f32 to vector<2x32xf32>
    %160 = arith.addf %159, %158 : vector<2x32xf32>
    %161 = arith.divf %159, %160 : vector<2x32xf32>
    %162 = vector.extract_strided_slice %149 {offsets = [0, 64], sizes = [2, 32], strides = [1, 1]} : vector<2x128xf32> to vector<2x32xf32>
    %163 = math.tanh %162 : vector<2x32xf32>
    %164 = vector.extract_strided_slice %149 {offsets = [0, 96], sizes = [2, 32], strides = [1, 1]} : vector<2x128xf32> to vector<2x32xf32>
    %165 = arith.negf %164 : vector<2x32xf32>
    %166 = math.exp %165 : vector<2x32xf32>
    %cst_44 = arith.constant 1.000000e+00 : f32
    %167 = vector.broadcast %cst_44 : f32 to vector<2x32xf32>
    %168 = arith.addf %167, %166 : vector<2x32xf32>
    %169 = arith.divf %167, %168 : vector<2x32xf32>
    %170 = arith.mulf %161, %138 : vector<2x32xf32>
    %171 = arith.mulf %155, %163 : vector<2x32xf32>
    %172 = arith.addf %170, %171 : vector<2x32xf32>
    %173 = math.tanh %172 : vector<2x32xf32>
    %174 = arith.mulf %169, %173 : vector<2x32xf32>
    %175 = vector.broadcast %c3_i32 : i32 to vector<2x1xi32>
    %176 = arith.cmpi sgt, %0, %175 : vector<2x1xi32>
    %177 = vector.shape_cast %176 : vector<2x1xi1> to vector<2x1xi1>
    %178 = vector.broadcast %177 : vector<2x1xi1> to vector<2x32xi1>
    %179 = arith.select %178, %174, %135 : vector<2x32xi1>, vector<2x32xf32>
    %180 = vector.shape_cast %176 : vector<2x1xi1> to vector<2x1xi1>
    %181 = vector.broadcast %180 : vector<2x1xi1> to vector<2x32xi1>
    %182 = arith.select %181, %172, %138 : vector<2x32xi1>, vector<2x32xf32>
    %183 = arith.index_cast %c3_i32 : i32 to index
    %c0_45 = arith.constant 0 : index
    %c0_46 = arith.constant 0 : index
    %184 = vector.load %arg17[%183, %c0_45, %c0_46] : memref<8x2x32xf32, #tpu.memory_space<vmem>>, vector<1x2x32xf32>
    %185 = vector.shape_cast %184 : vector<1x2x32xf32> to vector<2x32xf32>
    %186 = vector.shape_cast %179 : vector<2x32xf32> to vector<1x2x32xf32>
    tpu.vector_store %arg17[%183, %c0_45, %c0_46], %186 {strides = array<i32>} : memref<8x2x32xf32, #tpu.memory_space<vmem>>, vector<1x2x32xf32>,
    %c4_i32 = arith.constant 4 : i32
    %187 = arith.index_cast %c4_i32 : i32 to index
    %c0_47 = arith.constant 0 : index
    %c0_48 = arith.constant 0 : index
    %188 = vector.load %arg0[%187, %c0_47, %c0_48] : memref<8x2x32xf32, #tpu.memory_space<vmem>>, vector<1x2x32xf32>
    %189 = vector.shape_cast %188 : vector<1x2x32xf32> to vector<2x32xf32>
    %cst_49 = arith.constant dense<0.000000e+00> : vector<2x128xf32>
    %190 = tpu.matmul %189, %1, %cst_49 {dimension_numbers = #tpu.dot_dimension_numbers<[1], [0], [0], [1], [0, 0, 1, 1], [], []>} : vector<2x32xf32>, vector<32x128xf32>, vector<2x128xf32> -> vector<2x128xf32>
    %191 = arith.addf %190, %5 : vector<2x128xf32>
    %cst_50 = arith.constant dense<0.000000e+00> : vector<2x128xf32>
    %192 = tpu.matmul %179, %9, %cst_50 {dimension_numbers = #tpu.dot_dimension_numbers<[1], [0], [0], [1], [0, 0, 1, 1], [], []>} : vector<2x32xf32>, vector<32x128xf32>, vector<2x128xf32> -> vector<2x128xf32>
    %193 = arith.addf %191, %192 : vector<2x128xf32>
    %194 = vector.extract_strided_slice %193 {offsets = [0, 0], sizes = [2, 32], strides = [1, 1]} : vector<2x128xf32> to vector<2x32xf32>
    %195 = arith.negf %194 : vector<2x32xf32>
    %196 = math.exp %195 : vector<2x32xf32>
    %cst_51 = arith.constant 1.000000e+00 : f32
    %197 = vector.broadcast %cst_51 : f32 to vector<2x32xf32>
    %198 = arith.addf %197, %196 : vector<2x32xf32>
    %199 = arith.divf %197, %198 : vector<2x32xf32>
    %200 = vector.extract_strided_slice %193 {offsets = [0, 32], sizes = [2, 32], strides = [1, 1]} : vector<2x128xf32> to vector<2x32xf32>
    %201 = arith.negf %200 : vector<2x32xf32>
    %202 = math.exp %201 : vector<2x32xf32>
    %cst_52 = arith.constant 1.000000e+00 : f32
    %203 = vector.broadcast %cst_52 : f32 to vector<2x32xf32>
    %204 = arith.addf %203, %202 : vector<2x32xf32>
    %205 = arith.divf %203, %204 : vector<2x32xf32>
    %206 = vector.extract_strided_slice %193 {offsets = [0, 64], sizes = [2, 32], strides = [1, 1]} : vector<2x128xf32> to vector<2x32xf32>
    %207 = math.tanh %206 : vector<2x32xf32>
    %208 = vector.extract_strided_slice %193 {offsets = [0, 96], sizes = [2, 32], strides = [1, 1]} : vector<2x128xf32> to vector<2x32xf32>
    %209 = arith.negf %208 : vector<2x32xf32>
    %210 = math.exp %209 : vector<2x32xf32>
    %cst_53 = arith.constant 1.000000e+00 : f32
    %211 = vector.broadcast %cst_53 : f32 to vector<2x32xf32>
    %212 = arith.addf %211, %210 : vector<2x32xf32>
    %213 = arith.divf %211, %212 : vector<2x32xf32>
    %214 = arith.mulf %205, %182 : vector<2x32xf32>
    %215 = arith.mulf %199, %207 : vector<2x32xf32>
    %216 = arith.addf %214, %215 : vector<2x32xf32>
    %217 = math.tanh %216 : vector<2x32xf32>
    %218 = arith.mulf %213, %217 : vector<2x32xf32>
    %219 = vector.broadcast %c4_i32 : i32 to vector<2x1xi32>
    %220 = arith.cmpi sgt, %0, %219 : vector<2x1xi32>
    %221 = vector.shape_cast %220 : vector<2x1xi1> to vector<2x1xi1>
    %222 = vector.broadcast %221 : vector<2x1xi1> to vector<2x32xi1>
    %223 = arith.select %222, %218, %179 : vector<2x32xi1>, vector<2x32xf32>
    %224 = vector.shape_cast %220 : vector<2x1xi1> to vector<2x1xi1>
    %225 = vector.broadcast %224 : vector<2x1xi1> to vector<2x32xi1>
    %226 = arith.select %225, %216, %182 : vector<2x32xi1>, vector<2x32xf32>
    %227 = arith.index_cast %c4_i32 : i32 to index
    %c0_54 = arith.constant 0 : index
    %c0_55 = arith.constant 0 : index
    %228 = vector.load %arg17[%227, %c0_54, %c0_55] : memref<8x2x32xf32, #tpu.memory_space<vmem>>, vector<1x2x32xf32>
    %229 = vector.shape_cast %228 : vector<1x2x32xf32> to vector<2x32xf32>
    %230 = vector.shape_cast %223 : vector<2x32xf32> to vector<1x2x32xf32>
    tpu.vector_store %arg17[%227, %c0_54, %c0_55], %230 {strides = array<i32>} : memref<8x2x32xf32, #tpu.memory_space<vmem>>, vector<1x2x32xf32>,
    %c5_i32 = arith.constant 5 : i32
    %231 = arith.index_cast %c5_i32 : i32 to index
    %c0_56 = arith.constant 0 : index
    %c0_57 = arith.constant 0 : index
    %232 = vector.load %arg0[%231, %c0_56, %c0_57] : memref<8x2x32xf32, #tpu.memory_space<vmem>>, vector<1x2x32xf32>
    %233 = vector.shape_cast %232 : vector<1x2x32xf32> to vector<2x32xf32>
    %cst_58 = arith.constant dense<0.000000e+00> : vector<2x128xf32>
    %234 = tpu.matmul %233, %1, %cst_58 {dimension_numbers = #tpu.dot_dimension_numbers<[1], [0], [0], [1], [0, 0, 1, 1], [], []>} : vector<2x32xf32>, vector<32x128xf32>, vector<2x128xf32> -> vector<2x128xf32>
    %235 = arith.addf %234, %5 : vector<2x128xf32>
    %cst_59 = arith.constant dense<0.000000e+00> : vector<2x128xf32>
    %236 = tpu.matmul %223, %9, %cst_59 {dimension_numbers = #tpu.dot_dimension_numbers<[1], [0], [0], [1], [0, 0, 1, 1], [], []>} : vector<2x32xf32>, vector<32x128xf32>, vector<2x128xf32> -> vector<2x128xf32>
    %237 = arith.addf %235, %236 : vector<2x128xf32>
    %238 = vector.extract_strided_slice %237 {offsets = [0, 0], sizes = [2, 32], strides = [1, 1]} : vector<2x128xf32> to vector<2x32xf32>
    %239 = arith.negf %238 : vector<2x32xf32>
    %240 = math.exp %239 : vector<2x32xf32>
    %cst_60 = arith.constant 1.000000e+00 : f32
    %241 = vector.broadcast %cst_60 : f32 to vector<2x32xf32>
    %242 = arith.addf %241, %240 : vector<2x32xf32>
    %243 = arith.divf %241, %242 : vector<2x32xf32>
    %244 = vector.extract_strided_slice %237 {offsets = [0, 32], sizes = [2, 32], strides = [1, 1]} : vector<2x128xf32> to vector<2x32xf32>
    %245 = arith.negf %244 : vector<2x32xf32>
    %246 = math.exp %245 : vector<2x32xf32>
    %cst_61 = arith.constant 1.000000e+00 : f32
    %247 = vector.broadcast %cst_61 : f32 to vector<2x32xf32>
    %248 = arith.addf %247, %246 : vector<2x32xf32>
    %249 = arith.divf %247, %248 : vector<2x32xf32>
    %250 = vector.extract_strided_slice %237 {offsets = [0, 64], sizes = [2, 32], strides = [1, 1]} : vector<2x128xf32> to vector<2x32xf32>
    %251 = math.tanh %250 : vector<2x32xf32>
    %252 = vector.extract_strided_slice %237 {offsets = [0, 96], sizes = [2, 32], strides = [1, 1]} : vector<2x128xf32> to vector<2x32xf32>
    %253 = arith.negf %252 : vector<2x32xf32>
    %254 = math.exp %253 : vector<2x32xf32>
    %cst_62 = arith.constant 1.000000e+00 : f32
    %255 = vector.broadcast %cst_62 : f32 to vector<2x32xf32>
    %256 = arith.addf %255, %254 : vector<2x32xf32>
    %257 = arith.divf %255, %256 : vector<2x32xf32>
    %258 = arith.mulf %249, %226 : vector<2x32xf32>
    %259 = arith.mulf %243, %251 : vector<2x32xf32>
    %260 = arith.addf %258, %259 : vector<2x32xf32>
    %261 = math.tanh %260 : vector<2x32xf32>
    %262 = arith.mulf %257, %261 : vector<2x32xf32>
    %263 = vector.broadcast %c5_i32 : i32 to vector<2x1xi32>
    %264 = arith.cmpi sgt, %0, %263 : vector<2x1xi32>
    %265 = vector.shape_cast %264 : vector<2x1xi1> to vector<2x1xi1>
    %266 = vector.broadcast %265 : vector<2x1xi1> to vector<2x32xi1>
    %267 = arith.select %266, %262, %223 : vector<2x32xi1>, vector<2x32xf32>
    %268 = vector.shape_cast %264 : vector<2x1xi1> to vector<2x1xi1>
    %269 = vector.broadcast %268 : vector<2x1xi1> to vector<2x32xi1>
    %270 = arith.select %269, %260, %226 : vector<2x32xi1>, vector<2x32xf32>
    %271 = arith.index_cast %c5_i32 : i32 to index
    %c0_63 = arith.constant 0 : index
    %c0_64 = arith.constant 0 : index
    %272 = vector.load %arg17[%271, %c0_63, %c0_64] : memref<8x2x32xf32, #tpu.memory_space<vmem>>, vector<1x2x32xf32>
    %273 = vector.shape_cast %272 : vector<1x2x32xf32> to vector<2x32xf32>
    %274 = vector.shape_cast %267 : vector<2x32xf32> to vector<1x2x32xf32>
    tpu.vector_store %arg17[%271, %c0_63, %c0_64], %274 {strides = array<i32>} : memref<8x2x32xf32, #tpu.memory_space<vmem>>, vector<1x2x32xf32>,
    %c6_i32 = arith.constant 6 : i32
    %275 = arith.index_cast %c6_i32 : i32 to index
    %c0_65 = arith.constant 0 : index
    %c0_66 = arith.constant 0 : index
    %276 = vector.load %arg0[%275, %c0_65, %c0_66] : memref<8x2x32xf32, #tpu.memory_space<vmem>>, vector<1x2x32xf32>
    %277 = vector.shape_cast %276 : vector<1x2x32xf32> to vector<2x32xf32>
    %cst_67 = arith.constant dense<0.000000e+00> : vector<2x128xf32>
    %278 = tpu.matmul %277, %1, %cst_67 {dimension_numbers = #tpu.dot_dimension_numbers<[1], [0], [0], [1], [0, 0, 1, 1], [], []>} : vector<2x32xf32>, vector<32x128xf32>, vector<2x128xf32> -> vector<2x128xf32>
    %279 = arith.addf %278, %5 : vector<2x128xf32>
    %cst_68 = arith.constant dense<0.000000e+00> : vector<2x128xf32>
    %280 = tpu.matmul %267, %9, %cst_68 {dimension_numbers = #tpu.dot_dimension_numbers<[1], [0], [0], [1], [0, 0, 1, 1], [], []>} : vector<2x32xf32>, vector<32x128xf32>, vector<2x128xf32> -> vector<2x128xf32>
    %281 = arith.addf %279, %280 : vector<2x128xf32>
    %282 = vector.extract_strided_slice %281 {offsets = [0, 0], sizes = [2, 32], strides = [1, 1]} : vector<2x128xf32> to vector<2x32xf32>
    %283 = arith.negf %282 : vector<2x32xf32>
    %284 = math.exp %283 : vector<2x32xf32>
    %cst_69 = arith.constant 1.000000e+00 : f32
    %285 = vector.broadcast %cst_69 : f32 to vector<2x32xf32>
    %286 = arith.addf %285, %284 : vector<2x32xf32>
    %287 = arith.divf %285, %286 : vector<2x32xf32>
    %288 = vector.extract_strided_slice %281 {offsets = [0, 32], sizes = [2, 32], strides = [1, 1]} : vector<2x128xf32> to vector<2x32xf32>
    %289 = arith.negf %288 : vector<2x32xf32>
    %290 = math.exp %289 : vector<2x32xf32>
    %cst_70 = arith.constant 1.000000e+00 : f32
    %291 = vector.broadcast %cst_70 : f32 to vector<2x32xf32>
    %292 = arith.addf %291, %290 : vector<2x32xf32>
    %293 = arith.divf %291, %292 : vector<2x32xf32>
    %294 = vector.extract_strided_slice %281 {offsets = [0, 64], sizes = [2, 32], strides = [1, 1]} : vector<2x128xf32> to vector<2x32xf32>
    %295 = math.tanh %294 : vector<2x32xf32>
    %296 = vector.extract_strided_slice %281 {offsets = [0, 96], sizes = [2, 32], strides = [1, 1]} : vector<2x128xf32> to vector<2x32xf32>
    %297 = arith.negf %296 : vector<2x32xf32>
    %298 = math.exp %297 : vector<2x32xf32>
    %cst_71 = arith.constant 1.000000e+00 : f32
    %299 = vector.broadcast %cst_71 : f32 to vector<2x32xf32>
    %300 = arith.addf %299, %298 : vector<2x32xf32>
    %301 = arith.divf %299, %300 : vector<2x32xf32>
    %302 = arith.mulf %293, %270 : vector<2x32xf32>
    %303 = arith.mulf %287, %295 : vector<2x32xf32>
    %304 = arith.addf %302, %303 : vector<2x32xf32>
    %305 = math.tanh %304 : vector<2x32xf32>
    %306 = arith.mulf %301, %305 : vector<2x32xf32>
    %307 = vector.broadcast %c6_i32 : i32 to vector<2x1xi32>
    %308 = arith.cmpi sgt, %0, %307 : vector<2x1xi32>
    %309 = vector.shape_cast %308 : vector<2x1xi1> to vector<2x1xi1>
    %310 = vector.broadcast %309 : vector<2x1xi1> to vector<2x32xi1>
    %311 = arith.select %310, %306, %267 : vector<2x32xi1>, vector<2x32xf32>
    %312 = vector.shape_cast %308 : vector<2x1xi1> to vector<2x1xi1>
    %313 = vector.broadcast %312 : vector<2x1xi1> to vector<2x32xi1>
    %314 = arith.select %313, %304, %270 : vector<2x32xi1>, vector<2x32xf32>
    %315 = arith.index_cast %c6_i32 : i32 to index
    %c0_72 = arith.constant 0 : index
    %c0_73 = arith.constant 0 : index
    %316 = vector.load %arg17[%315, %c0_72, %c0_73] : memref<8x2x32xf32, #tpu.memory_space<vmem>>, vector<1x2x32xf32>
    %317 = vector.shape_cast %316 : vector<1x2x32xf32> to vector<2x32xf32>
    %318 = vector.shape_cast %311 : vector<2x32xf32> to vector<1x2x32xf32>
    tpu.vector_store %arg17[%315, %c0_72, %c0_73], %318 {strides = array<i32>} : memref<8x2x32xf32, #tpu.memory_space<vmem>>, vector<1x2x32xf32>,
    %c7_i32 = arith.constant 7 : i32
    %319 = arith.index_cast %c7_i32 : i32 to index
    %c0_74 = arith.constant 0 : index
    %c0_75 = arith.constant 0 : index
    %320 = vector.load %arg0[%319, %c0_74, %c0_75] : memref<8x2x32xf32, #tpu.memory_space<vmem>>, vector<1x2x32xf32>
    %321 = vector.shape_cast %320 : vector<1x2x32xf32> to vector<2x32xf32>
    %cst_76 = arith.constant dense<0.000000e+00> : vector<2x128xf32>
    %322 = tpu.matmul %321, %1, %cst_76 {dimension_numbers = #tpu.dot_dimension_numbers<[1], [0], [0], [1], [0, 0, 1, 1], [], []>} : vector<2x32xf32>, vector<32x128xf32>, vector<2x128xf32> -> vector<2x128xf32>
    %323 = arith.addf %322, %5 : vector<2x128xf32>
    %cst_77 = arith.constant dense<0.000000e+00> : vector<2x128xf32>
    %324 = tpu.matmul %311, %9, %cst_77 {dimension_numbers = #tpu.dot_dimension_numbers<[1], [0], [0], [1], [0, 0, 1, 1], [], []>} : vector<2x32xf32>, vector<32x128xf32>, vector<2x128xf32> -> vector<2x128xf32>
    %325 = arith.addf %323, %324 : vector<2x128xf32>
    %326 = vector.extract_strided_slice %325 {offsets = [0, 0], sizes = [2, 32], strides = [1, 1]} : vector<2x128xf32> to vector<2x32xf32>
    %327 = arith.negf %326 : vector<2x32xf32>
    %328 = math.exp %327 : vector<2x32xf32>
    %cst_78 = arith.constant 1.000000e+00 : f32
    %329 = vector.broadcast %cst_78 : f32 to vector<2x32xf32>
    %330 = arith.addf %329, %328 : vector<2x32xf32>
    %331 = arith.divf %329, %330 : vector<2x32xf32>
    %332 = vector.extract_strided_slice %325 {offsets = [0, 32], sizes = [2, 32], strides = [1, 1]} : vector<2x128xf32> to vector<2x32xf32>
    %333 = arith.negf %332 : vector<2x32xf32>
    %334 = math.exp %333 : vector<2x32xf32>
    %cst_79 = arith.constant 1.000000e+00 : f32
    %335 = vector.broadcast %cst_79 : f32 to vector<2x32xf32>
    %336 = arith.addf %335, %334 : vector<2x32xf32>
    %337 = arith.divf %335, %336 : vector<2x32xf32>
    %338 = vector.extract_strided_slice %325 {offsets = [0, 64], sizes = [2, 32], strides = [1, 1]} : vector<2x128xf32> to vector<2x32xf32>
    %339 = math.tanh %338 : vector<2x32xf32>
    %340 = vector.extract_strided_slice %325 {offsets = [0, 96], sizes = [2, 32], strides = [1, 1]} : vector<2x128xf32> to vector<2x32xf32>
    %341 = arith.negf %340 : vector<2x32xf32>
    %342 = math.exp %341 : vector<2x32xf32>
    %cst_80 = arith.constant 1.000000e+00 : f32
    %343 = vector.broadcast %cst_80 : f32 to vector<2x32xf32>
    %344 = arith.addf %343, %342 : vector<2x32xf32>
    %345 = arith.divf %343, %344 : vector<2x32xf32>
    %346 = arith.mulf %337, %314 : vector<2x32xf32>
    %347 = arith.mulf %331, %339 : vector<2x32xf32>
    %348 = arith.addf %346, %347 : vector<2x32xf32>
    %349 = math.tanh %348 : vector<2x32xf32>
    %350 = arith.mulf %345, %349 : vector<2x32xf32>
    %351 = vector.broadcast %c7_i32 : i32 to vector<2x1xi32>
    %352 = arith.cmpi sgt, %0, %351 : vector<2x1xi32>
    %353 = vector.shape_cast %352 : vector<2x1xi1> to vector<2x1xi1>
    %354 = vector.broadcast %353 : vector<2x1xi1> to vector<2x32xi1>
    %355 = arith.select %354, %350, %311 : vector<2x32xi1>, vector<2x32xf32>
    %356 = vector.shape_cast %352 : vector<2x1xi1> to vector<2x1xi1>
    %357 = vector.broadcast %356 : vector<2x1xi1> to vector<2x32xi1>
    %358 = arith.select %357, %348, %314 : vector<2x32xi1>, vector<2x32xf32>
    %359 = arith.index_cast %c7_i32 : i32 to index
    %c0_81 = arith.constant 0 : index
    %c0_82 = arith.constant 0 : index
    %360 = vector.load %arg17[%359, %c0_81, %c0_82] : memref<8x2x32xf32, #tpu.memory_space<vmem>>, vector<1x2x32xf32>
    %361 = vector.shape_cast %360 : vector<1x2x32xf32> to vector<2x32xf32>
    %362 = vector.shape_cast %355 : vector<2x32xf32> to vector<1x2x32xf32>
    tpu.vector_store %arg17[%359, %c0_81, %c0_82], %362 {strides = array<i32>} : memref<8x2x32xf32, #tpu.memory_space<vmem>>, vector<1x2x32xf32>,
    %c8_i32 = arith.constant 8 : i32
    %c0_83 = arith.constant 0 : index
    %c0_84 = arith.constant 0 : index
    %363 = vector.load %arg6[%c0_83, %c0_84] : memref<32x128xf32, #tpu.memory_space<vmem>>, vector<32x128xf32>
    %cst_85 = arith.constant 0.000000e+00 : f32
    %364 = vector.broadcast %cst_85 : f32 to vector<2x32xf32>
    %c0_i32_86 = arith.constant 0 : i32
    %c7_i32_87 = arith.constant 7 : i32
    %365 = arith.subi %c7_i32_87, %c0_i32_86 : i32
    %366 = arith.index_cast %365 : i32 to index
    %c0_88 = arith.constant 0 : index
    %c0_89 = arith.constant 0 : index
    %367 = vector.load %arg0[%366, %c0_88, %c0_89] : memref<8x2x32xf32, #tpu.memory_space<vmem>>, vector<1x2x32xf32>
    %368 = vector.shape_cast %367 : vector<1x2x32xf32> to vector<2x32xf32>
    %cst_90 = arith.constant dense<0.000000e+00> : vector<2x128xf32>
    %369 = tpu.matmul %368, %2, %cst_90 {dimension_numbers = #tpu.dot_dimension_numbers<[1], [0], [0], [1], [0, 0, 1, 1], [], []>} : vector<2x32xf32>, vector<32x128xf32>, vector<2x128xf32> -> vector<2x128xf32>
    %370 = arith.addf %369, %8 : vector<2x128xf32>
    %cst_91 = arith.constant dense<0.000000e+00> : vector<2x128xf32>
    %371 = tpu.matmul %364, %363, %cst_91 {dimension_numbers = #tpu.dot_dimension_numbers<[1], [0], [0], [1], [0, 0, 1, 1], [], []>} : vector<2x32xf32>, vector<32x128xf32>, vector<2x128xf32> -> vector<2x128xf32>
    %372 = arith.addf %370, %371 : vector<2x128xf32>
    %373 = vector.extract_strided_slice %372 {offsets = [0, 0], sizes = [2, 32], strides = [1, 1]} : vector<2x128xf32> to vector<2x32xf32>
    %374 = arith.negf %373 : vector<2x32xf32>
    %375 = math.exp %374 : vector<2x32xf32>
    %cst_92 = arith.constant 1.000000e+00 : f32
    %376 = vector.broadcast %cst_92 : f32 to vector<2x32xf32>
    %377 = arith.addf %376, %375 : vector<2x32xf32>
    %378 = arith.divf %376, %377 : vector<2x32xf32>
    %379 = vector.extract_strided_slice %372 {offsets = [0, 32], sizes = [2, 32], strides = [1, 1]} : vector<2x128xf32> to vector<2x32xf32>
    %380 = arith.negf %379 : vector<2x32xf32>
    %381 = math.exp %380 : vector<2x32xf32>
    %cst_93 = arith.constant 1.000000e+00 : f32
    %382 = vector.broadcast %cst_93 : f32 to vector<2x32xf32>
    %383 = arith.addf %382, %381 : vector<2x32xf32>
    %384 = arith.divf %382, %383 : vector<2x32xf32>
    %385 = vector.extract_strided_slice %372 {offsets = [0, 64], sizes = [2, 32], strides = [1, 1]} : vector<2x128xf32> to vector<2x32xf32>
    %386 = math.tanh %385 : vector<2x32xf32>
    %387 = vector.extract_strided_slice %372 {offsets = [0, 96], sizes = [2, 32], strides = [1, 1]} : vector<2x128xf32> to vector<2x32xf32>
    %388 = arith.negf %387 : vector<2x32xf32>
    %389 = math.exp %388 : vector<2x32xf32>
    %cst_94 = arith.constant 1.000000e+00 : f32
    %390 = vector.broadcast %cst_94 : f32 to vector<2x32xf32>
    %391 = arith.addf %390, %389 : vector<2x32xf32>
    %392 = arith.divf %390, %391 : vector<2x32xf32>
    %393 = arith.mulf %384, %364 : vector<2x32xf32>
    %394 = arith.mulf %378, %386 : vector<2x32xf32>
    %395 = arith.addf %393, %394 : vector<2x32xf32>
    %396 = math.tanh %395 : vector<2x32xf32>
    %397 = arith.mulf %392, %396 : vector<2x32xf32>
    %398 = vector.broadcast %365 : i32 to vector<2x1xi32>
    %399 = arith.cmpi sgt, %0, %398 : vector<2x1xi32>
    %400 = vector.shape_cast %399 : vector<2x1xi1> to vector<2x1xi1>
    %401 = vector.broadcast %400 : vector<2x1xi1> to vector<2x32xi1>
    %402 = arith.select %401, %397, %364 : vector<2x32xi1>, vector<2x32xf32>
    %403 = vector.shape_cast %399 : vector<2x1xi1> to vector<2x1xi1>
    %404 = vector.broadcast %403 : vector<2x1xi1> to vector<2x32xi1>
    %405 = arith.select %404, %395, %364 : vector<2x32xi1>, vector<2x32xf32>
    %406 = arith.index_cast %365 : i32 to index
    %c0_95 = arith.constant 0 : index
    %c0_96 = arith.constant 0 : index
    %407 = vector.load %arg18[%406, %c0_95, %c0_96] : memref<8x2x32xf32, #tpu.memory_space<vmem>>, vector<1x2x32xf32>
    %408 = vector.shape_cast %407 : vector<1x2x32xf32> to vector<2x32xf32>
    %409 = vector.shape_cast %402 : vector<2x32xf32> to vector<1x2x32xf32>
    tpu.vector_store %arg18[%406, %c0_95, %c0_96], %409 {strides = array<i32>} : memref<8x2x32xf32, #tpu.memory_space<vmem>>, vector<1x2x32xf32>,
    %c1_i32_97 = arith.constant 1 : i32
    %c7_i32_98 = arith.constant 7 : i32
    %410 = arith.subi %c7_i32_98, %c1_i32_97 : i32
    %411 = arith.index_cast %410 : i32 to index
    %c0_99 = arith.constant 0 : index
    %c0_100 = arith.constant 0 : index
    %412 = vector.load %arg0[%411, %c0_99, %c0_100] : memref<8x2x32xf32, #tpu.memory_space<vmem>>, vector<1x2x32xf32>
    %413 = vector.shape_cast %412 : vector<1x2x32xf32> to vector<2x32xf32>
    %cst_101 = arith.constant dense<0.000000e+00> : vector<2x128xf32>
    %414 = tpu.matmul %413, %2, %cst_101 {dimension_numbers = #tpu.dot_dimension_numbers<[1], [0], [0], [1], [0, 0, 1, 1], [], []>} : vector<2x32xf32>, vector<32x128xf32>, vector<2x128xf32> -> vector<2x128xf32>
    %415 = arith.addf %414, %8 : vector<2x128xf32>
    %cst_102 = arith.constant dense<0.000000e+00> : vector<2x128xf32>
    %416 = tpu.matmul %402, %363, %cst_102 {dimension_numbers = #tpu.dot_dimension_numbers<[1], [0], [0], [1], [0, 0, 1, 1], [], []>} : vector<2x32xf32>, vector<32x128xf32>, vector<2x128xf32> -> vector<2x128xf32>
    %417 = arith.addf %415, %416 : vector<2x128xf32>
    %418 = vector.extract_strided_slice %417 {offsets = [0, 0], sizes = [2, 32], strides = [1, 1]} : vector<2x128xf32> to vector<2x32xf32>
    %419 = arith.negf %418 : vector<2x32xf32>
    %420 = math.exp %419 : vector<2x32xf32>
    %cst_103 = arith.constant 1.000000e+00 : f32
    %421 = vector.broadcast %cst_103 : f32 to vector<2x32xf32>
    %422 = arith.addf %421, %420 : vector<2x32xf32>
    %423 = arith.divf %421, %422 : vector<2x32xf32>
    %424 = vector.extract_strided_slice %417 {offsets = [0, 32], sizes = [2, 32], strides = [1, 1]} : vector<2x128xf32> to vector<2x32xf32>
    %425 = arith.negf %424 : vector<2x32xf32>
    %426 = math.exp %425 : vector<2x32xf32>
    %cst_104 = arith.constant 1.000000e+00 : f32
    %427 = vector.broadcast %cst_104 : f32 to vector<2x32xf32>
    %428 = arith.addf %427, %426 : vector<2x32xf32>
    %429 = arith.divf %427, %428 : vector<2x32xf32>
    %430 = vector.extract_strided_slice %417 {offsets = [0, 64], sizes = [2, 32], strides = [1, 1]} : vector<2x128xf32> to vector<2x32xf32>
    %431 = math.tanh %430 : vector<2x32xf32>
    %432 = vector.extract_strided_slice %417 {offsets = [0, 96], sizes = [2, 32], strides = [1, 1]} : vector<2x128xf32> to vector<2x32xf32>
    %433 = arith.negf %432 : vector<2x32xf32>
    %434 = math.exp %433 : vector<2x32xf32>
    %cst_105 = arith.constant 1.000000e+00 : f32
    %435 = vector.broadcast %cst_105 : f32 to vector<2x32xf32>
    %436 = arith.addf %435, %434 : vector<2x32xf32>
    %437 = arith.divf %435, %436 : vector<2x32xf32>
    %438 = arith.mulf %429, %405 : vector<2x32xf32>
    %439 = arith.mulf %423, %431 : vector<2x32xf32>
    %440 = arith.addf %438, %439 : vector<2x32xf32>
    %441 = math.tanh %440 : vector<2x32xf32>
    %442 = arith.mulf %437, %441 : vector<2x32xf32>
    %443 = vector.broadcast %410 : i32 to vector<2x1xi32>
    %444 = arith.cmpi sgt, %0, %443 : vector<2x1xi32>
    %445 = vector.shape_cast %444 : vector<2x1xi1> to vector<2x1xi1>
    %446 = vector.broadcast %445 : vector<2x1xi1> to vector<2x32xi1>
    %447 = arith.select %446, %442, %402 : vector<2x32xi1>, vector<2x32xf32>
    %448 = vector.shape_cast %444 : vector<2x1xi1> to vector<2x1xi1>
    %449 = vector.broadcast %448 : vector<2x1xi1> to vector<2x32xi1>
    %450 = arith.select %449, %440, %405 : vector<2x32xi1>, vector<2x32xf32>
    %451 = arith.index_cast %410 : i32 to index
    %c0_106 = arith.constant 0 : index
    %c0_107 = arith.constant 0 : index
    %452 = vector.load %arg18[%451, %c0_106, %c0_107] : memref<8x2x32xf32, #tpu.memory_space<vmem>>, vector<1x2x32xf32>
    %453 = vector.shape_cast %452 : vector<1x2x32xf32> to vector<2x32xf32>
    %454 = vector.shape_cast %447 : vector<2x32xf32> to vector<1x2x32xf32>
    tpu.vector_store %arg18[%451, %c0_106, %c0_107], %454 {strides = array<i32>} : memref<8x2x32xf32, #tpu.memory_space<vmem>>, vector<1x2x32xf32>,
    %c2_i32_108 = arith.constant 2 : i32
    %c7_i32_109 = arith.constant 7 : i32
    %455 = arith.subi %c7_i32_109, %c2_i32_108 : i32
    %456 = arith.index_cast %455 : i32 to index
    %c0_110 = arith.constant 0 : index
    %c0_111 = arith.constant 0 : index
    %457 = vector.load %arg0[%456, %c0_110, %c0_111] : memref<8x2x32xf32, #tpu.memory_space<vmem>>, vector<1x2x32xf32>
    %458 = vector.shape_cast %457 : vector<1x2x32xf32> to vector<2x32xf32>
    %cst_112 = arith.constant dense<0.000000e+00> : vector<2x128xf32>
    %459 = tpu.matmul %458, %2, %cst_112 {dimension_numbers = #tpu.dot_dimension_numbers<[1], [0], [0], [1], [0, 0, 1, 1], [], []>} : vector<2x32xf32>, vector<32x128xf32>, vector<2x128xf32> -> vector<2x128xf32>
    %460 = arith.addf %459, %8 : vector<2x128xf32>
    %cst_113 = arith.constant dense<0.000000e+00> : vector<2x128xf32>
    %461 = tpu.matmul %447, %363, %cst_113 {dimension_numbers = #tpu.dot_dimension_numbers<[1], [0], [0], [1], [0, 0, 1, 1], [], []>} : vector<2x32xf32>, vector<32x128xf32>, vector<2x128xf32> -> vector<2x128xf32>
    %462 = arith.addf %460, %461 : vector<2x128xf32>
    %463 = vector.extract_strided_slice %462 {offsets = [0, 0], sizes = [2, 32], strides = [1, 1]} : vector<2x128xf32> to vector<2x32xf32>
    %464 = arith.negf %463 : vector<2x32xf32>
    %465 = math.exp %464 : vector<2x32xf32>
    %cst_114 = arith.constant 1.000000e+00 : f32
    %466 = vector.broadcast %cst_114 : f32 to vector<2x32xf32>
    %467 = arith.addf %466, %465 : vector<2x32xf32>
    %468 = arith.divf %466, %467 : vector<2x32xf32>
    %469 = vector.extract_strided_slice %462 {offsets = [0, 32], sizes = [2, 32], strides = [1, 1]} : vector<2x128xf32> to vector<2x32xf32>
    %470 = arith.negf %469 : vector<2x32xf32>
    %471 = math.exp %470 : vector<2x32xf32>
    %cst_115 = arith.constant 1.000000e+00 : f32
    %472 = vector.broadcast %cst_115 : f32 to vector<2x32xf32>
    %473 = arith.addf %472, %471 : vector<2x32xf32>
    %474 = arith.divf %472, %473 : vector<2x32xf32>
    %475 = vector.extract_strided_slice %462 {offsets = [0, 64], sizes = [2, 32], strides = [1, 1]} : vector<2x128xf32> to vector<2x32xf32>
    %476 = math.tanh %475 : vector<2x32xf32>
    %477 = vector.extract_strided_slice %462 {offsets = [0, 96], sizes = [2, 32], strides = [1, 1]} : vector<2x128xf32> to vector<2x32xf32>
    %478 = arith.negf %477 : vector<2x32xf32>
    %479 = math.exp %478 : vector<2x32xf32>
    %cst_116 = arith.constant 1.000000e+00 : f32
    %480 = vector.broadcast %cst_116 : f32 to vector<2x32xf32>
    %481 = arith.addf %480, %479 : vector<2x32xf32>
    %482 = arith.divf %480, %481 : vector<2x32xf32>
    %483 = arith.mulf %474, %450 : vector<2x32xf32>
    %484 = arith.mulf %468, %476 : vector<2x32xf32>
    %485 = arith.addf %483, %484 : vector<2x32xf32>
    %486 = math.tanh %485 : vector<2x32xf32>
    %487 = arith.mulf %482, %486 : vector<2x32xf32>
    %488 = vector.broadcast %455 : i32 to vector<2x1xi32>
    %489 = arith.cmpi sgt, %0, %488 : vector<2x1xi32>
    %490 = vector.shape_cast %489 : vector<2x1xi1> to vector<2x1xi1>
    %491 = vector.broadcast %490 : vector<2x1xi1> to vector<2x32xi1>
    %492 = arith.select %491, %487, %447 : vector<2x32xi1>, vector<2x32xf32>
    %493 = vector.shape_cast %489 : vector<2x1xi1> to vector<2x1xi1>
    %494 = vector.broadcast %493 : vector<2x1xi1> to vector<2x32xi1>
    %495 = arith.select %494, %485, %450 : vector<2x32xi1>, vector<2x32xf32>
    %496 = arith.index_cast %455 : i32 to index
    %c0_117 = arith.constant 0 : index
    %c0_118 = arith.constant 0 : index
    %497 = vector.load %arg18[%496, %c0_117, %c0_118] : memref<8x2x32xf32, #tpu.memory_space<vmem>>, vector<1x2x32xf32>
    %498 = vector.shape_cast %497 : vector<1x2x32xf32> to vector<2x32xf32>
    %499 = vector.shape_cast %492 : vector<2x32xf32> to vector<1x2x32xf32>
    tpu.vector_store %arg18[%496, %c0_117, %c0_118], %499 {strides = array<i32>} : memref<8x2x32xf32, #tpu.memory_space<vmem>>, vector<1x2x32xf32>,
    %c3_i32_119 = arith.constant 3 : i32
    %c7_i32_120 = arith.constant 7 : i32
    %500 = arith.subi %c7_i32_120, %c3_i32_119 : i32
    %501 = arith.index_cast %500 : i32 to index
    %c0_121 = arith.constant 0 : index
    %c0_122 = arith.constant 0 : index
    %502 = vector.load %arg0[%501, %c0_121, %c0_122] : memref<8x2x32xf32, #tpu.memory_space<vmem>>, vector<1x2x32xf32>
    %503 = vector.shape_cast %502 : vector<1x2x32xf32> to vector<2x32xf32>
    %cst_123 = arith.constant dense<0.000000e+00> : vector<2x128xf32>
    %504 = tpu.matmul %503, %2, %cst_123 {dimension_numbers = #tpu.dot_dimension_numbers<[1], [0], [0], [1], [0, 0, 1, 1], [], []>} : vector<2x32xf32>, vector<32x128xf32>, vector<2x128xf32> -> vector<2x128xf32>
    %505 = arith.addf %504, %8 : vector<2x128xf32>
    %cst_124 = arith.constant dense<0.000000e+00> : vector<2x128xf32>
    %506 = tpu.matmul %492, %363, %cst_124 {dimension_numbers = #tpu.dot_dimension_numbers<[1], [0], [0], [1], [0, 0, 1, 1], [], []>} : vector<2x32xf32>, vector<32x128xf32>, vector<2x128xf32> -> vector<2x128xf32>
    %507 = arith.addf %505, %506 : vector<2x128xf32>
    %508 = vector.extract_strided_slice %507 {offsets = [0, 0], sizes = [2, 32], strides = [1, 1]} : vector<2x128xf32> to vector<2x32xf32>
    %509 = arith.negf %508 : vector<2x32xf32>
    %510 = math.exp %509 : vector<2x32xf32>
    %cst_125 = arith.constant 1.000000e+00 : f32
    %511 = vector.broadcast %cst_125 : f32 to vector<2x32xf32>
    %512 = arith.addf %511, %510 : vector<2x32xf32>
    %513 = arith.divf %511, %512 : vector<2x32xf32>
    %514 = vector.extract_strided_slice %507 {offsets = [0, 32], sizes = [2, 32], strides = [1, 1]} : vector<2x128xf32> to vector<2x32xf32>
    %515 = arith.negf %514 : vector<2x32xf32>
    %516 = math.exp %515 : vector<2x32xf32>
    %cst_126 = arith.constant 1.000000e+00 : f32
    %517 = vector.broadcast %cst_126 : f32 to vector<2x32xf32>
    %518 = arith.addf %517, %516 : vector<2x32xf32>
    %519 = arith.divf %517, %518 : vector<2x32xf32>
    %520 = vector.extract_strided_slice %507 {offsets = [0, 64], sizes = [2, 32], strides = [1, 1]} : vector<2x128xf32> to vector<2x32xf32>
    %521 = math.tanh %520 : vector<2x32xf32>
    %522 = vector.extract_strided_slice %507 {offsets = [0, 96], sizes = [2, 32], strides = [1, 1]} : vector<2x128xf32> to vector<2x32xf32>
    %523 = arith.negf %522 : vector<2x32xf32>
    %524 = math.exp %523 : vector<2x32xf32>
    %cst_127 = arith.constant 1.000000e+00 : f32
    %525 = vector.broadcast %cst_127 : f32 to vector<2x32xf32>
    %526 = arith.addf %525, %524 : vector<2x32xf32>
    %527 = arith.divf %525, %526 : vector<2x32xf32>
    %528 = arith.mulf %519, %495 : vector<2x32xf32>
    %529 = arith.mulf %513, %521 : vector<2x32xf32>
    %530 = arith.addf %528, %529 : vector<2x32xf32>
    %531 = math.tanh %530 : vector<2x32xf32>
    %532 = arith.mulf %527, %531 : vector<2x32xf32>
    %533 = vector.broadcast %500 : i32 to vector<2x1xi32>
    %534 = arith.cmpi sgt, %0, %533 : vector<2x1xi32>
    %535 = vector.shape_cast %534 : vector<2x1xi1> to vector<2x1xi1>
    %536 = vector.broadcast %535 : vector<2x1xi1> to vector<2x32xi1>
    %537 = arith.select %536, %532, %492 : vector<2x32xi1>, vector<2x32xf32>
    %538 = vector.shape_cast %534 : vector<2x1xi1> to vector<2x1xi1>
    %539 = vector.broadcast %538 : vector<2x1xi1> to vector<2x32xi1>
    %540 = arith.select %539, %530, %495 : vector<2x32xi1>, vector<2x32xf32>
    %541 = arith.index_cast %500 : i32 to index
    %c0_128 = arith.constant 0 : index
    %c0_129 = arith.constant 0 : index
    %542 = vector.load %arg18[%541, %c0_128, %c0_129] : memref<8x2x32xf32, #tpu.memory_space<vmem>>, vector<1x2x32xf32>
    %543 = vector.shape_cast %542 : vector<1x2x32xf32> to vector<2x32xf32>
    %544 = vector.shape_cast %537 : vector<2x32xf32> to vector<1x2x32xf32>
    tpu.vector_store %arg18[%541, %c0_128, %c0_129], %544 {strides = array<i32>} : memref<8x2x32xf32, #tpu.memory_space<vmem>>, vector<1x2x32xf32>,
    %c4_i32_130 = arith.constant 4 : i32
    %c7_i32_131 = arith.constant 7 : i32
    %545 = arith.subi %c7_i32_131, %c4_i32_130 : i32
    %546 = arith.index_cast %545 : i32 to index
    %c0_132 = arith.constant 0 : index
    %c0_133 = arith.constant 0 : index
    %547 = vector.load %arg0[%546, %c0_132, %c0_133] : memref<8x2x32xf32, #tpu.memory_space<vmem>>, vector<1x2x32xf32>
    %548 = vector.shape_cast %547 : vector<1x2x32xf32> to vector<2x32xf32>
    %cst_134 = arith.constant dense<0.000000e+00> : vector<2x128xf32>
    %549 = tpu.matmul %548, %2, %cst_134 {dimension_numbers = #tpu.dot_dimension_numbers<[1], [0], [0], [1], [0, 0, 1, 1], [], []>} : vector<2x32xf32>, vector<32x128xf32>, vector<2x128xf32> -> vector<2x128xf32>
    %550 = arith.addf %549, %8 : vector<2x128xf32>
    %cst_135 = arith.constant dense<0.000000e+00> : vector<2x128xf32>
    %551 = tpu.matmul %537, %363, %cst_135 {dimension_numbers = #tpu.dot_dimension_numbers<[1], [0], [0], [1], [0, 0, 1, 1], [], []>} : vector<2x32xf32>, vector<32x128xf32>, vector<2x128xf32> -> vector<2x128xf32>
    %552 = arith.addf %550, %551 : vector<2x128xf32>
    %553 = vector.extract_strided_slice %552 {offsets = [0, 0], sizes = [2, 32], strides = [1, 1]} : vector<2x128xf32> to vector<2x32xf32>
    %554 = arith.negf %553 : vector<2x32xf32>
    %555 = math.exp %554 : vector<2x32xf32>
    %cst_136 = arith.constant 1.000000e+00 : f32
    %556 = vector.broadcast %cst_136 : f32 to vector<2x32xf32>
    %557 = arith.addf %556, %555 : vector<2x32xf32>
    %558 = arith.divf %556, %557 : vector<2x32xf32>
    %559 = vector.extract_strided_slice %552 {offsets = [0, 32], sizes = [2, 32], strides = [1, 1]} : vector<2x128xf32> to vector<2x32xf32>
    %560 = arith.negf %559 : vector<2x32xf32>
    %561 = math.exp %560 : vector<2x32xf32>
    %cst_137 = arith.constant 1.000000e+00 : f32
    %562 = vector.broadcast %cst_137 : f32 to vector<2x32xf32>
    %563 = arith.addf %562, %561 : vector<2x32xf32>
    %564 = arith.divf %562, %563 : vector<2x32xf32>
    %565 = vector.extract_strided_slice %552 {offsets = [0, 64], sizes = [2, 32], strides = [1, 1]} : vector<2x128xf32> to vector<2x32xf32>
    %566 = math.tanh %565 : vector<2x32xf32>
    %567 = vector.extract_strided_slice %552 {offsets = [0, 96], sizes = [2, 32], strides = [1, 1]} : vector<2x128xf32> to vector<2x32xf32>
    %568 = arith.negf %567 : vector<2x32xf32>
    %569 = math.exp %568 : vector<2x32xf32>
    %cst_138 = arith.constant 1.000000e+00 : f32
    %570 = vector.broadcast %cst_138 : f32 to vector<2x32xf32>
    %571 = arith.addf %570, %569 : vector<2x32xf32>
    %572 = arith.divf %570, %571 : vector<2x32xf32>
    %573 = arith.mulf %564, %540 : vector<2x32xf32>
    %574 = arith.mulf %558, %566 : vector<2x32xf32>
    %575 = arith.addf %573, %574 : vector<2x32xf32>
    %576 = math.tanh %575 : vector<2x32xf32>
    %577 = arith.mulf %572, %576 : vector<2x32xf32>
    %578 = vector.broadcast %545 : i32 to vector<2x1xi32>
    %579 = arith.cmpi sgt, %0, %578 : vector<2x1xi32>
    %580 = vector.shape_cast %579 : vector<2x1xi1> to vector<2x1xi1>
    %581 = vector.broadcast %580 : vector<2x1xi1> to vector<2x32xi1>
    %582 = arith.select %581, %577, %537 : vector<2x32xi1>, vector<2x32xf32>
    %583 = vector.shape_cast %579 : vector<2x1xi1> to vector<2x1xi1>
    %584 = vector.broadcast %583 : vector<2x1xi1> to vector<2x32xi1>
    %585 = arith.select %584, %575, %540 : vector<2x32xi1>, vector<2x32xf32>
    %586 = arith.index_cast %545 : i32 to index
    %c0_139 = arith.constant 0 : index
    %c0_140 = arith.constant 0 : index
    %587 = vector.load %arg18[%586, %c0_139, %c0_140] : memref<8x2x32xf32, #tpu.memory_space<vmem>>, vector<1x2x32xf32>
    %588 = vector.shape_cast %587 : vector<1x2x32xf32> to vector<2x32xf32>
    %589 = vector.shape_cast %582 : vector<2x32xf32> to vector<1x2x32xf32>
    tpu.vector_store %arg18[%586, %c0_139, %c0_140], %589 {strides = array<i32>} : memref<8x2x32xf32, #tpu.memory_space<vmem>>, vector<1x2x32xf32>,
    %c5_i32_141 = arith.constant 5 : i32
    %c7_i32_142 = arith.constant 7 : i32
    %590 = arith.subi %c7_i32_142, %c5_i32_141 : i32
    %591 = arith.index_cast %590 : i32 to index
    %c0_143 = arith.constant 0 : index
    %c0_144 = arith.constant 0 : index
    %592 = vector.load %arg0[%591, %c0_143, %c0_144] : memref<8x2x32xf32, #tpu.memory_space<vmem>>, vector<1x2x32xf32>
    %593 = vector.shape_cast %592 : vector<1x2x32xf32> to vector<2x32xf32>
    %cst_145 = arith.constant dense<0.000000e+00> : vector<2x128xf32>
    %594 = tpu.matmul %593, %2, %cst_145 {dimension_numbers = #tpu.dot_dimension_numbers<[1], [0], [0], [1], [0, 0, 1, 1], [], []>} : vector<2x32xf32>, vector<32x128xf32>, vector<2x128xf32> -> vector<2x128xf32>
    %595 = arith.addf %594, %8 : vector<2x128xf32>
    %cst_146 = arith.constant dense<0.000000e+00> : vector<2x128xf32>
    %596 = tpu.matmul %582, %363, %cst_146 {dimension_numbers = #tpu.dot_dimension_numbers<[1], [0], [0], [1], [0, 0, 1, 1], [], []>} : vector<2x32xf32>, vector<32x128xf32>, vector<2x128xf32> -> vector<2x128xf32>
    %597 = arith.addf %595, %596 : vector<2x128xf32>
    %598 = vector.extract_strided_slice %597 {offsets = [0, 0], sizes = [2, 32], strides = [1, 1]} : vector<2x128xf32> to vector<2x32xf32>
    %599 = arith.negf %598 : vector<2x32xf32>
    %600 = math.exp %599 : vector<2x32xf32>
    %cst_147 = arith.constant 1.000000e+00 : f32
    %601 = vector.broadcast %cst_147 : f32 to vector<2x32xf32>
    %602 = arith.addf %601, %600 : vector<2x32xf32>
    %603 = arith.divf %601, %602 : vector<2x32xf32>
    %604 = vector.extract_strided_slice %597 {offsets = [0, 32], sizes = [2, 32], strides = [1, 1]} : vector<2x128xf32> to vector<2x32xf32>
    %605 = arith.negf %604 : vector<2x32xf32>
    %606 = math.exp %605 : vector<2x32xf32>
    %cst_148 = arith.constant 1.000000e+00 : f32
    %607 = vector.broadcast %cst_148 : f32 to vector<2x32xf32>
    %608 = arith.addf %607, %606 : vector<2x32xf32>
    %609 = arith.divf %607, %608 : vector<2x32xf32>
    %610 = vector.extract_strided_slice %597 {offsets = [0, 64], sizes = [2, 32], strides = [1, 1]} : vector<2x128xf32> to vector<2x32xf32>
    %611 = math.tanh %610 : vector<2x32xf32>
    %612 = vector.extract_strided_slice %597 {offsets = [0, 96], sizes = [2, 32], strides = [1, 1]} : vector<2x128xf32> to vector<2x32xf32>
    %613 = arith.negf %612 : vector<2x32xf32>
    %614 = math.exp %613 : vector<2x32xf32>
    %cst_149 = arith.constant 1.000000e+00 : f32
    %615 = vector.broadcast %cst_149 : f32 to vector<2x32xf32>
    %616 = arith.addf %615, %614 : vector<2x32xf32>
    %617 = arith.divf %615, %616 : vector<2x32xf32>
    %618 = arith.mulf %609, %585 : vector<2x32xf32>
    %619 = arith.mulf %603, %611 : vector<2x32xf32>
    %620 = arith.addf %618, %619 : vector<2x32xf32>
    %621 = math.tanh %620 : vector<2x32xf32>
    %622 = arith.mulf %617, %621 : vector<2x32xf32>
    %623 = vector.broadcast %590 : i32 to vector<2x1xi32>
    %624 = arith.cmpi sgt, %0, %623 : vector<2x1xi32>
    %625 = vector.shape_cast %624 : vector<2x1xi1> to vector<2x1xi1>
    %626 = vector.broadcast %625 : vector<2x1xi1> to vector<2x32xi1>
    %627 = arith.select %626, %622, %582 : vector<2x32xi1>, vector<2x32xf32>
    %628 = vector.shape_cast %624 : vector<2x1xi1> to vector<2x1xi1>
    %629 = vector.broadcast %628 : vector<2x1xi1> to vector<2x32xi1>
    %630 = arith.select %629, %620, %585 : vector<2x32xi1>, vector<2x32xf32>
    %631 = arith.index_cast %590 : i32 to index
    %c0_150 = arith.constant 0 : index
    %c0_151 = arith.constant 0 : index
    %632 = vector.load %arg18[%631, %c0_150, %c0_151] : memref<8x2x32xf32, #tpu.memory_space<vmem>>, vector<1x2x32xf32>
    %633 = vector.shape_cast %632 : vector<1x2x32xf32> to vector<2x32xf32>
    %634 = vector.shape_cast %627 : vector<2x32xf32> to vector<1x2x32xf32>
    tpu.vector_store %arg18[%631, %c0_150, %c0_151], %634 {strides = array<i32>} : memref<8x2x32xf32, #tpu.memory_space<vmem>>, vector<1x2x32xf32>,
    %c6_i32_152 = arith.constant 6 : i32
    %c7_i32_153 = arith.constant 7 : i32
    %635 = arith.subi %c7_i32_153, %c6_i32_152 : i32
    %636 = arith.index_cast %635 : i32 to index
    %c0_154 = arith.constant 0 : index
    %c0_155 = arith.constant 0 : index
    %637 = vector.load %arg0[%636, %c0_154, %c0_155] : memref<8x2x32xf32, #tpu.memory_space<vmem>>, vector<1x2x32xf32>
    %638 = vector.shape_cast %637 : vector<1x2x32xf32> to vector<2x32xf32>
    %cst_156 = arith.constant dense<0.000000e+00> : vector<2x128xf32>
    %639 = tpu.matmul %638, %2, %cst_156 {dimension_numbers = #tpu.dot_dimension_numbers<[1], [0], [0], [1], [0, 0, 1, 1], [], []>} : vector<2x32xf32>, vector<32x128xf32>, vector<2x128xf32> -> vector<2x128xf32>
    %640 = arith.addf %639, %8 : vector<2x128xf32>
    %cst_157 = arith.constant dense<0.000000e+00> : vector<2x128xf32>
    %641 = tpu.matmul %627, %363, %cst_157 {dimension_numbers = #tpu.dot_dimension_numbers<[1], [0], [0], [1], [0, 0, 1, 1], [], []>} : vector<2x32xf32>, vector<32x128xf32>, vector<2x128xf32> -> vector<2x128xf32>
    %642 = arith.addf %640, %641 : vector<2x128xf32>
    %643 = vector.extract_strided_slice %642 {offsets = [0, 0], sizes = [2, 32], strides = [1, 1]} : vector<2x128xf32> to vector<2x32xf32>
    %644 = arith.negf %643 : vector<2x32xf32>
    %645 = math.exp %644 : vector<2x32xf32>
    %cst_158 = arith.constant 1.000000e+00 : f32
    %646 = vector.broadcast %cst_158 : f32 to vector<2x32xf32>
    %647 = arith.addf %646, %645 : vector<2x32xf32>
    %648 = arith.divf %646, %647 : vector<2x32xf32>
    %649 = vector.extract_strided_slice %642 {offsets = [0, 32], sizes = [2, 32], strides = [1, 1]} : vector<2x128xf32> to vector<2x32xf32>
    %650 = arith.negf %649 : vector<2x32xf32>
    %651 = math.exp %650 : vector<2x32xf32>
    %cst_159 = arith.constant 1.000000e+00 : f32
    %652 = vector.broadcast %cst_159 : f32 to vector<2x32xf32>
    %653 = arith.addf %652, %651 : vector<2x32xf32>
    %654 = arith.divf %652, %653 : vector<2x32xf32>
    %655 = vector.extract_strided_slice %642 {offsets = [0, 64], sizes = [2, 32], strides = [1, 1]} : vector<2x128xf32> to vector<2x32xf32>
    %656 = math.tanh %655 : vector<2x32xf32>
    %657 = vector.extract_strided_slice %642 {offsets = [0, 96], sizes = [2, 32], strides = [1, 1]} : vector<2x128xf32> to vector<2x32xf32>
    %658 = arith.negf %657 : vector<2x32xf32>
    %659 = math.exp %658 : vector<2x32xf32>
    %cst_160 = arith.constant 1.000000e+00 : f32
    %660 = vector.broadcast %cst_160 : f32 to vector<2x32xf32>
    %661 = arith.addf %660, %659 : vector<2x32xf32>
    %662 = arith.divf %660, %661 : vector<2x32xf32>
    %663 = arith.mulf %654, %630 : vector<2x32xf32>
    %664 = arith.mulf %648, %656 : vector<2x32xf32>
    %665 = arith.addf %663, %664 : vector<2x32xf32>
    %666 = math.tanh %665 : vector<2x32xf32>
    %667 = arith.mulf %662, %666 : vector<2x32xf32>
    %668 = vector.broadcast %635 : i32 to vector<2x1xi32>
    %669 = arith.cmpi sgt, %0, %668 : vector<2x1xi32>
    %670 = vector.shape_cast %669 : vector<2x1xi1> to vector<2x1xi1>
    %671 = vector.broadcast %670 : vector<2x1xi1> to vector<2x32xi1>
    %672 = arith.select %671, %667, %627 : vector<2x32xi1>, vector<2x32xf32>
    %673 = vector.shape_cast %669 : vector<2x1xi1> to vector<2x1xi1>
    %674 = vector.broadcast %673 : vector<2x1xi1> to vector<2x32xi1>
    %675 = arith.select %674, %665, %630 : vector<2x32xi1>, vector<2x32xf32>
    %676 = arith.index_cast %635 : i32 to index
    %c0_161 = arith.constant 0 : index
    %c0_162 = arith.constant 0 : index
    %677 = vector.load %arg18[%676, %c0_161, %c0_162] : memref<8x2x32xf32, #tpu.memory_space<vmem>>, vector<1x2x32xf32>
    %678 = vector.shape_cast %677 : vector<1x2x32xf32> to vector<2x32xf32>
    %679 = vector.shape_cast %672 : vector<2x32xf32> to vector<1x2x32xf32>
    tpu.vector_store %arg18[%676, %c0_161, %c0_162], %679 {strides = array<i32>} : memref<8x2x32xf32, #tpu.memory_space<vmem>>, vector<1x2x32xf32>,
    %c7_i32_163 = arith.constant 7 : i32
    %c7_i32_164 = arith.constant 7 : i32
    %680 = arith.subi %c7_i32_164, %c7_i32_163 : i32
    %681 = arith.index_cast %680 : i32 to index
    %c0_165 = arith.constant 0 : index
    %c0_166 = arith.constant 0 : index
    %682 = vector.load %arg0[%681, %c0_165, %c0_166] : memref<8x2x32xf32, #tpu.memory_space<vmem>>, vector<1x2x32xf32>
    %683 = vector.shape_cast %682 : vector<1x2x32xf32> to vector<2x32xf32>
    %cst_167 = arith.constant dense<0.000000e+00> : vector<2x128xf32>
    %684 = tpu.matmul %683, %2, %cst_167 {dimension_numbers = #tpu.dot_dimension_numbers<[1], [0], [0], [1], [0, 0, 1, 1], [], []>} : vector<2x32xf32>, vector<32x128xf32>, vector<2x128xf32> -> vector<2x128xf32>
    %685 = arith.addf %684, %8 : vector<2x128xf32>
    %cst_168 = arith.constant dense<0.000000e+00> : vector<2x128xf32>
    %686 = tpu.matmul %672, %363, %cst_168 {dimension_numbers = #tpu.dot_dimension_numbers<[1], [0], [0], [1], [0, 0, 1, 1], [], []>} : vector<2x32xf32>, vector<32x128xf32>, vector<2x128xf32> -> vector<2x128xf32>
    %687 = arith.addf %685, %686 : vector<2x128xf32>
    %688 = vector.extract_strided_slice %687 {offsets = [0, 0], sizes = [2, 32], strides = [1, 1]} : vector<2x128xf32> to vector<2x32xf32>
    %689 = arith.negf %688 : vector<2x32xf32>
    %690 = math.exp %689 : vector<2x32xf32>
    %cst_169 = arith.constant 1.000000e+00 : f32
    %691 = vector.broadcast %cst_169 : f32 to vector<2x32xf32>
    %692 = arith.addf %691, %690 : vector<2x32xf32>
    %693 = arith.divf %691, %692 : vector<2x32xf32>
    %694 = vector.extract_strided_slice %687 {offsets = [0, 32], sizes = [2, 32], strides = [1, 1]} : vector<2x128xf32> to vector<2x32xf32>
    %695 = arith.negf %694 : vector<2x32xf32>
    %696 = math.exp %695 : vector<2x32xf32>
    %cst_170 = arith.constant 1.000000e+00 : f32
    %697 = vector.broadcast %cst_170 : f32 to vector<2x32xf32>
    %698 = arith.addf %697, %696 : vector<2x32xf32>
    %699 = arith.divf %697, %698 : vector<2x32xf32>
    %700 = vector.extract_strided_slice %687 {offsets = [0, 64], sizes = [2, 32], strides = [1, 1]} : vector<2x128xf32> to vector<2x32xf32>
    %701 = math.tanh %700 : vector<2x32xf32>
    %702 = vector.extract_strided_slice %687 {offsets = [0, 96], sizes = [2, 32], strides = [1, 1]} : vector<2x128xf32> to vector<2x32xf32>
    %703 = arith.negf %702 : vector<2x32xf32>
    %704 = math.exp %703 : vector<2x32xf32>
    %cst_171 = arith.constant 1.000000e+00 : f32
    %705 = vector.broadcast %cst_171 : f32 to vector<2x32xf32>
    %706 = arith.addf %705, %704 : vector<2x32xf32>
    %707 = arith.divf %705, %706 : vector<2x32xf32>
    %708 = arith.mulf %699, %675 : vector<2x32xf32>
    %709 = arith.mulf %693, %701 : vector<2x32xf32>
    %710 = arith.addf %708, %709 : vector<2x32xf32>
    %711 = math.tanh %710 : vector<2x32xf32>
    %712 = arith.mulf %707, %711 : vector<2x32xf32>
    %713 = vector.broadcast %680 : i32 to vector<2x1xi32>
    %714 = arith.cmpi sgt, %0, %713 : vector<2x1xi32>
    %715 = vector.shape_cast %714 : vector<2x1xi1> to vector<2x1xi1>
    %716 = vector.broadcast %715 : vector<2x1xi1> to vector<2x32xi1>
    %717 = arith.select %716, %712, %672 : vector<2x32xi1>, vector<2x32xf32>
    %718 = vector.shape_cast %714 : vector<2x1xi1> to vector<2x1xi1>
    %719 = vector.broadcast %718 : vector<2x1xi1> to vector<2x32xi1>
    %720 = arith.select %719, %710, %675 : vector<2x32xi1>, vector<2x32xf32>
    %721 = arith.index_cast %680 : i32 to index
    %c0_172 = arith.constant 0 : index
    %c0_173 = arith.constant 0 : index
    %722 = vector.load %arg18[%721, %c0_172, %c0_173] : memref<8x2x32xf32, #tpu.memory_space<vmem>>, vector<1x2x32xf32>
    %723 = vector.shape_cast %722 : vector<1x2x32xf32> to vector<2x32xf32>
    %724 = vector.shape_cast %717 : vector<2x32xf32> to vector<1x2x32xf32>
    tpu.vector_store %arg18[%721, %c0_172, %c0_173], %724 {strides = array<i32>} : memref<8x2x32xf32, #tpu.memory_space<vmem>>, vector<1x2x32xf32>,
    %c8_i32_174 = arith.constant 8 : i32
    %c0_175 = arith.constant 0 : index
    %c0_176 = arith.constant 0 : index
    %725 = vector.load %arg8[%c0_175, %c0_176] : memref<64x128xf32, #tpu.memory_space<vmem>>, vector<64x128xf32>
    %c0_177 = arith.constant 0 : index
    %c0_178 = arith.constant 0 : index
    %726 = vector.load %arg11[%c0_177, %c0_178] : memref<64x128xf32, #tpu.memory_space<vmem>>, vector<64x128xf32>
    %c0_179 = arith.constant 0 : index
    %c0_180 = arith.constant 0 : index
    %727 = vector.load %arg10[%c0_179, %c0_180] : memref<1x128xf32, #tpu.memory_space<vmem>>, vector<1x128xf32>
    %728 = vector.shape_cast %727 : vector<1x128xf32> to vector<1x128xf32>
    %729 = vector.broadcast %728 : vector<1x128xf32> to vector<2x128xf32>
    %c0_181 = arith.constant 0 : index
    %c0_182 = arith.constant 0 : index
    %730 = vector.load %arg13[%c0_181, %c0_182] : memref<1x128xf32, #tpu.memory_space<vmem>>, vector<1x128xf32>
    %731 = vector.shape_cast %730 : vector<1x128xf32> to vector<1x128xf32>
    %732 = vector.broadcast %731 : vector<1x128xf32> to vector<2x128xf32>
    %733 = vector.extract_strided_slice %725 {offsets = [0, 0], sizes = [32, 128], strides = [1, 1]} : vector<64x128xf32> to vector<32x128xf32>
    %734 = vector.extract_strided_slice %725 {offsets = [32, 0], sizes = [32, 128], strides = [1, 1]} : vector<64x128xf32> to vector<32x128xf32>
    %c0_183 = arith.constant 0 : index
    %c0_184 = arith.constant 0 : index
    %735 = vector.load %arg9[%c0_183, %c0_184] : memref<32x128xf32, #tpu.memory_space<vmem>>, vector<32x128xf32>
    %cst_185 = arith.constant 0.000000e+00 : f32
    %736 = vector.broadcast %cst_185 : f32 to vector<2x32xf32>
    %c0_i32_186 = arith.constant 0 : i32
    %737 = arith.index_cast %c0_i32_186 : i32 to index
    %c0_187 = arith.constant 0 : index
    %c0_188 = arith.constant 0 : index
    %738 = vector.load %arg17[%737, %c0_187, %c0_188] : memref<8x2x32xf32, #tpu.memory_space<vmem>>, vector<1x2x32xf32>
    %739 = vector.shape_cast %738 : vector<1x2x32xf32> to vector<2x32xf32>
    %cst_189 = arith.constant dense<0.000000e+00> : vector<2x128xf32>
    %740 = tpu.matmul %739, %733, %cst_189 {dimension_numbers = #tpu.dot_dimension_numbers<[1], [0], [0], [1], [0, 0, 1, 1], [], []>} : vector<2x32xf32>, vector<32x128xf32>, vector<2x128xf32> -> vector<2x128xf32>
    %741 = arith.index_cast %c0_i32_186 : i32 to index
    %c0_190 = arith.constant 0 : index
    %c0_191 = arith.constant 0 : index
    %742 = vector.load %arg18[%741, %c0_190, %c0_191] : memref<8x2x32xf32, #tpu.memory_space<vmem>>, vector<1x2x32xf32>
    %743 = vector.shape_cast %742 : vector<1x2x32xf32> to vector<2x32xf32>
    %cst_192 = arith.constant dense<0.000000e+00> : vector<2x128xf32>
    %744 = tpu.matmul %743, %734, %cst_192 {dimension_numbers = #tpu.dot_dimension_numbers<[1], [0], [0], [1], [0, 0, 1, 1], [], []>} : vector<2x32xf32>, vector<32x128xf32>, vector<2x128xf32> -> vector<2x128xf32>
    %745 = arith.addf %740, %744 : vector<2x128xf32>
    %746 = arith.addf %745, %729 : vector<2x128xf32>
    %cst_193 = arith.constant dense<0.000000e+00> : vector<2x128xf32>
    %747 = tpu.matmul %736, %735, %cst_193 {dimension_numbers = #tpu.dot_dimension_numbers<[1], [0], [0], [1], [0, 0, 1, 1], [], []>} : vector<2x32xf32>, vector<32x128xf32>, vector<2x128xf32> -> vector<2x128xf32>
    %748 = arith.addf %746, %747 : vector<2x128xf32>
    %749 = vector.extract_strided_slice %748 {offsets = [0, 0], sizes = [2, 32], strides = [1, 1]} : vector<2x128xf32> to vector<2x32xf32>
    %750 = arith.negf %749 : vector<2x32xf32>
    %751 = math.exp %750 : vector<2x32xf32>
    %cst_194 = arith.constant 1.000000e+00 : f32
    %752 = vector.broadcast %cst_194 : f32 to vector<2x32xf32>
    %753 = arith.addf %752, %751 : vector<2x32xf32>
    %754 = arith.divf %752, %753 : vector<2x32xf32>
    %755 = vector.extract_strided_slice %748 {offsets = [0, 32], sizes = [2, 32], strides = [1, 1]} : vector<2x128xf32> to vector<2x32xf32>
    %756 = arith.negf %755 : vector<2x32xf32>
    %757 = math.exp %756 : vector<2x32xf32>
    %cst_195 = arith.constant 1.000000e+00 : f32
    %758 = vector.broadcast %cst_195 : f32 to vector<2x32xf32>
    %759 = arith.addf %758, %757 : vector<2x32xf32>
    %760 = arith.divf %758, %759 : vector<2x32xf32>
    %761 = vector.extract_strided_slice %748 {offsets = [0, 64], sizes = [2, 32], strides = [1, 1]} : vector<2x128xf32> to vector<2x32xf32>
    %762 = math.tanh %761 : vector<2x32xf32>
    %763 = vector.extract_strided_slice %748 {offsets = [0, 96], sizes = [2, 32], strides = [1, 1]} : vector<2x128xf32> to vector<2x32xf32>
    %764 = arith.negf %763 : vector<2x32xf32>
    %765 = math.exp %764 : vector<2x32xf32>
    %cst_196 = arith.constant 1.000000e+00 : f32
    %766 = vector.broadcast %cst_196 : f32 to vector<2x32xf32>
    %767 = arith.addf %766, %765 : vector<2x32xf32>
    %768 = arith.divf %766, %767 : vector<2x32xf32>
    %769 = arith.mulf %760, %736 : vector<2x32xf32>
    %770 = arith.mulf %754, %762 : vector<2x32xf32>
    %771 = arith.addf %769, %770 : vector<2x32xf32>
    %772 = math.tanh %771 : vector<2x32xf32>
    %773 = arith.mulf %768, %772 : vector<2x32xf32>
    %774 = vector.broadcast %c0_i32_186 : i32 to vector<2x1xi32>
    %775 = arith.cmpi sgt, %0, %774 : vector<2x1xi32>
    %776 = vector.shape_cast %775 : vector<2x1xi1> to vector<2x1xi1>
    %777 = vector.broadcast %776 : vector<2x1xi1> to vector<2x32xi1>
    %778 = arith.select %777, %773, %736 : vector<2x32xi1>, vector<2x32xf32>
    %779 = vector.shape_cast %775 : vector<2x1xi1> to vector<2x1xi1>
    %780 = vector.broadcast %779 : vector<2x1xi1> to vector<2x32xi1>
    %781 = arith.select %780, %771, %736 : vector<2x32xi1>, vector<2x32xf32>
    %c1_i32_197 = arith.constant 1 : i32
    %782 = arith.index_cast %c1_i32_197 : i32 to index
    %c0_198 = arith.constant 0 : index
    %c0_199 = arith.constant 0 : index
    %783 = vector.load %arg17[%782, %c0_198, %c0_199] : memref<8x2x32xf32, #tpu.memory_space<vmem>>, vector<1x2x32xf32>
    %784 = vector.shape_cast %783 : vector<1x2x32xf32> to vector<2x32xf32>
    %cst_200 = arith.constant dense<0.000000e+00> : vector<2x128xf32>
    %785 = tpu.matmul %784, %733, %cst_200 {dimension_numbers = #tpu.dot_dimension_numbers<[1], [0], [0], [1], [0, 0, 1, 1], [], []>} : vector<2x32xf32>, vector<32x128xf32>, vector<2x128xf32> -> vector<2x128xf32>
    %786 = arith.index_cast %c1_i32_197 : i32 to index
    %c0_201 = arith.constant 0 : index
    %c0_202 = arith.constant 0 : index
    %787 = vector.load %arg18[%786, %c0_201, %c0_202] : memref<8x2x32xf32, #tpu.memory_space<vmem>>, vector<1x2x32xf32>
    %788 = vector.shape_cast %787 : vector<1x2x32xf32> to vector<2x32xf32>
    %cst_203 = arith.constant dense<0.000000e+00> : vector<2x128xf32>
    %789 = tpu.matmul %788, %734, %cst_203 {dimension_numbers = #tpu.dot_dimension_numbers<[1], [0], [0], [1], [0, 0, 1, 1], [], []>} : vector<2x32xf32>, vector<32x128xf32>, vector<2x128xf32> -> vector<2x128xf32>
    %790 = arith.addf %785, %789 : vector<2x128xf32>
    %791 = arith.addf %790, %729 : vector<2x128xf32>
    %cst_204 = arith.constant dense<0.000000e+00> : vector<2x128xf32>
    %792 = tpu.matmul %778, %735, %cst_204 {dimension_numbers = #tpu.dot_dimension_numbers<[1], [0], [0], [1], [0, 0, 1, 1], [], []>} : vector<2x32xf32>, vector<32x128xf32>, vector<2x128xf32> -> vector<2x128xf32>
    %793 = arith.addf %791, %792 : vector<2x128xf32>
    %794 = vector.extract_strided_slice %793 {offsets = [0, 0], sizes = [2, 32], strides = [1, 1]} : vector<2x128xf32> to vector<2x32xf32>
    %795 = arith.negf %794 : vector<2x32xf32>
    %796 = math.exp %795 : vector<2x32xf32>
    %cst_205 = arith.constant 1.000000e+00 : f32
    %797 = vector.broadcast %cst_205 : f32 to vector<2x32xf32>
    %798 = arith.addf %797, %796 : vector<2x32xf32>
    %799 = arith.divf %797, %798 : vector<2x32xf32>
    %800 = vector.extract_strided_slice %793 {offsets = [0, 32], sizes = [2, 32], strides = [1, 1]} : vector<2x128xf32> to vector<2x32xf32>
    %801 = arith.negf %800 : vector<2x32xf32>
    %802 = math.exp %801 : vector<2x32xf32>
    %cst_206 = arith.constant 1.000000e+00 : f32
    %803 = vector.broadcast %cst_206 : f32 to vector<2x32xf32>
    %804 = arith.addf %803, %802 : vector<2x32xf32>
    %805 = arith.divf %803, %804 : vector<2x32xf32>
    %806 = vector.extract_strided_slice %793 {offsets = [0, 64], sizes = [2, 32], strides = [1, 1]} : vector<2x128xf32> to vector<2x32xf32>
    %807 = math.tanh %806 : vector<2x32xf32>
    %808 = vector.extract_strided_slice %793 {offsets = [0, 96], sizes = [2, 32], strides = [1, 1]} : vector<2x128xf32> to vector<2x32xf32>
    %809 = arith.negf %808 : vector<2x32xf32>
    %810 = math.exp %809 : vector<2x32xf32>
    %cst_207 = arith.constant 1.000000e+00 : f32
    %811 = vector.broadcast %cst_207 : f32 to vector<2x32xf32>
    %812 = arith.addf %811, %810 : vector<2x32xf32>
    %813 = arith.divf %811, %812 : vector<2x32xf32>
    %814 = arith.mulf %805, %781 : vector<2x32xf32>
    %815 = arith.mulf %799, %807 : vector<2x32xf32>
    %816 = arith.addf %814, %815 : vector<2x32xf32>
    %817 = math.tanh %816 : vector<2x32xf32>
    %818 = arith.mulf %813, %817 : vector<2x32xf32>
    %819 = vector.broadcast %c1_i32_197 : i32 to vector<2x1xi32>
    %820 = arith.cmpi sgt, %0, %819 : vector<2x1xi32>
    %821 = vector.shape_cast %820 : vector<2x1xi1> to vector<2x1xi1>
    %822 = vector.broadcast %821 : vector<2x1xi1> to vector<2x32xi1>
    %823 = arith.select %822, %818, %778 : vector<2x32xi1>, vector<2x32xf32>
    %824 = vector.shape_cast %820 : vector<2x1xi1> to vector<2x1xi1>
    %825 = vector.broadcast %824 : vector<2x1xi1> to vector<2x32xi1>
    %826 = arith.select %825, %816, %781 : vector<2x32xi1>, vector<2x32xf32>
    %c2_i32_208 = arith.constant 2 : i32
    %827 = arith.index_cast %c2_i32_208 : i32 to index
    %c0_209 = arith.constant 0 : index
    %c0_210 = arith.constant 0 : index
    %828 = vector.load %arg17[%827, %c0_209, %c0_210] : memref<8x2x32xf32, #tpu.memory_space<vmem>>, vector<1x2x32xf32>
    %829 = vector.shape_cast %828 : vector<1x2x32xf32> to vector<2x32xf32>
    %cst_211 = arith.constant dense<0.000000e+00> : vector<2x128xf32>
    %830 = tpu.matmul %829, %733, %cst_211 {dimension_numbers = #tpu.dot_dimension_numbers<[1], [0], [0], [1], [0, 0, 1, 1], [], []>} : vector<2x32xf32>, vector<32x128xf32>, vector<2x128xf32> -> vector<2x128xf32>
    %831 = arith.index_cast %c2_i32_208 : i32 to index
    %c0_212 = arith.constant 0 : index
    %c0_213 = arith.constant 0 : index
    %832 = vector.load %arg18[%831, %c0_212, %c0_213] : memref<8x2x32xf32, #tpu.memory_space<vmem>>, vector<1x2x32xf32>
    %833 = vector.shape_cast %832 : vector<1x2x32xf32> to vector<2x32xf32>
    %cst_214 = arith.constant dense<0.000000e+00> : vector<2x128xf32>
    %834 = tpu.matmul %833, %734, %cst_214 {dimension_numbers = #tpu.dot_dimension_numbers<[1], [0], [0], [1], [0, 0, 1, 1], [], []>} : vector<2x32xf32>, vector<32x128xf32>, vector<2x128xf32> -> vector<2x128xf32>
    %835 = arith.addf %830, %834 : vector<2x128xf32>
    %836 = arith.addf %835, %729 : vector<2x128xf32>
    %cst_215 = arith.constant dense<0.000000e+00> : vector<2x128xf32>
    %837 = tpu.matmul %823, %735, %cst_215 {dimension_numbers = #tpu.dot_dimension_numbers<[1], [0], [0], [1], [0, 0, 1, 1], [], []>} : vector<2x32xf32>, vector<32x128xf32>, vector<2x128xf32> -> vector<2x128xf32>
    %838 = arith.addf %836, %837 : vector<2x128xf32>
    %839 = vector.extract_strided_slice %838 {offsets = [0, 0], sizes = [2, 32], strides = [1, 1]} : vector<2x128xf32> to vector<2x32xf32>
    %840 = arith.negf %839 : vector<2x32xf32>
    %841 = math.exp %840 : vector<2x32xf32>
    %cst_216 = arith.constant 1.000000e+00 : f32
    %842 = vector.broadcast %cst_216 : f32 to vector<2x32xf32>
    %843 = arith.addf %842, %841 : vector<2x32xf32>
    %844 = arith.divf %842, %843 : vector<2x32xf32>
    %845 = vector.extract_strided_slice %838 {offsets = [0, 32], sizes = [2, 32], strides = [1, 1]} : vector<2x128xf32> to vector<2x32xf32>
    %846 = arith.negf %845 : vector<2x32xf32>
    %847 = math.exp %846 : vector<2x32xf32>
    %cst_217 = arith.constant 1.000000e+00 : f32
    %848 = vector.broadcast %cst_217 : f32 to vector<2x32xf32>
    %849 = arith.addf %848, %847 : vector<2x32xf32>
    %850 = arith.divf %848, %849 : vector<2x32xf32>
    %851 = vector.extract_strided_slice %838 {offsets = [0, 64], sizes = [2, 32], strides = [1, 1]} : vector<2x128xf32> to vector<2x32xf32>
    %852 = math.tanh %851 : vector<2x32xf32>
    %853 = vector.extract_strided_slice %838 {offsets = [0, 96], sizes = [2, 32], strides = [1, 1]} : vector<2x128xf32> to vector<2x32xf32>
    %854 = arith.negf %853 : vector<2x32xf32>
    %855 = math.exp %854 : vector<2x32xf32>
    %cst_218 = arith.constant 1.000000e+00 : f32
    %856 = vector.broadcast %cst_218 : f32 to vector<2x32xf32>
    %857 = arith.addf %856, %855 : vector<2x32xf32>
    %858 = arith.divf %856, %857 : vector<2x32xf32>
    %859 = arith.mulf %850, %826 : vector<2x32xf32>
    %860 = arith.mulf %844, %852 : vector<2x32xf32>
    %861 = arith.addf %859, %860 : vector<2x32xf32>
    %862 = math.tanh %861 : vector<2x32xf32>
    %863 = arith.mulf %858, %862 : vector<2x32xf32>
    %864 = vector.broadcast %c2_i32_208 : i32 to vector<2x1xi32>
    %865 = arith.cmpi sgt, %0, %864 : vector<2x1xi32>
    %866 = vector.shape_cast %865 : vector<2x1xi1> to vector<2x1xi1>
    %867 = vector.broadcast %866 : vector<2x1xi1> to vector<2x32xi1>
    %868 = arith.select %867, %863, %823 : vector<2x32xi1>, vector<2x32xf32>
    %869 = vector.shape_cast %865 : vector<2x1xi1> to vector<2x1xi1>
    %870 = vector.broadcast %869 : vector<2x1xi1> to vector<2x32xi1>
    %871 = arith.select %870, %861, %826 : vector<2x32xi1>, vector<2x32xf32>
    %c3_i32_219 = arith.constant 3 : i32
    %872 = arith.index_cast %c3_i32_219 : i32 to index
    %c0_220 = arith.constant 0 : index
    %c0_221 = arith.constant 0 : index
    %873 = vector.load %arg17[%872, %c0_220, %c0_221] : memref<8x2x32xf32, #tpu.memory_space<vmem>>, vector<1x2x32xf32>
    %874 = vector.shape_cast %873 : vector<1x2x32xf32> to vector<2x32xf32>
    %cst_222 = arith.constant dense<0.000000e+00> : vector<2x128xf32>
    %875 = tpu.matmul %874, %733, %cst_222 {dimension_numbers = #tpu.dot_dimension_numbers<[1], [0], [0], [1], [0, 0, 1, 1], [], []>} : vector<2x32xf32>, vector<32x128xf32>, vector<2x128xf32> -> vector<2x128xf32>
    %876 = arith.index_cast %c3_i32_219 : i32 to index
    %c0_223 = arith.constant 0 : index
    %c0_224 = arith.constant 0 : index
    %877 = vector.load %arg18[%876, %c0_223, %c0_224] : memref<8x2x32xf32, #tpu.memory_space<vmem>>, vector<1x2x32xf32>
    %878 = vector.shape_cast %877 : vector<1x2x32xf32> to vector<2x32xf32>
    %cst_225 = arith.constant dense<0.000000e+00> : vector<2x128xf32>
    %879 = tpu.matmul %878, %734, %cst_225 {dimension_numbers = #tpu.dot_dimension_numbers<[1], [0], [0], [1], [0, 0, 1, 1], [], []>} : vector<2x32xf32>, vector<32x128xf32>, vector<2x128xf32> -> vector<2x128xf32>
    %880 = arith.addf %875, %879 : vector<2x128xf32>
    %881 = arith.addf %880, %729 : vector<2x128xf32>
    %cst_226 = arith.constant dense<0.000000e+00> : vector<2x128xf32>
    %882 = tpu.matmul %868, %735, %cst_226 {dimension_numbers = #tpu.dot_dimension_numbers<[1], [0], [0], [1], [0, 0, 1, 1], [], []>} : vector<2x32xf32>, vector<32x128xf32>, vector<2x128xf32> -> vector<2x128xf32>
    %883 = arith.addf %881, %882 : vector<2x128xf32>
    %884 = vector.extract_strided_slice %883 {offsets = [0, 0], sizes = [2, 32], strides = [1, 1]} : vector<2x128xf32> to vector<2x32xf32>
    %885 = arith.negf %884 : vector<2x32xf32>
    %886 = math.exp %885 : vector<2x32xf32>
    %cst_227 = arith.constant 1.000000e+00 : f32
    %887 = vector.broadcast %cst_227 : f32 to vector<2x32xf32>
    %888 = arith.addf %887, %886 : vector<2x32xf32>
    %889 = arith.divf %887, %888 : vector<2x32xf32>
    %890 = vector.extract_strided_slice %883 {offsets = [0, 32], sizes = [2, 32], strides = [1, 1]} : vector<2x128xf32> to vector<2x32xf32>
    %891 = arith.negf %890 : vector<2x32xf32>
    %892 = math.exp %891 : vector<2x32xf32>
    %cst_228 = arith.constant 1.000000e+00 : f32
    %893 = vector.broadcast %cst_228 : f32 to vector<2x32xf32>
    %894 = arith.addf %893, %892 : vector<2x32xf32>
    %895 = arith.divf %893, %894 : vector<2x32xf32>
    %896 = vector.extract_strided_slice %883 {offsets = [0, 64], sizes = [2, 32], strides = [1, 1]} : vector<2x128xf32> to vector<2x32xf32>
    %897 = math.tanh %896 : vector<2x32xf32>
    %898 = vector.extract_strided_slice %883 {offsets = [0, 96], sizes = [2, 32], strides = [1, 1]} : vector<2x128xf32> to vector<2x32xf32>
    %899 = arith.negf %898 : vector<2x32xf32>
    %900 = math.exp %899 : vector<2x32xf32>
    %cst_229 = arith.constant 1.000000e+00 : f32
    %901 = vector.broadcast %cst_229 : f32 to vector<2x32xf32>
    %902 = arith.addf %901, %900 : vector<2x32xf32>
    %903 = arith.divf %901, %902 : vector<2x32xf32>
    %904 = arith.mulf %895, %871 : vector<2x32xf32>
    %905 = arith.mulf %889, %897 : vector<2x32xf32>
    %906 = arith.addf %904, %905 : vector<2x32xf32>
    %907 = math.tanh %906 : vector<2x32xf32>
    %908 = arith.mulf %903, %907 : vector<2x32xf32>
    %909 = vector.broadcast %c3_i32_219 : i32 to vector<2x1xi32>
    %910 = arith.cmpi sgt, %0, %909 : vector<2x1xi32>
    %911 = vector.shape_cast %910 : vector<2x1xi1> to vector<2x1xi1>
    %912 = vector.broadcast %911 : vector<2x1xi1> to vector<2x32xi1>
    %913 = arith.select %912, %908, %868 : vector<2x32xi1>, vector<2x32xf32>
    %914 = vector.shape_cast %910 : vector<2x1xi1> to vector<2x1xi1>
    %915 = vector.broadcast %914 : vector<2x1xi1> to vector<2x32xi1>
    %916 = arith.select %915, %906, %871 : vector<2x32xi1>, vector<2x32xf32>
    %c4_i32_230 = arith.constant 4 : i32
    %917 = arith.index_cast %c4_i32_230 : i32 to index
    %c0_231 = arith.constant 0 : index
    %c0_232 = arith.constant 0 : index
    %918 = vector.load %arg17[%917, %c0_231, %c0_232] : memref<8x2x32xf32, #tpu.memory_space<vmem>>, vector<1x2x32xf32>
    %919 = vector.shape_cast %918 : vector<1x2x32xf32> to vector<2x32xf32>
    %cst_233 = arith.constant dense<0.000000e+00> : vector<2x128xf32>
    %920 = tpu.matmul %919, %733, %cst_233 {dimension_numbers = #tpu.dot_dimension_numbers<[1], [0], [0], [1], [0, 0, 1, 1], [], []>} : vector<2x32xf32>, vector<32x128xf32>, vector<2x128xf32> -> vector<2x128xf32>
    %921 = arith.index_cast %c4_i32_230 : i32 to index
    %c0_234 = arith.constant 0 : index
    %c0_235 = arith.constant 0 : index
    %922 = vector.load %arg18[%921, %c0_234, %c0_235] : memref<8x2x32xf32, #tpu.memory_space<vmem>>, vector<1x2x32xf32>
    %923 = vector.shape_cast %922 : vector<1x2x32xf32> to vector<2x32xf32>
    %cst_236 = arith.constant dense<0.000000e+00> : vector<2x128xf32>
    %924 = tpu.matmul %923, %734, %cst_236 {dimension_numbers = #tpu.dot_dimension_numbers<[1], [0], [0], [1], [0, 0, 1, 1], [], []>} : vector<2x32xf32>, vector<32x128xf32>, vector<2x128xf32> -> vector<2x128xf32>
    %925 = arith.addf %920, %924 : vector<2x128xf32>
    %926 = arith.addf %925, %729 : vector<2x128xf32>
    %cst_237 = arith.constant dense<0.000000e+00> : vector<2x128xf32>
    %927 = tpu.matmul %913, %735, %cst_237 {dimension_numbers = #tpu.dot_dimension_numbers<[1], [0], [0], [1], [0, 0, 1, 1], [], []>} : vector<2x32xf32>, vector<32x128xf32>, vector<2x128xf32> -> vector<2x128xf32>
    %928 = arith.addf %926, %927 : vector<2x128xf32>
    %929 = vector.extract_strided_slice %928 {offsets = [0, 0], sizes = [2, 32], strides = [1, 1]} : vector<2x128xf32> to vector<2x32xf32>
    %930 = arith.negf %929 : vector<2x32xf32>
    %931 = math.exp %930 : vector<2x32xf32>
    %cst_238 = arith.constant 1.000000e+00 : f32
    %932 = vector.broadcast %cst_238 : f32 to vector<2x32xf32>
    %933 = arith.addf %932, %931 : vector<2x32xf32>
    %934 = arith.divf %932, %933 : vector<2x32xf32>
    %935 = vector.extract_strided_slice %928 {offsets = [0, 32], sizes = [2, 32], strides = [1, 1]} : vector<2x128xf32> to vector<2x32xf32>
    %936 = arith.negf %935 : vector<2x32xf32>
    %937 = math.exp %936 : vector<2x32xf32>
    %cst_239 = arith.constant 1.000000e+00 : f32
    %938 = vector.broadcast %cst_239 : f32 to vector<2x32xf32>
    %939 = arith.addf %938, %937 : vector<2x32xf32>
    %940 = arith.divf %938, %939 : vector<2x32xf32>
    %941 = vector.extract_strided_slice %928 {offsets = [0, 64], sizes = [2, 32], strides = [1, 1]} : vector<2x128xf32> to vector<2x32xf32>
    %942 = math.tanh %941 : vector<2x32xf32>
    %943 = vector.extract_strided_slice %928 {offsets = [0, 96], sizes = [2, 32], strides = [1, 1]} : vector<2x128xf32> to vector<2x32xf32>
    %944 = arith.negf %943 : vector<2x32xf32>
    %945 = math.exp %944 : vector<2x32xf32>
    %cst_240 = arith.constant 1.000000e+00 : f32
    %946 = vector.broadcast %cst_240 : f32 to vector<2x32xf32>
    %947 = arith.addf %946, %945 : vector<2x32xf32>
    %948 = arith.divf %946, %947 : vector<2x32xf32>
    %949 = arith.mulf %940, %916 : vector<2x32xf32>
    %950 = arith.mulf %934, %942 : vector<2x32xf32>
    %951 = arith.addf %949, %950 : vector<2x32xf32>
    %952 = math.tanh %951 : vector<2x32xf32>
    %953 = arith.mulf %948, %952 : vector<2x32xf32>
    %954 = vector.broadcast %c4_i32_230 : i32 to vector<2x1xi32>
    %955 = arith.cmpi sgt, %0, %954 : vector<2x1xi32>
    %956 = vector.shape_cast %955 : vector<2x1xi1> to vector<2x1xi1>
    %957 = vector.broadcast %956 : vector<2x1xi1> to vector<2x32xi1>
    %958 = arith.select %957, %953, %913 : vector<2x32xi1>, vector<2x32xf32>
    %959 = vector.shape_cast %955 : vector<2x1xi1> to vector<2x1xi1>
    %960 = vector.broadcast %959 : vector<2x1xi1> to vector<2x32xi1>
    %961 = arith.select %960, %951, %916 : vector<2x32xi1>, vector<2x32xf32>
    %c5_i32_241 = arith.constant 5 : i32
    %962 = arith.index_cast %c5_i32_241 : i32 to index
    %c0_242 = arith.constant 0 : index
    %c0_243 = arith.constant 0 : index
    %963 = vector.load %arg17[%962, %c0_242, %c0_243] : memref<8x2x32xf32, #tpu.memory_space<vmem>>, vector<1x2x32xf32>
    %964 = vector.shape_cast %963 : vector<1x2x32xf32> to vector<2x32xf32>
    %cst_244 = arith.constant dense<0.000000e+00> : vector<2x128xf32>
    %965 = tpu.matmul %964, %733, %cst_244 {dimension_numbers = #tpu.dot_dimension_numbers<[1], [0], [0], [1], [0, 0, 1, 1], [], []>} : vector<2x32xf32>, vector<32x128xf32>, vector<2x128xf32> -> vector<2x128xf32>
    %966 = arith.index_cast %c5_i32_241 : i32 to index
    %c0_245 = arith.constant 0 : index
    %c0_246 = arith.constant 0 : index
    %967 = vector.load %arg18[%966, %c0_245, %c0_246] : memref<8x2x32xf32, #tpu.memory_space<vmem>>, vector<1x2x32xf32>
    %968 = vector.shape_cast %967 : vector<1x2x32xf32> to vector<2x32xf32>
    %cst_247 = arith.constant dense<0.000000e+00> : vector<2x128xf32>
    %969 = tpu.matmul %968, %734, %cst_247 {dimension_numbers = #tpu.dot_dimension_numbers<[1], [0], [0], [1], [0, 0, 1, 1], [], []>} : vector<2x32xf32>, vector<32x128xf32>, vector<2x128xf32> -> vector<2x128xf32>
    %970 = arith.addf %965, %969 : vector<2x128xf32>
    %971 = arith.addf %970, %729 : vector<2x128xf32>
    %cst_248 = arith.constant dense<0.000000e+00> : vector<2x128xf32>
    %972 = tpu.matmul %958, %735, %cst_248 {dimension_numbers = #tpu.dot_dimension_numbers<[1], [0], [0], [1], [0, 0, 1, 1], [], []>} : vector<2x32xf32>, vector<32x128xf32>, vector<2x128xf32> -> vector<2x128xf32>
    %973 = arith.addf %971, %972 : vector<2x128xf32>
    %974 = vector.extract_strided_slice %973 {offsets = [0, 0], sizes = [2, 32], strides = [1, 1]} : vector<2x128xf32> to vector<2x32xf32>
    %975 = arith.negf %974 : vector<2x32xf32>
    %976 = math.exp %975 : vector<2x32xf32>
    %cst_249 = arith.constant 1.000000e+00 : f32
    %977 = vector.broadcast %cst_249 : f32 to vector<2x32xf32>
    %978 = arith.addf %977, %976 : vector<2x32xf32>
    %979 = arith.divf %977, %978 : vector<2x32xf32>
    %980 = vector.extract_strided_slice %973 {offsets = [0, 32], sizes = [2, 32], strides = [1, 1]} : vector<2x128xf32> to vector<2x32xf32>
    %981 = arith.negf %980 : vector<2x32xf32>
    %982 = math.exp %981 : vector<2x32xf32>
    %cst_250 = arith.constant 1.000000e+00 : f32
    %983 = vector.broadcast %cst_250 : f32 to vector<2x32xf32>
    %984 = arith.addf %983, %982 : vector<2x32xf32>
    %985 = arith.divf %983, %984 : vector<2x32xf32>
    %986 = vector.extract_strided_slice %973 {offsets = [0, 64], sizes = [2, 32], strides = [1, 1]} : vector<2x128xf32> to vector<2x32xf32>
    %987 = math.tanh %986 : vector<2x32xf32>
    %988 = vector.extract_strided_slice %973 {offsets = [0, 96], sizes = [2, 32], strides = [1, 1]} : vector<2x128xf32> to vector<2x32xf32>
    %989 = arith.negf %988 : vector<2x32xf32>
    %990 = math.exp %989 : vector<2x32xf32>
    %cst_251 = arith.constant 1.000000e+00 : f32
    %991 = vector.broadcast %cst_251 : f32 to vector<2x32xf32>
    %992 = arith.addf %991, %990 : vector<2x32xf32>
    %993 = arith.divf %991, %992 : vector<2x32xf32>
    %994 = arith.mulf %985, %961 : vector<2x32xf32>
    %995 = arith.mulf %979, %987 : vector<2x32xf32>
    %996 = arith.addf %994, %995 : vector<2x32xf32>
    %997 = math.tanh %996 : vector<2x32xf32>
    %998 = arith.mulf %993, %997 : vector<2x32xf32>
    %999 = vector.broadcast %c5_i32_241 : i32 to vector<2x1xi32>
    %1000 = arith.cmpi sgt, %0, %999 : vector<2x1xi32>
    %1001 = vector.shape_cast %1000 : vector<2x1xi1> to vector<2x1xi1>
    %1002 = vector.broadcast %1001 : vector<2x1xi1> to vector<2x32xi1>
    %1003 = arith.select %1002, %998, %958 : vector<2x32xi1>, vector<2x32xf32>
    %1004 = vector.shape_cast %1000 : vector<2x1xi1> to vector<2x1xi1>
    %1005 = vector.broadcast %1004 : vector<2x1xi1> to vector<2x32xi1>
    %1006 = arith.select %1005, %996, %961 : vector<2x32xi1>, vector<2x32xf32>
    %c6_i32_252 = arith.constant 6 : i32
    %1007 = arith.index_cast %c6_i32_252 : i32 to index
    %c0_253 = arith.constant 0 : index
    %c0_254 = arith.constant 0 : index
    %1008 = vector.load %arg17[%1007, %c0_253, %c0_254] : memref<8x2x32xf32, #tpu.memory_space<vmem>>, vector<1x2x32xf32>
    %1009 = vector.shape_cast %1008 : vector<1x2x32xf32> to vector<2x32xf32>
    %cst_255 = arith.constant dense<0.000000e+00> : vector<2x128xf32>
    %1010 = tpu.matmul %1009, %733, %cst_255 {dimension_numbers = #tpu.dot_dimension_numbers<[1], [0], [0], [1], [0, 0, 1, 1], [], []>} : vector<2x32xf32>, vector<32x128xf32>, vector<2x128xf32> -> vector<2x128xf32>
    %1011 = arith.index_cast %c6_i32_252 : i32 to index
    %c0_256 = arith.constant 0 : index
    %c0_257 = arith.constant 0 : index
    %1012 = vector.load %arg18[%1011, %c0_256, %c0_257] : memref<8x2x32xf32, #tpu.memory_space<vmem>>, vector<1x2x32xf32>
    %1013 = vector.shape_cast %1012 : vector<1x2x32xf32> to vector<2x32xf32>
    %cst_258 = arith.constant dense<0.000000e+00> : vector<2x128xf32>
    %1014 = tpu.matmul %1013, %734, %cst_258 {dimension_numbers = #tpu.dot_dimension_numbers<[1], [0], [0], [1], [0, 0, 1, 1], [], []>} : vector<2x32xf32>, vector<32x128xf32>, vector<2x128xf32> -> vector<2x128xf32>
    %1015 = arith.addf %1010, %1014 : vector<2x128xf32>
    %1016 = arith.addf %1015, %729 : vector<2x128xf32>
    %cst_259 = arith.constant dense<0.000000e+00> : vector<2x128xf32>
    %1017 = tpu.matmul %1003, %735, %cst_259 {dimension_numbers = #tpu.dot_dimension_numbers<[1], [0], [0], [1], [0, 0, 1, 1], [], []>} : vector<2x32xf32>, vector<32x128xf32>, vector<2x128xf32> -> vector<2x128xf32>
    %1018 = arith.addf %1016, %1017 : vector<2x128xf32>
    %1019 = vector.extract_strided_slice %1018 {offsets = [0, 0], sizes = [2, 32], strides = [1, 1]} : vector<2x128xf32> to vector<2x32xf32>
    %1020 = arith.negf %1019 : vector<2x32xf32>
    %1021 = math.exp %1020 : vector<2x32xf32>
    %cst_260 = arith.constant 1.000000e+00 : f32
    %1022 = vector.broadcast %cst_260 : f32 to vector<2x32xf32>
    %1023 = arith.addf %1022, %1021 : vector<2x32xf32>
    %1024 = arith.divf %1022, %1023 : vector<2x32xf32>
    %1025 = vector.extract_strided_slice %1018 {offsets = [0, 32], sizes = [2, 32], strides = [1, 1]} : vector<2x128xf32> to vector<2x32xf32>
    %1026 = arith.negf %1025 : vector<2x32xf32>
    %1027 = math.exp %1026 : vector<2x32xf32>
    %cst_261 = arith.constant 1.000000e+00 : f32
    %1028 = vector.broadcast %cst_261 : f32 to vector<2x32xf32>
    %1029 = arith.addf %1028, %1027 : vector<2x32xf32>
    %1030 = arith.divf %1028, %1029 : vector<2x32xf32>
    %1031 = vector.extract_strided_slice %1018 {offsets = [0, 64], sizes = [2, 32], strides = [1, 1]} : vector<2x128xf32> to vector<2x32xf32>
    %1032 = math.tanh %1031 : vector<2x32xf32>
    %1033 = vector.extract_strided_slice %1018 {offsets = [0, 96], sizes = [2, 32], strides = [1, 1]} : vector<2x128xf32> to vector<2x32xf32>
    %1034 = arith.negf %1033 : vector<2x32xf32>
    %1035 = math.exp %1034 : vector<2x32xf32>
    %cst_262 = arith.constant 1.000000e+00 : f32
    %1036 = vector.broadcast %cst_262 : f32 to vector<2x32xf32>
    %1037 = arith.addf %1036, %1035 : vector<2x32xf32>
    %1038 = arith.divf %1036, %1037 : vector<2x32xf32>
    %1039 = arith.mulf %1030, %1006 : vector<2x32xf32>
    %1040 = arith.mulf %1024, %1032 : vector<2x32xf32>
    %1041 = arith.addf %1039, %1040 : vector<2x32xf32>
    %1042 = math.tanh %1041 : vector<2x32xf32>
    %1043 = arith.mulf %1038, %1042 : vector<2x32xf32>
    %1044 = vector.broadcast %c6_i32_252 : i32 to vector<2x1xi32>
    %1045 = arith.cmpi sgt, %0, %1044 : vector<2x1xi32>
    %1046 = vector.shape_cast %1045 : vector<2x1xi1> to vector<2x1xi1>
    %1047 = vector.broadcast %1046 : vector<2x1xi1> to vector<2x32xi1>
    %1048 = arith.select %1047, %1043, %1003 : vector<2x32xi1>, vector<2x32xf32>
    %1049 = vector.shape_cast %1045 : vector<2x1xi1> to vector<2x1xi1>
    %1050 = vector.broadcast %1049 : vector<2x1xi1> to vector<2x32xi1>
    %1051 = arith.select %1050, %1041, %1006 : vector<2x32xi1>, vector<2x32xf32>
    %c7_i32_263 = arith.constant 7 : i32
    %1052 = arith.index_cast %c7_i32_263 : i32 to index
    %c0_264 = arith.constant 0 : index
    %c0_265 = arith.constant 0 : index
    %1053 = vector.load %arg17[%1052, %c0_264, %c0_265] : memref<8x2x32xf32, #tpu.memory_space<vmem>>, vector<1x2x32xf32>
    %1054 = vector.shape_cast %1053 : vector<1x2x32xf32> to vector<2x32xf32>
    %cst_266 = arith.constant dense<0.000000e+00> : vector<2x128xf32>
    %1055 = tpu.matmul %1054, %733, %cst_266 {dimension_numbers = #tpu.dot_dimension_numbers<[1], [0], [0], [1], [0, 0, 1, 1], [], []>} : vector<2x32xf32>, vector<32x128xf32>, vector<2x128xf32> -> vector<2x128xf32>
    %1056 = arith.index_cast %c7_i32_263 : i32 to index
    %c0_267 = arith.constant 0 : index
    %c0_268 = arith.constant 0 : index
    %1057 = vector.load %arg18[%1056, %c0_267, %c0_268] : memref<8x2x32xf32, #tpu.memory_space<vmem>>, vector<1x2x32xf32>
    %1058 = vector.shape_cast %1057 : vector<1x2x32xf32> to vector<2x32xf32>
    %cst_269 = arith.constant dense<0.000000e+00> : vector<2x128xf32>
    %1059 = tpu.matmul %1058, %734, %cst_269 {dimension_numbers = #tpu.dot_dimension_numbers<[1], [0], [0], [1], [0, 0, 1, 1], [], []>} : vector<2x32xf32>, vector<32x128xf32>, vector<2x128xf32> -> vector<2x128xf32>
    %1060 = arith.addf %1055, %1059 : vector<2x128xf32>
    %1061 = arith.addf %1060, %729 : vector<2x128xf32>
    %cst_270 = arith.constant dense<0.000000e+00> : vector<2x128xf32>
    %1062 = tpu.matmul %1048, %735, %cst_270 {dimension_numbers = #tpu.dot_dimension_numbers<[1], [0], [0], [1], [0, 0, 1, 1], [], []>} : vector<2x32xf32>, vector<32x128xf32>, vector<2x128xf32> -> vector<2x128xf32>
    %1063 = arith.addf %1061, %1062 : vector<2x128xf32>
    %1064 = vector.extract_strided_slice %1063 {offsets = [0, 0], sizes = [2, 32], strides = [1, 1]} : vector<2x128xf32> to vector<2x32xf32>
    %1065 = arith.negf %1064 : vector<2x32xf32>
    %1066 = math.exp %1065 : vector<2x32xf32>
    %cst_271 = arith.constant 1.000000e+00 : f32
    %1067 = vector.broadcast %cst_271 : f32 to vector<2x32xf32>
    %1068 = arith.addf %1067, %1066 : vector<2x32xf32>
    %1069 = arith.divf %1067, %1068 : vector<2x32xf32>
    %1070 = vector.extract_strided_slice %1063 {offsets = [0, 32], sizes = [2, 32], strides = [1, 1]} : vector<2x128xf32> to vector<2x32xf32>
    %1071 = arith.negf %1070 : vector<2x32xf32>
    %1072 = math.exp %1071 : vector<2x32xf32>
    %cst_272 = arith.constant 1.000000e+00 : f32
    %1073 = vector.broadcast %cst_272 : f32 to vector<2x32xf32>
    %1074 = arith.addf %1073, %1072 : vector<2x32xf32>
    %1075 = arith.divf %1073, %1074 : vector<2x32xf32>
    %1076 = vector.extract_strided_slice %1063 {offsets = [0, 64], sizes = [2, 32], strides = [1, 1]} : vector<2x128xf32> to vector<2x32xf32>
    %1077 = math.tanh %1076 : vector<2x32xf32>
    %1078 = vector.extract_strided_slice %1063 {offsets = [0, 96], sizes = [2, 32], strides = [1, 1]} : vector<2x128xf32> to vector<2x32xf32>
    %1079 = arith.negf %1078 : vector<2x32xf32>
    %1080 = math.exp %1079 : vector<2x32xf32>
    %cst_273 = arith.constant 1.000000e+00 : f32
    %1081 = vector.broadcast %cst_273 : f32 to vector<2x32xf32>
    %1082 = arith.addf %1081, %1080 : vector<2x32xf32>
    %1083 = arith.divf %1081, %1082 : vector<2x32xf32>
    %1084 = arith.mulf %1075, %1051 : vector<2x32xf32>
    %1085 = arith.mulf %1069, %1077 : vector<2x32xf32>
    %1086 = arith.addf %1084, %1085 : vector<2x32xf32>
    %1087 = math.tanh %1086 : vector<2x32xf32>
    %1088 = arith.mulf %1083, %1087 : vector<2x32xf32>
    %1089 = vector.broadcast %c7_i32_263 : i32 to vector<2x1xi32>
    %1090 = arith.cmpi sgt, %0, %1089 : vector<2x1xi32>
    %1091 = vector.shape_cast %1090 : vector<2x1xi1> to vector<2x1xi1>
    %1092 = vector.broadcast %1091 : vector<2x1xi1> to vector<2x32xi1>
    %1093 = arith.select %1092, %1088, %1048 : vector<2x32xi1>, vector<2x32xf32>
    %1094 = vector.shape_cast %1090 : vector<2x1xi1> to vector<2x1xi1>
    %1095 = vector.broadcast %1094 : vector<2x1xi1> to vector<2x32xi1>
    %1096 = arith.select %1095, %1086, %1051 : vector<2x32xi1>, vector<2x32xf32>
    %c8_i32_274 = arith.constant 8 : i32
    %1097 = vector.extract_strided_slice %726 {offsets = [0, 0], sizes = [32, 128], strides = [1, 1]} : vector<64x128xf32> to vector<32x128xf32>
    %1098 = vector.extract_strided_slice %726 {offsets = [32, 0], sizes = [32, 128], strides = [1, 1]} : vector<64x128xf32> to vector<32x128xf32>
    %c0_275 = arith.constant 0 : index
    %c0_276 = arith.constant 0 : index
    %1099 = vector.load %arg12[%c0_275, %c0_276] : memref<32x128xf32, #tpu.memory_space<vmem>>, vector<32x128xf32>
    %cst_277 = arith.constant 0.000000e+00 : f32
    %1100 = vector.broadcast %cst_277 : f32 to vector<2x32xf32>
    %c0_i32_278 = arith.constant 0 : i32
    %c7_i32_279 = arith.constant 7 : i32
    %1101 = arith.subi %c7_i32_279, %c0_i32_278 : i32
    %1102 = arith.index_cast %1101 : i32 to index
    %c0_280 = arith.constant 0 : index
    %c0_281 = arith.constant 0 : index
    %1103 = vector.load %arg17[%1102, %c0_280, %c0_281] : memref<8x2x32xf32, #tpu.memory_space<vmem>>, vector<1x2x32xf32>
    %1104 = vector.shape_cast %1103 : vector<1x2x32xf32> to vector<2x32xf32>
    %cst_282 = arith.constant dense<0.000000e+00> : vector<2x128xf32>
    %1105 = tpu.matmul %1104, %1097, %cst_282 {dimension_numbers = #tpu.dot_dimension_numbers<[1], [0], [0], [1], [0, 0, 1, 1], [], []>} : vector<2x32xf32>, vector<32x128xf32>, vector<2x128xf32> -> vector<2x128xf32>
    %1106 = arith.index_cast %1101 : i32 to index
    %c0_283 = arith.constant 0 : index
    %c0_284 = arith.constant 0 : index
    %1107 = vector.load %arg18[%1106, %c0_283, %c0_284] : memref<8x2x32xf32, #tpu.memory_space<vmem>>, vector<1x2x32xf32>
    %1108 = vector.shape_cast %1107 : vector<1x2x32xf32> to vector<2x32xf32>
    %cst_285 = arith.constant dense<0.000000e+00> : vector<2x128xf32>
    %1109 = tpu.matmul %1108, %1098, %cst_285 {dimension_numbers = #tpu.dot_dimension_numbers<[1], [0], [0], [1], [0, 0, 1, 1], [], []>} : vector<2x32xf32>, vector<32x128xf32>, vector<2x128xf32> -> vector<2x128xf32>
    %1110 = arith.addf %1105, %1109 : vector<2x128xf32>
    %1111 = arith.addf %1110, %732 : vector<2x128xf32>
    %cst_286 = arith.constant dense<0.000000e+00> : vector<2x128xf32>
    %1112 = tpu.matmul %1100, %1099, %cst_286 {dimension_numbers = #tpu.dot_dimension_numbers<[1], [0], [0], [1], [0, 0, 1, 1], [], []>} : vector<2x32xf32>, vector<32x128xf32>, vector<2x128xf32> -> vector<2x128xf32>
    %1113 = arith.addf %1111, %1112 : vector<2x128xf32>
    %1114 = vector.extract_strided_slice %1113 {offsets = [0, 0], sizes = [2, 32], strides = [1, 1]} : vector<2x128xf32> to vector<2x32xf32>
    %1115 = arith.negf %1114 : vector<2x32xf32>
    %1116 = math.exp %1115 : vector<2x32xf32>
    %cst_287 = arith.constant 1.000000e+00 : f32
    %1117 = vector.broadcast %cst_287 : f32 to vector<2x32xf32>
    %1118 = arith.addf %1117, %1116 : vector<2x32xf32>
    %1119 = arith.divf %1117, %1118 : vector<2x32xf32>
    %1120 = vector.extract_strided_slice %1113 {offsets = [0, 32], sizes = [2, 32], strides = [1, 1]} : vector<2x128xf32> to vector<2x32xf32>
    %1121 = arith.negf %1120 : vector<2x32xf32>
    %1122 = math.exp %1121 : vector<2x32xf32>
    %cst_288 = arith.constant 1.000000e+00 : f32
    %1123 = vector.broadcast %cst_288 : f32 to vector<2x32xf32>
    %1124 = arith.addf %1123, %1122 : vector<2x32xf32>
    %1125 = arith.divf %1123, %1124 : vector<2x32xf32>
    %1126 = vector.extract_strided_slice %1113 {offsets = [0, 64], sizes = [2, 32], strides = [1, 1]} : vector<2x128xf32> to vector<2x32xf32>
    %1127 = math.tanh %1126 : vector<2x32xf32>
    %1128 = vector.extract_strided_slice %1113 {offsets = [0, 96], sizes = [2, 32], strides = [1, 1]} : vector<2x128xf32> to vector<2x32xf32>
    %1129 = arith.negf %1128 : vector<2x32xf32>
    %1130 = math.exp %1129 : vector<2x32xf32>
    %cst_289 = arith.constant 1.000000e+00 : f32
    %1131 = vector.broadcast %cst_289 : f32 to vector<2x32xf32>
    %1132 = arith.addf %1131, %1130 : vector<2x32xf32>
    %1133 = arith.divf %1131, %1132 : vector<2x32xf32>
    %1134 = arith.mulf %1125, %1100 : vector<2x32xf32>
    %1135 = arith.mulf %1119, %1127 : vector<2x32xf32>
    %1136 = arith.addf %1134, %1135 : vector<2x32xf32>
    %1137 = math.tanh %1136 : vector<2x32xf32>
    %1138 = arith.mulf %1133, %1137 : vector<2x32xf32>
    %1139 = vector.broadcast %1101 : i32 to vector<2x1xi32>
    %1140 = arith.cmpi sgt, %0, %1139 : vector<2x1xi32>
    %1141 = vector.shape_cast %1140 : vector<2x1xi1> to vector<2x1xi1>
    %1142 = vector.broadcast %1141 : vector<2x1xi1> to vector<2x32xi1>
    %1143 = arith.select %1142, %1138, %1100 : vector<2x32xi1>, vector<2x32xf32>
    %1144 = vector.shape_cast %1140 : vector<2x1xi1> to vector<2x1xi1>
    %1145 = vector.broadcast %1144 : vector<2x1xi1> to vector<2x32xi1>
    %1146 = arith.select %1145, %1136, %1100 : vector<2x32xi1>, vector<2x32xf32>
    %c1_i32_290 = arith.constant 1 : i32
    %c7_i32_291 = arith.constant 7 : i32
    %1147 = arith.subi %c7_i32_291, %c1_i32_290 : i32
    %1148 = arith.index_cast %1147 : i32 to index
    %c0_292 = arith.constant 0 : index
    %c0_293 = arith.constant 0 : index
    %1149 = vector.load %arg17[%1148, %c0_292, %c0_293] : memref<8x2x32xf32, #tpu.memory_space<vmem>>, vector<1x2x32xf32>
    %1150 = vector.shape_cast %1149 : vector<1x2x32xf32> to vector<2x32xf32>
    %cst_294 = arith.constant dense<0.000000e+00> : vector<2x128xf32>
    %1151 = tpu.matmul %1150, %1097, %cst_294 {dimension_numbers = #tpu.dot_dimension_numbers<[1], [0], [0], [1], [0, 0, 1, 1], [], []>} : vector<2x32xf32>, vector<32x128xf32>, vector<2x128xf32> -> vector<2x128xf32>
    %1152 = arith.index_cast %1147 : i32 to index
    %c0_295 = arith.constant 0 : index
    %c0_296 = arith.constant 0 : index
    %1153 = vector.load %arg18[%1152, %c0_295, %c0_296] : memref<8x2x32xf32, #tpu.memory_space<vmem>>, vector<1x2x32xf32>
    %1154 = vector.shape_cast %1153 : vector<1x2x32xf32> to vector<2x32xf32>
    %cst_297 = arith.constant dense<0.000000e+00> : vector<2x128xf32>
    %1155 = tpu.matmul %1154, %1098, %cst_297 {dimension_numbers = #tpu.dot_dimension_numbers<[1], [0], [0], [1], [0, 0, 1, 1], [], []>} : vector<2x32xf32>, vector<32x128xf32>, vector<2x128xf32> -> vector<2x128xf32>
    %1156 = arith.addf %1151, %1155 : vector<2x128xf32>
    %1157 = arith.addf %1156, %732 : vector<2x128xf32>
    %cst_298 = arith.constant dense<0.000000e+00> : vector<2x128xf32>
    %1158 = tpu.matmul %1143, %1099, %cst_298 {dimension_numbers = #tpu.dot_dimension_numbers<[1], [0], [0], [1], [0, 0, 1, 1], [], []>} : vector<2x32xf32>, vector<32x128xf32>, vector<2x128xf32> -> vector<2x128xf32>
    %1159 = arith.addf %1157, %1158 : vector<2x128xf32>
    %1160 = vector.extract_strided_slice %1159 {offsets = [0, 0], sizes = [2, 32], strides = [1, 1]} : vector<2x128xf32> to vector<2x32xf32>
    %1161 = arith.negf %1160 : vector<2x32xf32>
    %1162 = math.exp %1161 : vector<2x32xf32>
    %cst_299 = arith.constant 1.000000e+00 : f32
    %1163 = vector.broadcast %cst_299 : f32 to vector<2x32xf32>
    %1164 = arith.addf %1163, %1162 : vector<2x32xf32>
    %1165 = arith.divf %1163, %1164 : vector<2x32xf32>
    %1166 = vector.extract_strided_slice %1159 {offsets = [0, 32], sizes = [2, 32], strides = [1, 1]} : vector<2x128xf32> to vector<2x32xf32>
    %1167 = arith.negf %1166 : vector<2x32xf32>
    %1168 = math.exp %1167 : vector<2x32xf32>
    %cst_300 = arith.constant 1.000000e+00 : f32
    %1169 = vector.broadcast %cst_300 : f32 to vector<2x32xf32>
    %1170 = arith.addf %1169, %1168 : vector<2x32xf32>
    %1171 = arith.divf %1169, %1170 : vector<2x32xf32>
    %1172 = vector.extract_strided_slice %1159 {offsets = [0, 64], sizes = [2, 32], strides = [1, 1]} : vector<2x128xf32> to vector<2x32xf32>
    %1173 = math.tanh %1172 : vector<2x32xf32>
    %1174 = vector.extract_strided_slice %1159 {offsets = [0, 96], sizes = [2, 32], strides = [1, 1]} : vector<2x128xf32> to vector<2x32xf32>
    %1175 = arith.negf %1174 : vector<2x32xf32>
    %1176 = math.exp %1175 : vector<2x32xf32>
    %cst_301 = arith.constant 1.000000e+00 : f32
    %1177 = vector.broadcast %cst_301 : f32 to vector<2x32xf32>
    %1178 = arith.addf %1177, %1176 : vector<2x32xf32>
    %1179 = arith.divf %1177, %1178 : vector<2x32xf32>
    %1180 = arith.mulf %1171, %1146 : vector<2x32xf32>
    %1181 = arith.mulf %1165, %1173 : vector<2x32xf32>
    %1182 = arith.addf %1180, %1181 : vector<2x32xf32>
    %1183 = math.tanh %1182 : vector<2x32xf32>
    %1184 = arith.mulf %1179, %1183 : vector<2x32xf32>
    %1185 = vector.broadcast %1147 : i32 to vector<2x1xi32>
    %1186 = arith.cmpi sgt, %0, %1185 : vector<2x1xi32>
    %1187 = vector.shape_cast %1186 : vector<2x1xi1> to vector<2x1xi1>
    %1188 = vector.broadcast %1187 : vector<2x1xi1> to vector<2x32xi1>
    %1189 = arith.select %1188, %1184, %1143 : vector<2x32xi1>, vector<2x32xf32>
    %1190 = vector.shape_cast %1186 : vector<2x1xi1> to vector<2x1xi1>
    %1191 = vector.broadcast %1190 : vector<2x1xi1> to vector<2x32xi1>
    %1192 = arith.select %1191, %1182, %1146 : vector<2x32xi1>, vector<2x32xf32>
    %c2_i32_302 = arith.constant 2 : i32
    %c7_i32_303 = arith.constant 7 : i32
    %1193 = arith.subi %c7_i32_303, %c2_i32_302 : i32
    %1194 = arith.index_cast %1193 : i32 to index
    %c0_304 = arith.constant 0 : index
    %c0_305 = arith.constant 0 : index
    %1195 = vector.load %arg17[%1194, %c0_304, %c0_305] : memref<8x2x32xf32, #tpu.memory_space<vmem>>, vector<1x2x32xf32>
    %1196 = vector.shape_cast %1195 : vector<1x2x32xf32> to vector<2x32xf32>
    %cst_306 = arith.constant dense<0.000000e+00> : vector<2x128xf32>
    %1197 = tpu.matmul %1196, %1097, %cst_306 {dimension_numbers = #tpu.dot_dimension_numbers<[1], [0], [0], [1], [0, 0, 1, 1], [], []>} : vector<2x32xf32>, vector<32x128xf32>, vector<2x128xf32> -> vector<2x128xf32>
    %1198 = arith.index_cast %1193 : i32 to index
    %c0_307 = arith.constant 0 : index
    %c0_308 = arith.constant 0 : index
    %1199 = vector.load %arg18[%1198, %c0_307, %c0_308] : memref<8x2x32xf32, #tpu.memory_space<vmem>>, vector<1x2x32xf32>
    %1200 = vector.shape_cast %1199 : vector<1x2x32xf32> to vector<2x32xf32>
    %cst_309 = arith.constant dense<0.000000e+00> : vector<2x128xf32>
    %1201 = tpu.matmul %1200, %1098, %cst_309 {dimension_numbers = #tpu.dot_dimension_numbers<[1], [0], [0], [1], [0, 0, 1, 1], [], []>} : vector<2x32xf32>, vector<32x128xf32>, vector<2x128xf32> -> vector<2x128xf32>
    %1202 = arith.addf %1197, %1201 : vector<2x128xf32>
    %1203 = arith.addf %1202, %732 : vector<2x128xf32>
    %cst_310 = arith.constant dense<0.000000e+00> : vector<2x128xf32>
    %1204 = tpu.matmul %1189, %1099, %cst_310 {dimension_numbers = #tpu.dot_dimension_numbers<[1], [0], [0], [1], [0, 0, 1, 1], [], []>} : vector<2x32xf32>, vector<32x128xf32>, vector<2x128xf32> -> vector<2x128xf32>
    %1205 = arith.addf %1203, %1204 : vector<2x128xf32>
    %1206 = vector.extract_strided_slice %1205 {offsets = [0, 0], sizes = [2, 32], strides = [1, 1]} : vector<2x128xf32> to vector<2x32xf32>
    %1207 = arith.negf %1206 : vector<2x32xf32>
    %1208 = math.exp %1207 : vector<2x32xf32>
    %cst_311 = arith.constant 1.000000e+00 : f32
    %1209 = vector.broadcast %cst_311 : f32 to vector<2x32xf32>
    %1210 = arith.addf %1209, %1208 : vector<2x32xf32>
    %1211 = arith.divf %1209, %1210 : vector<2x32xf32>
    %1212 = vector.extract_strided_slice %1205 {offsets = [0, 32], sizes = [2, 32], strides = [1, 1]} : vector<2x128xf32> to vector<2x32xf32>
    %1213 = arith.negf %1212 : vector<2x32xf32>
    %1214 = math.exp %1213 : vector<2x32xf32>
    %cst_312 = arith.constant 1.000000e+00 : f32
    %1215 = vector.broadcast %cst_312 : f32 to vector<2x32xf32>
    %1216 = arith.addf %1215, %1214 : vector<2x32xf32>
    %1217 = arith.divf %1215, %1216 : vector<2x32xf32>
    %1218 = vector.extract_strided_slice %1205 {offsets = [0, 64], sizes = [2, 32], strides = [1, 1]} : vector<2x128xf32> to vector<2x32xf32>
    %1219 = math.tanh %1218 : vector<2x32xf32>
    %1220 = vector.extract_strided_slice %1205 {offsets = [0, 96], sizes = [2, 32], strides = [1, 1]} : vector<2x128xf32> to vector<2x32xf32>
    %1221 = arith.negf %1220 : vector<2x32xf32>
    %1222 = math.exp %1221 : vector<2x32xf32>
    %cst_313 = arith.constant 1.000000e+00 : f32
    %1223 = vector.broadcast %cst_313 : f32 to vector<2x32xf32>
    %1224 = arith.addf %1223, %1222 : vector<2x32xf32>
    %1225 = arith.divf %1223, %1224 : vector<2x32xf32>
    %1226 = arith.mulf %1217, %1192 : vector<2x32xf32>
    %1227 = arith.mulf %1211, %1219 : vector<2x32xf32>
    %1228 = arith.addf %1226, %1227 : vector<2x32xf32>
    %1229 = math.tanh %1228 : vector<2x32xf32>
    %1230 = arith.mulf %1225, %1229 : vector<2x32xf32>
    %1231 = vector.broadcast %1193 : i32 to vector<2x1xi32>
    %1232 = arith.cmpi sgt, %0, %1231 : vector<2x1xi32>
    %1233 = vector.shape_cast %1232 : vector<2x1xi1> to vector<2x1xi1>
    %1234 = vector.broadcast %1233 : vector<2x1xi1> to vector<2x32xi1>
    %1235 = arith.select %1234, %1230, %1189 : vector<2x32xi1>, vector<2x32xf32>
    %1236 = vector.shape_cast %1232 : vector<2x1xi1> to vector<2x1xi1>
    %1237 = vector.broadcast %1236 : vector<2x1xi1> to vector<2x32xi1>
    %1238 = arith.select %1237, %1228, %1192 : vector<2x32xi1>, vector<2x32xf32>
    %c3_i32_314 = arith.constant 3 : i32
    %c7_i32_315 = arith.constant 7 : i32
    %1239 = arith.subi %c7_i32_315, %c3_i32_314 : i32
    %1240 = arith.index_cast %1239 : i32 to index
    %c0_316 = arith.constant 0 : index
    %c0_317 = arith.constant 0 : index
    %1241 = vector.load %arg17[%1240, %c0_316, %c0_317] : memref<8x2x32xf32, #tpu.memory_space<vmem>>, vector<1x2x32xf32>
    %1242 = vector.shape_cast %1241 : vector<1x2x32xf32> to vector<2x32xf32>
    %cst_318 = arith.constant dense<0.000000e+00> : vector<2x128xf32>
    %1243 = tpu.matmul %1242, %1097, %cst_318 {dimension_numbers = #tpu.dot_dimension_numbers<[1], [0], [0], [1], [0, 0, 1, 1], [], []>} : vector<2x32xf32>, vector<32x128xf32>, vector<2x128xf32> -> vector<2x128xf32>
    %1244 = arith.index_cast %1239 : i32 to index
    %c0_319 = arith.constant 0 : index
    %c0_320 = arith.constant 0 : index
    %1245 = vector.load %arg18[%1244, %c0_319, %c0_320] : memref<8x2x32xf32, #tpu.memory_space<vmem>>, vector<1x2x32xf32>
    %1246 = vector.shape_cast %1245 : vector<1x2x32xf32> to vector<2x32xf32>
    %cst_321 = arith.constant dense<0.000000e+00> : vector<2x128xf32>
    %1247 = tpu.matmul %1246, %1098, %cst_321 {dimension_numbers = #tpu.dot_dimension_numbers<[1], [0], [0], [1], [0, 0, 1, 1], [], []>} : vector<2x32xf32>, vector<32x128xf32>, vector<2x128xf32> -> vector<2x128xf32>
    %1248 = arith.addf %1243, %1247 : vector<2x128xf32>
    %1249 = arith.addf %1248, %732 : vector<2x128xf32>
    %cst_322 = arith.constant dense<0.000000e+00> : vector<2x128xf32>
    %1250 = tpu.matmul %1235, %1099, %cst_322 {dimension_numbers = #tpu.dot_dimension_numbers<[1], [0], [0], [1], [0, 0, 1, 1], [], []>} : vector<2x32xf32>, vector<32x128xf32>, vector<2x128xf32> -> vector<2x128xf32>
    %1251 = arith.addf %1249, %1250 : vector<2x128xf32>
    %1252 = vector.extract_strided_slice %1251 {offsets = [0, 0], sizes = [2, 32], strides = [1, 1]} : vector<2x128xf32> to vector<2x32xf32>
    %1253 = arith.negf %1252 : vector<2x32xf32>
    %1254 = math.exp %1253 : vector<2x32xf32>
    %cst_323 = arith.constant 1.000000e+00 : f32
    %1255 = vector.broadcast %cst_323 : f32 to vector<2x32xf32>
    %1256 = arith.addf %1255, %1254 : vector<2x32xf32>
    %1257 = arith.divf %1255, %1256 : vector<2x32xf32>
    %1258 = vector.extract_strided_slice %1251 {offsets = [0, 32], sizes = [2, 32], strides = [1, 1]} : vector<2x128xf32> to vector<2x32xf32>
    %1259 = arith.negf %1258 : vector<2x32xf32>
    %1260 = math.exp %1259 : vector<2x32xf32>
    %cst_324 = arith.constant 1.000000e+00 : f32
    %1261 = vector.broadcast %cst_324 : f32 to vector<2x32xf32>
    %1262 = arith.addf %1261, %1260 : vector<2x32xf32>
    %1263 = arith.divf %1261, %1262 : vector<2x32xf32>
    %1264 = vector.extract_strided_slice %1251 {offsets = [0, 64], sizes = [2, 32], strides = [1, 1]} : vector<2x128xf32> to vector<2x32xf32>
    %1265 = math.tanh %1264 : vector<2x32xf32>
    %1266 = vector.extract_strided_slice %1251 {offsets = [0, 96], sizes = [2, 32], strides = [1, 1]} : vector<2x128xf32> to vector<2x32xf32>
    %1267 = arith.negf %1266 : vector<2x32xf32>
    %1268 = math.exp %1267 : vector<2x32xf32>
    %cst_325 = arith.constant 1.000000e+00 : f32
    %1269 = vector.broadcast %cst_325 : f32 to vector<2x32xf32>
    %1270 = arith.addf %1269, %1268 : vector<2x32xf32>
    %1271 = arith.divf %1269, %1270 : vector<2x32xf32>
    %1272 = arith.mulf %1263, %1238 : vector<2x32xf32>
    %1273 = arith.mulf %1257, %1265 : vector<2x32xf32>
    %1274 = arith.addf %1272, %1273 : vector<2x32xf32>
    %1275 = math.tanh %1274 : vector<2x32xf32>
    %1276 = arith.mulf %1271, %1275 : vector<2x32xf32>
    %1277 = vector.broadcast %1239 : i32 to vector<2x1xi32>
    %1278 = arith.cmpi sgt, %0, %1277 : vector<2x1xi32>
    %1279 = vector.shape_cast %1278 : vector<2x1xi1> to vector<2x1xi1>
    %1280 = vector.broadcast %1279 : vector<2x1xi1> to vector<2x32xi1>
    %1281 = arith.select %1280, %1276, %1235 : vector<2x32xi1>, vector<2x32xf32>
    %1282 = vector.shape_cast %1278 : vector<2x1xi1> to vector<2x1xi1>
    %1283 = vector.broadcast %1282 : vector<2x1xi1> to vector<2x32xi1>
    %1284 = arith.select %1283, %1274, %1238 : vector<2x32xi1>, vector<2x32xf32>
    %c4_i32_326 = arith.constant 4 : i32
    %c7_i32_327 = arith.constant 7 : i32
    %1285 = arith.subi %c7_i32_327, %c4_i32_326 : i32
    %1286 = arith.index_cast %1285 : i32 to index
    %c0_328 = arith.constant 0 : index
    %c0_329 = arith.constant 0 : index
    %1287 = vector.load %arg17[%1286, %c0_328, %c0_329] : memref<8x2x32xf32, #tpu.memory_space<vmem>>, vector<1x2x32xf32>
    %1288 = vector.shape_cast %1287 : vector<1x2x32xf32> to vector<2x32xf32>
    %cst_330 = arith.constant dense<0.000000e+00> : vector<2x128xf32>
    %1289 = tpu.matmul %1288, %1097, %cst_330 {dimension_numbers = #tpu.dot_dimension_numbers<[1], [0], [0], [1], [0, 0, 1, 1], [], []>} : vector<2x32xf32>, vector<32x128xf32>, vector<2x128xf32> -> vector<2x128xf32>
    %1290 = arith.index_cast %1285 : i32 to index
    %c0_331 = arith.constant 0 : index
    %c0_332 = arith.constant 0 : index
    %1291 = vector.load %arg18[%1290, %c0_331, %c0_332] : memref<8x2x32xf32, #tpu.memory_space<vmem>>, vector<1x2x32xf32>
    %1292 = vector.shape_cast %1291 : vector<1x2x32xf32> to vector<2x32xf32>
    %cst_333 = arith.constant dense<0.000000e+00> : vector<2x128xf32>
    %1293 = tpu.matmul %1292, %1098, %cst_333 {dimension_numbers = #tpu.dot_dimension_numbers<[1], [0], [0], [1], [0, 0, 1, 1], [], []>} : vector<2x32xf32>, vector<32x128xf32>, vector<2x128xf32> -> vector<2x128xf32>
    %1294 = arith.addf %1289, %1293 : vector<2x128xf32>
    %1295 = arith.addf %1294, %732 : vector<2x128xf32>
    %cst_334 = arith.constant dense<0.000000e+00> : vector<2x128xf32>
    %1296 = tpu.matmul %1281, %1099, %cst_334 {dimension_numbers = #tpu.dot_dimension_numbers<[1], [0], [0], [1], [0, 0, 1, 1], [], []>} : vector<2x32xf32>, vector<32x128xf32>, vector<2x128xf32> -> vector<2x128xf32>
    %1297 = arith.addf %1295, %1296 : vector<2x128xf32>
    %1298 = vector.extract_strided_slice %1297 {offsets = [0, 0], sizes = [2, 32], strides = [1, 1]} : vector<2x128xf32> to vector<2x32xf32>
    %1299 = arith.negf %1298 : vector<2x32xf32>
    %1300 = math.exp %1299 : vector<2x32xf32>
    %cst_335 = arith.constant 1.000000e+00 : f32
    %1301 = vector.broadcast %cst_335 : f32 to vector<2x32xf32>
    %1302 = arith.addf %1301, %1300 : vector<2x32xf32>
    %1303 = arith.divf %1301, %1302 : vector<2x32xf32>
    %1304 = vector.extract_strided_slice %1297 {offsets = [0, 32], sizes = [2, 32], strides = [1, 1]} : vector<2x128xf32> to vector<2x32xf32>
    %1305 = arith.negf %1304 : vector<2x32xf32>
    %1306 = math.exp %1305 : vector<2x32xf32>
    %cst_336 = arith.constant 1.000000e+00 : f32
    %1307 = vector.broadcast %cst_336 : f32 to vector<2x32xf32>
    %1308 = arith.addf %1307, %1306 : vector<2x32xf32>
    %1309 = arith.divf %1307, %1308 : vector<2x32xf32>
    %1310 = vector.extract_strided_slice %1297 {offsets = [0, 64], sizes = [2, 32], strides = [1, 1]} : vector<2x128xf32> to vector<2x32xf32>
    %1311 = math.tanh %1310 : vector<2x32xf32>
    %1312 = vector.extract_strided_slice %1297 {offsets = [0, 96], sizes = [2, 32], strides = [1, 1]} : vector<2x128xf32> to vector<2x32xf32>
    %1313 = arith.negf %1312 : vector<2x32xf32>
    %1314 = math.exp %1313 : vector<2x32xf32>
    %cst_337 = arith.constant 1.000000e+00 : f32
    %1315 = vector.broadcast %cst_337 : f32 to vector<2x32xf32>
    %1316 = arith.addf %1315, %1314 : vector<2x32xf32>
    %1317 = arith.divf %1315, %1316 : vector<2x32xf32>
    %1318 = arith.mulf %1309, %1284 : vector<2x32xf32>
    %1319 = arith.mulf %1303, %1311 : vector<2x32xf32>
    %1320 = arith.addf %1318, %1319 : vector<2x32xf32>
    %1321 = math.tanh %1320 : vector<2x32xf32>
    %1322 = arith.mulf %1317, %1321 : vector<2x32xf32>
    %1323 = vector.broadcast %1285 : i32 to vector<2x1xi32>
    %1324 = arith.cmpi sgt, %0, %1323 : vector<2x1xi32>
    %1325 = vector.shape_cast %1324 : vector<2x1xi1> to vector<2x1xi1>
    %1326 = vector.broadcast %1325 : vector<2x1xi1> to vector<2x32xi1>
    %1327 = arith.select %1326, %1322, %1281 : vector<2x32xi1>, vector<2x32xf32>
    %1328 = vector.shape_cast %1324 : vector<2x1xi1> to vector<2x1xi1>
    %1329 = vector.broadcast %1328 : vector<2x1xi1> to vector<2x32xi1>
    %1330 = arith.select %1329, %1320, %1284 : vector<2x32xi1>, vector<2x32xf32>
    %c5_i32_338 = arith.constant 5 : i32
    %c7_i32_339 = arith.constant 7 : i32
    %1331 = arith.subi %c7_i32_339, %c5_i32_338 : i32
    %1332 = arith.index_cast %1331 : i32 to index
    %c0_340 = arith.constant 0 : index
    %c0_341 = arith.constant 0 : index
    %1333 = vector.load %arg17[%1332, %c0_340, %c0_341] : memref<8x2x32xf32, #tpu.memory_space<vmem>>, vector<1x2x32xf32>
    %1334 = vector.shape_cast %1333 : vector<1x2x32xf32> to vector<2x32xf32>
    %cst_342 = arith.constant dense<0.000000e+00> : vector<2x128xf32>
    %1335 = tpu.matmul %1334, %1097, %cst_342 {dimension_numbers = #tpu.dot_dimension_numbers<[1], [0], [0], [1], [0, 0, 1, 1], [], []>} : vector<2x32xf32>, vector<32x128xf32>, vector<2x128xf32> -> vector<2x128xf32>
    %1336 = arith.index_cast %1331 : i32 to index
    %c0_343 = arith.constant 0 : index
    %c0_344 = arith.constant 0 : index
    %1337 = vector.load %arg18[%1336, %c0_343, %c0_344] : memref<8x2x32xf32, #tpu.memory_space<vmem>>, vector<1x2x32xf32>
    %1338 = vector.shape_cast %1337 : vector<1x2x32xf32> to vector<2x32xf32>
    %cst_345 = arith.constant dense<0.000000e+00> : vector<2x128xf32>
    %1339 = tpu.matmul %1338, %1098, %cst_345 {dimension_numbers = #tpu.dot_dimension_numbers<[1], [0], [0], [1], [0, 0, 1, 1], [], []>} : vector<2x32xf32>, vector<32x128xf32>, vector<2x128xf32> -> vector<2x128xf32>
    %1340 = arith.addf %1335, %1339 : vector<2x128xf32>
    %1341 = arith.addf %1340, %732 : vector<2x128xf32>
    %cst_346 = arith.constant dense<0.000000e+00> : vector<2x128xf32>
    %1342 = tpu.matmul %1327, %1099, %cst_346 {dimension_numbers = #tpu.dot_dimension_numbers<[1], [0], [0], [1], [0, 0, 1, 1], [], []>} : vector<2x32xf32>, vector<32x128xf32>, vector<2x128xf32> -> vector<2x128xf32>
    %1343 = arith.addf %1341, %1342 : vector<2x128xf32>
    %1344 = vector.extract_strided_slice %1343 {offsets = [0, 0], sizes = [2, 32], strides = [1, 1]} : vector<2x128xf32> to vector<2x32xf32>
    %1345 = arith.negf %1344 : vector<2x32xf32>
    %1346 = math.exp %1345 : vector<2x32xf32>
    %cst_347 = arith.constant 1.000000e+00 : f32
    %1347 = vector.broadcast %cst_347 : f32 to vector<2x32xf32>
    %1348 = arith.addf %1347, %1346 : vector<2x32xf32>
    %1349 = arith.divf %1347, %1348 : vector<2x32xf32>
    %1350 = vector.extract_strided_slice %1343 {offsets = [0, 32], sizes = [2, 32], strides = [1, 1]} : vector<2x128xf32> to vector<2x32xf32>
    %1351 = arith.negf %1350 : vector<2x32xf32>
    %1352 = math.exp %1351 : vector<2x32xf32>
    %cst_348 = arith.constant 1.000000e+00 : f32
    %1353 = vector.broadcast %cst_348 : f32 to vector<2x32xf32>
    %1354 = arith.addf %1353, %1352 : vector<2x32xf32>
    %1355 = arith.divf %1353, %1354 : vector<2x32xf32>
    %1356 = vector.extract_strided_slice %1343 {offsets = [0, 64], sizes = [2, 32], strides = [1, 1]} : vector<2x128xf32> to vector<2x32xf32>
    %1357 = math.tanh %1356 : vector<2x32xf32>
    %1358 = vector.extract_strided_slice %1343 {offsets = [0, 96], sizes = [2, 32], strides = [1, 1]} : vector<2x128xf32> to vector<2x32xf32>
    %1359 = arith.negf %1358 : vector<2x32xf32>
    %1360 = math.exp %1359 : vector<2x32xf32>
    %cst_349 = arith.constant 1.000000e+00 : f32
    %1361 = vector.broadcast %cst_349 : f32 to vector<2x32xf32>
    %1362 = arith.addf %1361, %1360 : vector<2x32xf32>
    %1363 = arith.divf %1361, %1362 : vector<2x32xf32>
    %1364 = arith.mulf %1355, %1330 : vector<2x32xf32>
    %1365 = arith.mulf %1349, %1357 : vector<2x32xf32>
    %1366 = arith.addf %1364, %1365 : vector<2x32xf32>
    %1367 = math.tanh %1366 : vector<2x32xf32>
    %1368 = arith.mulf %1363, %1367 : vector<2x32xf32>
    %1369 = vector.broadcast %1331 : i32 to vector<2x1xi32>
    %1370 = arith.cmpi sgt, %0, %1369 : vector<2x1xi32>
    %1371 = vector.shape_cast %1370 : vector<2x1xi1> to vector<2x1xi1>
    %1372 = vector.broadcast %1371 : vector<2x1xi1> to vector<2x32xi1>
    %1373 = arith.select %1372, %1368, %1327 : vector<2x32xi1>, vector<2x32xf32>
    %1374 = vector.shape_cast %1370 : vector<2x1xi1> to vector<2x1xi1>
    %1375 = vector.broadcast %1374 : vector<2x1xi1> to vector<2x32xi1>
    %1376 = arith.select %1375, %1366, %1330 : vector<2x32xi1>, vector<2x32xf32>
    %c6_i32_350 = arith.constant 6 : i32
    %c7_i32_351 = arith.constant 7 : i32
    %1377 = arith.subi %c7_i32_351, %c6_i32_350 : i32
    %1378 = arith.index_cast %1377 : i32 to index
    %c0_352 = arith.constant 0 : index
    %c0_353 = arith.constant 0 : index
    %1379 = vector.load %arg17[%1378, %c0_352, %c0_353] : memref<8x2x32xf32, #tpu.memory_space<vmem>>, vector<1x2x32xf32>
    %1380 = vector.shape_cast %1379 : vector<1x2x32xf32> to vector<2x32xf32>
    %cst_354 = arith.constant dense<0.000000e+00> : vector<2x128xf32>
    %1381 = tpu.matmul %1380, %1097, %cst_354 {dimension_numbers = #tpu.dot_dimension_numbers<[1], [0], [0], [1], [0, 0, 1, 1], [], []>} : vector<2x32xf32>, vector<32x128xf32>, vector<2x128xf32> -> vector<2x128xf32>
    %1382 = arith.index_cast %1377 : i32 to index
    %c0_355 = arith.constant 0 : index
    %c0_356 = arith.constant 0 : index
    %1383 = vector.load %arg18[%1382, %c0_355, %c0_356] : memref<8x2x32xf32, #tpu.memory_space<vmem>>, vector<1x2x32xf32>
    %1384 = vector.shape_cast %1383 : vector<1x2x32xf32> to vector<2x32xf32>
    %cst_357 = arith.constant dense<0.000000e+00> : vector<2x128xf32>
    %1385 = tpu.matmul %1384, %1098, %cst_357 {dimension_numbers = #tpu.dot_dimension_numbers<[1], [0], [0], [1], [0, 0, 1, 1], [], []>} : vector<2x32xf32>, vector<32x128xf32>, vector<2x128xf32> -> vector<2x128xf32>
    %1386 = arith.addf %1381, %1385 : vector<2x128xf32>
    %1387 = arith.addf %1386, %732 : vector<2x128xf32>
    %cst_358 = arith.constant dense<0.000000e+00> : vector<2x128xf32>
    %1388 = tpu.matmul %1373, %1099, %cst_358 {dimension_numbers = #tpu.dot_dimension_numbers<[1], [0], [0], [1], [0, 0, 1, 1], [], []>} : vector<2x32xf32>, vector<32x128xf32>, vector<2x128xf32> -> vector<2x128xf32>
    %1389 = arith.addf %1387, %1388 : vector<2x128xf32>
    %1390 = vector.extract_strided_slice %1389 {offsets = [0, 0], sizes = [2, 32], strides = [1, 1]} : vector<2x128xf32> to vector<2x32xf32>
    %1391 = arith.negf %1390 : vector<2x32xf32>
    %1392 = math.exp %1391 : vector<2x32xf32>
    %cst_359 = arith.constant 1.000000e+00 : f32
    %1393 = vector.broadcast %cst_359 : f32 to vector<2x32xf32>
    %1394 = arith.addf %1393, %1392 : vector<2x32xf32>
    %1395 = arith.divf %1393, %1394 : vector<2x32xf32>
    %1396 = vector.extract_strided_slice %1389 {offsets = [0, 32], sizes = [2, 32], strides = [1, 1]} : vector<2x128xf32> to vector<2x32xf32>
    %1397 = arith.negf %1396 : vector<2x32xf32>
    %1398 = math.exp %1397 : vector<2x32xf32>
    %cst_360 = arith.constant 1.000000e+00 : f32
    %1399 = vector.broadcast %cst_360 : f32 to vector<2x32xf32>
    %1400 = arith.addf %1399, %1398 : vector<2x32xf32>
    %1401 = arith.divf %1399, %1400 : vector<2x32xf32>
    %1402 = vector.extract_strided_slice %1389 {offsets = [0, 64], sizes = [2, 32], strides = [1, 1]} : vector<2x128xf32> to vector<2x32xf32>
    %1403 = math.tanh %1402 : vector<2x32xf32>
    %1404 = vector.extract_strided_slice %1389 {offsets = [0, 96], sizes = [2, 32], strides = [1, 1]} : vector<2x128xf32> to vector<2x32xf32>
    %1405 = arith.negf %1404 : vector<2x32xf32>
    %1406 = math.exp %1405 : vector<2x32xf32>
    %cst_361 = arith.constant 1.000000e+00 : f32
    %1407 = vector.broadcast %cst_361 : f32 to vector<2x32xf32>
    %1408 = arith.addf %1407, %1406 : vector<2x32xf32>
    %1409 = arith.divf %1407, %1408 : vector<2x32xf32>
    %1410 = arith.mulf %1401, %1376 : vector<2x32xf32>
    %1411 = arith.mulf %1395, %1403 : vector<2x32xf32>
    %1412 = arith.addf %1410, %1411 : vector<2x32xf32>
    %1413 = math.tanh %1412 : vector<2x32xf32>
    %1414 = arith.mulf %1409, %1413 : vector<2x32xf32>
    %1415 = vector.broadcast %1377 : i32 to vector<2x1xi32>
    %1416 = arith.cmpi sgt, %0, %1415 : vector<2x1xi32>
    %1417 = vector.shape_cast %1416 : vector<2x1xi1> to vector<2x1xi1>
    %1418 = vector.broadcast %1417 : vector<2x1xi1> to vector<2x32xi1>
    %1419 = arith.select %1418, %1414, %1373 : vector<2x32xi1>, vector<2x32xf32>
    %1420 = vector.shape_cast %1416 : vector<2x1xi1> to vector<2x1xi1>
    %1421 = vector.broadcast %1420 : vector<2x1xi1> to vector<2x32xi1>
    %1422 = arith.select %1421, %1412, %1376 : vector<2x32xi1>, vector<2x32xf32>
    %c7_i32_362 = arith.constant 7 : i32
    %c7_i32_363 = arith.constant 7 : i32
    %1423 = arith.subi %c7_i32_363, %c7_i32_362 : i32
    %1424 = arith.index_cast %1423 : i32 to index
    %c0_364 = arith.constant 0 : index
    %c0_365 = arith.constant 0 : index
    %1425 = vector.load %arg17[%1424, %c0_364, %c0_365] : memref<8x2x32xf32, #tpu.memory_space<vmem>>, vector<1x2x32xf32>
    %1426 = vector.shape_cast %1425 : vector<1x2x32xf32> to vector<2x32xf32>
    %cst_366 = arith.constant dense<0.000000e+00> : vector<2x128xf32>
    %1427 = tpu.matmul %1426, %1097, %cst_366 {dimension_numbers = #tpu.dot_dimension_numbers<[1], [0], [0], [1], [0, 0, 1, 1], [], []>} : vector<2x32xf32>, vector<32x128xf32>, vector<2x128xf32> -> vector<2x128xf32>
    %1428 = arith.index_cast %1423 : i32 to index
    %c0_367 = arith.constant 0 : index
    %c0_368 = arith.constant 0 : index
    %1429 = vector.load %arg18[%1428, %c0_367, %c0_368] : memref<8x2x32xf32, #tpu.memory_space<vmem>>, vector<1x2x32xf32>
    %1430 = vector.shape_cast %1429 : vector<1x2x32xf32> to vector<2x32xf32>
    %cst_369 = arith.constant dense<0.000000e+00> : vector<2x128xf32>
    %1431 = tpu.matmul %1430, %1098, %cst_369 {dimension_numbers = #tpu.dot_dimension_numbers<[1], [0], [0], [1], [0, 0, 1, 1], [], []>} : vector<2x32xf32>, vector<32x128xf32>, vector<2x128xf32> -> vector<2x128xf32>
    %1432 = arith.addf %1427, %1431 : vector<2x128xf32>
    %1433 = arith.addf %1432, %732 : vector<2x128xf32>
    %cst_370 = arith.constant dense<0.000000e+00> : vector<2x128xf32>
    %1434 = tpu.matmul %1419, %1099, %cst_370 {dimension_numbers = #tpu.dot_dimension_numbers<[1], [0], [0], [1], [0, 0, 1, 1], [], []>} : vector<2x32xf32>, vector<32x128xf32>, vector<2x128xf32> -> vector<2x128xf32>
    %1435 = arith.addf %1433, %1434 : vector<2x128xf32>
    %1436 = vector.extract_strided_slice %1435 {offsets = [0, 0], sizes = [2, 32], strides = [1, 1]} : vector<2x128xf32> to vector<2x32xf32>
    %1437 = arith.negf %1436 : vector<2x32xf32>
    %1438 = math.exp %1437 : vector<2x32xf32>
    %cst_371 = arith.constant 1.000000e+00 : f32
    %1439 = vector.broadcast %cst_371 : f32 to vector<2x32xf32>
    %1440 = arith.addf %1439, %1438 : vector<2x32xf32>
    %1441 = arith.divf %1439, %1440 : vector<2x32xf32>
    %1442 = vector.extract_strided_slice %1435 {offsets = [0, 32], sizes = [2, 32], strides = [1, 1]} : vector<2x128xf32> to vector<2x32xf32>
    %1443 = arith.negf %1442 : vector<2x32xf32>
    %1444 = math.exp %1443 : vector<2x32xf32>
    %cst_372 = arith.constant 1.000000e+00 : f32
    %1445 = vector.broadcast %cst_372 : f32 to vector<2x32xf32>
    %1446 = arith.addf %1445, %1444 : vector<2x32xf32>
    %1447 = arith.divf %1445, %1446 : vector<2x32xf32>
    %1448 = vector.extract_strided_slice %1435 {offsets = [0, 64], sizes = [2, 32], strides = [1, 1]} : vector<2x128xf32> to vector<2x32xf32>
    %1449 = math.tanh %1448 : vector<2x32xf32>
    %1450 = vector.extract_strided_slice %1435 {offsets = [0, 96], sizes = [2, 32], strides = [1, 1]} : vector<2x128xf32> to vector<2x32xf32>
    %1451 = arith.negf %1450 : vector<2x32xf32>
    %1452 = math.exp %1451 : vector<2x32xf32>
    %cst_373 = arith.constant 1.000000e+00 : f32
    %1453 = vector.broadcast %cst_373 : f32 to vector<2x32xf32>
    %1454 = arith.addf %1453, %1452 : vector<2x32xf32>
    %1455 = arith.divf %1453, %1454 : vector<2x32xf32>
    %1456 = arith.mulf %1447, %1422 : vector<2x32xf32>
    %1457 = arith.mulf %1441, %1449 : vector<2x32xf32>
    %1458 = arith.addf %1456, %1457 : vector<2x32xf32>
    %1459 = math.tanh %1458 : vector<2x32xf32>
    %1460 = arith.mulf %1455, %1459 : vector<2x32xf32>
    %1461 = vector.broadcast %1423 : i32 to vector<2x1xi32>
    %1462 = arith.cmpi sgt, %0, %1461 : vector<2x1xi32>
    %1463 = vector.shape_cast %1462 : vector<2x1xi1> to vector<2x1xi1>
    %1464 = vector.broadcast %1463 : vector<2x1xi1> to vector<2x32xi1>
    %1465 = arith.select %1464, %1460, %1419 : vector<2x32xi1>, vector<2x32xf32>
    %1466 = vector.shape_cast %1462 : vector<2x1xi1> to vector<2x1xi1>
    %1467 = vector.broadcast %1466 : vector<2x1xi1> to vector<2x32xi1>
    %1468 = arith.select %1467, %1458, %1422 : vector<2x32xi1>, vector<2x32xf32>
    %c8_i32_374 = arith.constant 8 : i32
    %c0_375 = arith.constant 0 : index
    %c0_376 = arith.constant 0 : index
    %1469 = vector.load %arg14[%c0_375, %c0_376] : memref<128x32xf32, #tpu.memory_space<vmem>>, vector<128x32xf32>
    %cst_377 = arith.constant 0.000000e+00 : f32
    %1470 = vector.broadcast %cst_377 : f32 to vector<2x32xf32>
    %1471 = arith.maximumf %355, %1470 : vector<2x32xf32>
    %1472 = vector.extract_strided_slice %1469 {offsets = [0, 0], sizes = [32, 32], strides = [1, 1]} : vector<128x32xf32> to vector<32x32xf32>
    %cst_378 = arith.constant dense<0.000000e+00> : vector<2x32xf32>
    %1473 = tpu.matmul %1471, %1472, %cst_378 {dimension_numbers = #tpu.dot_dimension_numbers<[1], [0], [0], [1], [0, 0, 1, 1], [], []>} : vector<2x32xf32>, vector<32x32xf32>, vector<2x32xf32> -> vector<2x32xf32>
    %cst_379 = arith.constant 0.000000e+00 : f32
    %1474 = vector.broadcast %cst_379 : f32 to vector<2x32xf32>
    %1475 = arith.maximumf %717, %1474 : vector<2x32xf32>
    %1476 = vector.extract_strided_slice %1469 {offsets = [32, 0], sizes = [32, 32], strides = [1, 1]} : vector<128x32xf32> to vector<32x32xf32>
    %cst_380 = arith.constant dense<0.000000e+00> : vector<2x32xf32>
    %1477 = tpu.matmul %1475, %1476, %cst_380 {dimension_numbers = #tpu.dot_dimension_numbers<[1], [0], [0], [1], [0, 0, 1, 1], [], []>} : vector<2x32xf32>, vector<32x32xf32>, vector<2x32xf32> -> vector<2x32xf32>
    %1478 = arith.addf %1473, %1477 : vector<2x32xf32>
    %cst_381 = arith.constant 0.000000e+00 : f32
    %1479 = vector.broadcast %cst_381 : f32 to vector<2x32xf32>
    %1480 = arith.maximumf %1093, %1479 : vector<2x32xf32>
    %1481 = vector.extract_strided_slice %1469 {offsets = [64, 0], sizes = [32, 32], strides = [1, 1]} : vector<128x32xf32> to vector<32x32xf32>
    %cst_382 = arith.constant dense<0.000000e+00> : vector<2x32xf32>
    %1482 = tpu.matmul %1480, %1481, %cst_382 {dimension_numbers = #tpu.dot_dimension_numbers<[1], [0], [0], [1], [0, 0, 1, 1], [], []>} : vector<2x32xf32>, vector<32x32xf32>, vector<2x32xf32> -> vector<2x32xf32>
    %1483 = arith.addf %1478, %1482 : vector<2x32xf32>
    %cst_383 = arith.constant 0.000000e+00 : f32
    %1484 = vector.broadcast %cst_383 : f32 to vector<2x32xf32>
    %1485 = arith.maximumf %1465, %1484 : vector<2x32xf32>
    %1486 = vector.extract_strided_slice %1469 {offsets = [96, 0], sizes = [32, 32], strides = [1, 1]} : vector<128x32xf32> to vector<32x32xf32>
    %cst_384 = arith.constant dense<0.000000e+00> : vector<2x32xf32>
    %1487 = tpu.matmul %1485, %1486, %cst_384 {dimension_numbers = #tpu.dot_dimension_numbers<[1], [0], [0], [1], [0, 0, 1, 1], [], []>} : vector<2x32xf32>, vector<32x32xf32>, vector<2x32xf32> -> vector<2x32xf32>
    %1488 = arith.addf %1483, %1487 : vector<2x32xf32>
    %c0_385 = arith.constant 0 : index
    %c0_386 = arith.constant 0 : index
    %1489 = vector.load %arg15[%c0_385, %c0_386] : memref<1x32xf32, #tpu.memory_space<vmem>>, vector<1x32xf32>
    %1490 = vector.broadcast %1489 : vector<1x32xf32> to vector<2x32xf32>
    %1491 = arith.addf %1488, %1490 : vector<2x32xf32>
    %c0_387 = arith.constant 0 : index
    %c0_388 = arith.constant 0 : index
    %1492 = vector.load %arg16[%c0_387, %c0_388] : memref<2x32xf32, #tpu.memory_space<vmem>>, vector<2x32xf32>
    tpu.vector_store %arg16[%c0_387, %c0_388], %1491 {strides = array<i32>} : memref<2x32xf32, #tpu.memory_space<vmem>>, vector<2x32xf32>,
    return
  }
}

</mosaic_0001>

<bundles_post_ra>
// kernel: tpu_custom_call.1
= control target key start
LH: loop header
LB: loop body
LE: loop exit
PB: predicated region body
PF: predicated region fallthrough
CT: control target
= control target key end

     0   :  { %s11394_s0 = inlined_call_operand.hbm [shape: f32[8,2,32], index: 0, kind: input, shape index: {}]   ;;  %s11395_s1 = inlined_call_operand.vmem [shape: s32[2,1], index: 1, kind: input, shape index: {}]   ;;  %s11396_s2 = inlined_call_operand.vmem [shape: f32[32,128], index: 2, kind: input, shape index: {}]   ;;  %s11397_s3 = inlined_call_operand.hbm [shape: f32[32,128], index: 3, kind: input, shape index: {}]   ;;  %s11398_s4 = inlined_call_operand.vmem [shape: f32[1,128], index: 4, kind: input, shape index: {}]   ;;  %s11399_s5 = inlined_call_operand.hbm [shape: f32[32,128], index: 5, kind: input, shape index: {}]   ;;  %s11400_s6 = inlined_call_operand.hbm [shape: f32[32,128], index: 6, kind: input, shape index: {}]   ;;  %s11401_s7 = inlined_call_operand.vmem [shape: f32[1,128], index: 7, kind: input, shape index: {}]   ;;  %s11402_s8 = inlined_call_operand.vmem [shape: f32[64,128], index: 8, kind: input, shape index: {}]   ;;  %s11403_s9 = inlined_call_operand.hbm [shape: f32[32,128], index: 9, kind: input, shape index: {}]   ;;  %s11404_s10 = inlined_call_operand.vmem [shape: f32[1,128], index: 10, kind: input, shape index: {}]   ;;  %s11405_s11 = inlined_call_operand.vmem [shape: f32[64,128], index: 11, kind: input, shape index: {}]   ;;  %s11406_s12 = inlined_call_operand.hbm [shape: f32[32,128], index: 12, kind: input, shape index: {}]   ;;  %s11407_s13 = inlined_call_operand.vmem [shape: f32[1,128], index: 13, kind: input, shape index: {}]   ;;  %s11408_s14 = inlined_call_operand.vmem [shape: f32[128,32], index: 14, kind: input, shape index: {}]   ;;  %s11409_s15 = inlined_call_operand.vmem [shape: f32[1,32], index: 15, kind: input, shape index: {}]   ;;  %s11410_s16 = inlined_call_operand.hbm [shape: f32[2,32], index: 16, kind: output, shape index: {}]  }
   0x1   :  { %11415 = sst [smem:[#allocation21_spill]] %s11394_s0 }
   0x2   :  { %11416 = sst [smem:[#allocation22_spill]] %s11410_s16 }
   0x3   :  { %21 = vsyncpa [#allocation5], 0 }
   0x4   :  { %22 = vsyncpa [#allocation8], 0 }
   0x5   :  { %23 = vsyncpa [#allocation11], 0 }
   0x6   :  { %24 = vsyncpa [#allocation14], 0 }
   0x7   :  { %25 = vsyncpa [#allocation6], 0  ;;  %s9949_s21 = smov [#allocation7]   ;;  %s9785_s25 = scalar_lea.hbm %s11397_s3, 512 }
   0x8   :  { %s47_s22 = sshll.u32 %s9949_s21, 4  ;;  %p9786_p0 = scmp.ne.s32.totalorder %s11397_s3, %s9785_s25  ;;  %s48_s22 = int_to_ptr.vmem [resolvable:$true] %s47_s22 }
   0x9   :  { %p9789_p1 = scmp.lt.u32.totalorder %s9785_s25, %s11397_s3 }
   0xb   :  { %p9791_p2 = pnand %p9789_p1, %p9786_p0 }
   0xd   :  { %9794 = shalt.err (!%p9791_p2)
}
   0xe   :  { %s9795_s30 = scalar_lea.vmem %s48_s22, 512  ;;  %p9800_p4 = scmp.lt.s32.totalorder %s48_s22, %s48_s22 }
   0xf   :  { %p9796_p3 = scmp.ne.s32.totalorder %s48_s22, %s9795_s30  ;;  %p9801_p5 = scmp.lt.s32.totalorder %s9795_s30, %s9795_s30 }
  0x11   :  { %p9802_p6 = por %p9801_p5, %p9800_p4 }
  0x13   :  { %p9803_p7 = pnand %p9802_p6, %p9796_p3 }
  0x15   :  { %9806 = shalt.err (!%p9803_p7)
}
  0x16   :  { %s11413_s0 = smov 128   ;;  %s9951_s17 = smov 8  }
  0x17   :  { %53 = dma.hbm_to_vmem [thread:$0]  %s11397_s3, 512, %s48_s22, [#allocation8], %s11413_s0, %s11413_s0, %s9951_s17  }
  0x18   :  { %s9952_s20 = smov [#allocation10]   ;;  %s9953_s23 = smov [#allocation4]  }
  0x19   :  { %s73_s21 = sshll.u32 %s9952_s20, 4  ;;  %s31_s24 = sshll.u32 %s9953_s23, 4  ;;  %s74_s21 = int_to_ptr.vmem [resolvable:$true] %s73_s21  ;;  %s32_s24 = int_to_ptr.vmem [resolvable:$true] %s31_s24 }
  0x1a   :  { %s9807_s27 = scalar_lea.hbm %s11400_s6, 512 }
  0x1b   :  { %p9808_p8 = scmp.ne.s32.totalorder %s11400_s6, %s9807_s27  ;;  %p9811_p9 = scmp.lt.u32.totalorder %s9807_s27, %s11400_s6 }
  0x1d   :  { %p9813_p10 = pnand %p9811_p9, %p9808_p8 }
  0x1f   :  { %9816 = shalt.err (!%p9813_p10)
}
  0x20   :  { %s9817_s3 = scalar_lea.vmem %s74_s21, 512  ;;  %p9822_p12 = scmp.lt.s32.totalorder %s74_s21, %s74_s21 }
  0x21   :  { %p9818_p11 = scmp.ne.s32.totalorder %s74_s21, %s9817_s3  ;;  %p9823_p13 = scmp.lt.s32.totalorder %s9817_s3, %s9817_s3 }
  0x23   :  { %p9824_p0 = por %p9823_p13, %p9822_p12 }
  0x25   :  { %p9825_p1 = pnand %p9824_p0, %p9818_p11 }
  0x27   :  { %9828 = shalt.err (!%p9825_p1)
}
  0x28   :  { %79 = dma.hbm_to_vmem [thread:$0]  %s11400_s6, 512, %s74_s21, [#allocation11], %s11413_s0, %s11413_s0, %s9951_s17  }
  0x29   :  { %s11417_s20 = sld [smem:[#allocation21_spill]] }
  0x2f   :  { %s9829_s23 = scalar_lea.hbm %s11417_s20, 256 }
  0x30   :  { %p9830_p2 = scmp.ne.s32.totalorder %s11417_s20, %s9829_s23  ;;  %p9833_p3 = scmp.lt.u32.totalorder %s9829_s23, %s11417_s20 }
  0x32   :  { %p9835_p4 = pnand %p9833_p3, %p9830_p2 }
  0x34   :  { %9838 = shalt.err (!%p9835_p4)
}
  0x35   :  { %s9839_s29 = scalar_lea.vmem %s32_s24, 256  ;;  %p9844_p6 = scmp.lt.s32.totalorder %s32_s24, %s32_s24 }
  0x36   :  { %p9840_p5 = scmp.ne.s32.totalorder %s32_s24, %s9839_s29  ;;  %p9845_p7 = scmp.lt.s32.totalorder %s9839_s29, %s9839_s29 }
  0x38   :  { %p9846_p8 = por %p9845_p7, %p9844_p6 }
  0x3a   :  { %p9847_p9 = pnand %p9846_p8, %p9840_p5 }
  0x3c   :  { %9850 = shalt.err (!%p9847_p9)
}
  0x3d   :  { %s9954_s6 = smov 32   ;;  %s9955_s21 = smov 2  }
  0x3e   :  { %37 = dma.hbm_to_vmem [thread:$0]  %s11417_s20, 256, %s32_s24, [#allocation5], %s9954_s6, %s9954_s6, %s9955_s21  }
  0x3f   :  { %s9956_s22 = smov [#allocation9]   ;;  %s9957_s19 = smov [#allocation12]  }
  0x40   :  { %s61_s18 = sshll.u32 %s9956_s22, 4  ;;  %s89_s16 = sshll.u32 %s9957_s19, 4  ;;  %s62_s18 = int_to_ptr.vmem [resolvable:$true] %s61_s18  ;;  %s90_s16 = int_to_ptr.vmem [resolvable:$true] %s89_s16 }
  0x41   :  { %s9851_s26 = scalar_lea.hbm %s11399_s5, 512 }
  0x42   :  { %p9852_p10 = scmp.ne.s32.totalorder %s11399_s5, %s9851_s26  ;;  %p9855_p11 = scmp.lt.u32.totalorder %s9851_s26, %s11399_s5 }
  0x44   :  { %p9857_p12 = pnand %p9855_p11, %p9852_p10 }
  0x46   :  { %9860 = shalt.err (!%p9857_p12)
}
  0x47   :  { %s9861_s24 = scalar_lea.vmem %s62_s18, 512  ;;  %p9866_p0 = scmp.lt.s32.totalorder %s62_s18, %s62_s18 }
  0x48   :  { %p9862_p13 = scmp.ne.s32.totalorder %s62_s18, %s9861_s24  ;;  %p9867_p1 = scmp.lt.s32.totalorder %s9861_s24, %s9861_s24 }
  0x4a   :  { %p9868_p2 = por %p9867_p1, %p9866_p0 }
  0x4c   :  { %p9869_p3 = pnand %p9868_p2, %p9862_p13 }
  0x4e   :  { %9872 = shalt.err (!%p9869_p3)
}
  0x4f   :  { %s11418_s20 = smov 128   ;;  %s9873_s22 = scalar_lea.hbm %s11403_s9, 512 }
  0x50   :  { %67 = dma.hbm_to_vmem [thread:$0]  %s11399_s5, 512, %s62_s18, [#allocation8], %s11418_s20, %s11418_s20, %s9951_s17  }
  0x51   :  { %p9874_p4 = scmp.ne.s32.totalorder %s11403_s9, %s9873_s22  ;;  %p9877_p5 = scmp.lt.u32.totalorder %s9873_s22, %s11403_s9 }
  0x53   :  { %p9879_p6 = pnand %p9877_p5, %p9874_p4 }
  0x55   :  { %9882 = shalt.err (!%p9879_p6)
}
  0x56   :  { %s9883_s27 = scalar_lea.vmem %s90_s16, 512  ;;  %p9888_p8 = scmp.lt.s32.totalorder %s90_s16, %s90_s16 }
  0x57   :  { %p9884_p7 = scmp.ne.s32.totalorder %s90_s16, %s9883_s27  ;;  %p9889_p9 = scmp.lt.s32.totalorder %s9883_s27, %s9883_s27 }
  0x59   :  { %p9890_p10 = por %p9889_p9, %p9888_p8 }
  0x5b   :  { %p9891_p11 = pnand %p9890_p10, %p9884_p7 }
  0x5d   :  { %9894 = shalt.err (!%p9891_p11)
}
  0x5e   :  { %95 = dma.hbm_to_vmem [thread:$0]  %s11403_s9, 512, %s90_s16, [#allocation11], %s11418_s20, %s11418_s20, %s9951_s17  }
  0x5f   :  { %s9958_s28 = smov [#allocation13]   ;;  %s9895_s30 = scalar_lea.hbm %s11406_s12, 512 }
  0x60   :  { %s105_s29 = sshll.u32 %s9958_s28, 4  ;;  %p9896_p12 = scmp.ne.s32.totalorder %s11406_s12, %s9895_s30  ;;  %s106_s29 = int_to_ptr.vmem [resolvable:$true] %s105_s29 }
  0x61   :  { %p9899_p13 = scmp.lt.u32.totalorder %s9895_s30, %s11406_s12 }
  0x63   :  { %p9901_p0 = pnand %p9899_p13, %p9896_p12 }
  0x65   :  { %9904 = shalt.err (!%p9901_p0)
}
  0x66   :  { %s9905_s23 = scalar_lea.vmem %s106_s29, 512  ;;  %p9910_p2 = scmp.lt.s32.totalorder %s106_s29, %s106_s29 }
  0x67   :  { %p9906_p1 = scmp.ne.s32.totalorder %s106_s29, %s9905_s23  ;;  %p9911_p3 = scmp.lt.s32.totalorder %s9905_s23, %s9905_s23 }
  0x69   :  { %p9912_p4 = por %p9911_p3, %p9910_p2 }
  0x6b   :  { %p9913_p5 = pnand %p9912_p4, %p9906_p1 }
  0x6d   :  { %9916 = shalt.err (!%p9913_p5)
}
  0x6e   :  { %111 = dma.hbm_to_vmem [thread:$0]  %s11406_s12, 512, %s106_s29, [#allocation14], %s11418_s20, %s11418_s20, %s9951_s17  }
  0x6f   :  { %9939 = dma.done.wait [#allocation5], 256  }
  0x70   :  { %9940 = vsyncadd [#allocation5], 4294967040 }
  0x71   :  { %9941 = dma.done.wait [#allocation8], 1024  }
  0x72   :  { %9942 = vsyncadd [#allocation8], 4294966272 }
  0x73   :  { %9943 = dma.done.wait [#allocation11], 1024  }
  0x74   :  { %9944 = vsyncadd [#allocation11], 4294966272 }
  0x75   :  { %9945 = dma.done.wait [#allocation14], 512  }
  0x76   :  { %9946 = vsyncadd [#allocation14], 4294966784  ;;  %v9959_v0 = vmov 0.0|0.0   ;;  %vm9960_vm0 = vmmov 0   ;;  %v9961_v1 = vmov 0.0   ;;  %v137_v2 = vld [vmem:[%s11396_s2] sm:$0xff] }
  0x77   :  { %8871 = vmatprep.subr.bf16.mxu0 %v9959_v0  ;;  %7955 = vmatprep.mubr.msk.f32.mxu0 %vm9960_vm0, %v9961_v1  ;;  %v138_v3 = vld [vmem:[%s11396_s2 + $0x8] sm:$0xff]  ;;  %v139_v4 = vld [vmem:[%s11396_s2 + $0x10] sm:$0xff]  ;;  %v140_v6 = vld [vmem:[%s11396_s2 + $0x18] sm:$0xff]  ;;  %vm164_vm1 = vcmask 261120   ;;  %v9962_v16 = vmov 0   ;;  %vm348_vm4 = vcmask 254976  }
  0x78   :  { %8883 = vmatprep.subr.bf16.mxu1 %v9959_v0  ;;  %7977 = vmatprep.mubr.msk.f32.mxu1 %vm9960_vm0, %v9961_v1  ;;  %v10154_v5 = vpack.c.bf16 %v138_v3, %v137_v2  ;;  %v10160_v7 = vpack.c.bf16 %v140_v6, %v139_v4  ;;  %v159_v8 = vld [vmem:[#allocation7] sm:$0xff]  ;;  %v160_v9 = vld [vmem:[#allocation7 + $0x8] sm:$0xff]  ;;  %v163_v10 = vld [vmem:[#allocation4] sm:$0x3] }
  0x79   :  { %v10166_v11 = vpack.c.bf16 %v160_v9, %v159_v8  ;;  %v161_v12 = vld [vmem:[#allocation7 + $0x10] sm:$0xff]  ;;  %v162_v13 = vld [vmem:[#allocation7 + $0x18] sm:$0xff]  ;;  %9519 = vset.pattern.permute.xlu1 %v9962_v16  ;;  %9520 = vset.pattern.permute.xlu0 %v9962_v16 }
  0x7a   :  { %8873 = vmatpush3.bf16.msra.mxu0 %v10154_v5  ;;  %8885 = vmatpush3.bf16.msra.mxu1 %v10154_v5  ;;  %v10173_v14 = vpack.c.bf16 %v162_v13, %v161_v12  ;;  %v10190_v15 = vld [vmem:[%s11395_s1] sm:$0x3]  ;;  %s9963_s1 = smov 64   ;;  %v351_v32 = vld [vmem:[#allocation4 + $0x2] sm:$0x3] }
  0x7b   :  { %8874 = vmatprep.subr.bf16.mxu0 %v9959_v0  ;;  %8886 = vmatprep.subr.bf16.mxu1 %v9959_v0  ;;  %vm336_vm2 = vcmp.gt.s32.totalorder %v10190_v15, 0  ;;  %v10199_v18 = vld [vmem:[%s11398_s4] ss:$0 sm:$0xff]  ;;  %vm522_vm5 = vcmp.gt.s32.totalorder %v10190_v15, 1  ;;  %v537_v54 = vld [vmem:[#allocation4 + $0x4] sm:$0x3] }
  0x7c   :  { %v337_v17 = vsel %vm336_vm2, 1, %v9962_v16  ;;  %v523_v43 = vsel %vm522_vm5, 1, %v9962_v16  ;;  %vm708_vm7 = vcmp.gt.s32.totalorder %v10190_v15, 2  ;;  %vm894_vm9 = vcmp.gt.s32.totalorder %v10190_v15, 3 }
  0x7d   :  { %339 = vperm.xlu1 %9519, %v337_v17   ;;  %v709_v3 = vsel %vm708_vm7, 1, %v9962_v16  ;;  %vm1080_vm11 = vcmp.gt.s32.totalorder %v10190_v15, 4  ;;  %vm1266_vm13 = vcmp.gt.s32.totalorder %v10190_v15, 5  ;;  %vm1452_vm15 = vcmp.gt.s32.totalorder %v10190_v15, 6 }
  0x7e   :  { %8876 = vmatpush3.bf16.msra.mxu0 %v10160_v7  ;;  %8888 = vmatpush3.bf16.msra.mxu1 %v10160_v7  ;;  %vm1638_vm2 = vcmp.gt.s32.totalorder %v10190_v15, 7 }
  0x7f   :  { %8877 = vmatprep.subr.bf16.mxu0 %v9959_v0  ;;  %8889 = vmatprep.subr.bf16.mxu1 %v9959_v0 }
  0x81   :  { %7956 = vmatmul.mubr.msk.f32.vlgmr.msra.gmra.mrb[0].mxu0 %vm164_vm1, %v163_v10  ;;  %7978 = vmatmul.mubr.msk.f32.vlgmr.msra.gmra.mrb[0].mxu1 %vm164_vm1, %v351_v32  ;;  %v895_v32 = vsel %vm894_vm9, 1, %v9962_v16 }
  0x82   :  { %8879 = vmatpush3.bf16.msra.mxu0 %v10166_v11  ;;  %7966 = vmatprep.mubr.msk.f32.mxu0 %vm9960_vm0, %v9961_v1 }
  0x83   :  { %8880 = vmatprep.subr.bf16.mxu0 %v9959_v0  ;;  %8891 = vmatpush3.bf16.msra.mxu1 %v10166_v11 }
  0x84   :  { %7988 = vmatprep.mubr.msk.f32.mxu1 %vm9960_vm0, %v9961_v1  ;;  %8892 = vmatprep.subr.bf16.mxu1 %v9959_v0 }
  0x86   :  { %8882 = vmatpush3.bf16.msra.mxu0 %v10173_v14 }
  0x87   :  { %8895 = vmatprep.subr.bf16.mxu0 %v9959_v0  ;;  %8894 = vmatpush3.bf16.msra.mxu1 %v10173_v14 }
  0x88   :  { %8907 = vmatprep.subr.bf16.mxu1 %v9959_v0 }
  0x89   :  { %7967 = vmatmul.mubr.f32.vlgmr.msra.gmra.mrb[0].mxu0 %v9961_v1 }
  0x8a   :  { %8897 = vmatpush3.bf16.msra.mxu0 %v10154_v5  ;;  %7999 = vmatprep.mubr.msk.f32.mxu0 %vm9960_vm0, %v9961_v1 }
  0x8b   :  { %8898 = vmatprep.subr.bf16.mxu0 %v9959_v0 }
  0x8e   :  { %8900 = vmatpush3.bf16.msra.mxu0 %v10160_v7 }
  0x8f   :  { %8901 = vmatprep.subr.bf16.mxu0 %v9959_v0 }
  0x91   :  { %8000 = vmatmul.mubr.msk.f32.vlgmr.msra.gmra.mrb[2].mxu0 %vm164_vm1, %v537_v54 }
  0x92   :  { %8903 = vmatpush3.bf16.msra.mxu0 %v10166_v11  ;;  %8010 = vmatprep.mubr.msk.f32.mxu0 %vm9960_vm0, %v9961_v1 }
  0x93   :  { %8904 = vmatprep.subr.bf16.mxu0 %v9959_v0 }
  0x96   :  { %8906 = vmatpush3.bf16.msra.mxu0 %v10173_v14 }
  0x97   :  { %8919 = vmatprep.subr.bf16.mxu0 %v9959_v0 }
  0xfc   :  { %v10212_v34 = vpop.permute.xlu1 %339 }
  0xfd   :  { %vm341_vm3 = vcmp.eq.s32.totalorder %v10212_v34, 1 }
 0x15c   :  { %v307_v19 = vpop.f32.mrb[0].mxu0 }
 0x15d   :  { %v9375_v20 = vadd.f32 %v10199_v18, %v307_v19  ;;  %v7968_v21 = vpop.f32.mrb[1].mxu0 }
 0x15e   :  { %v723_v21 = vld [vmem:[#allocation4 + $0x6] sm:$0x3] }
 0x15f   :  { %9521 = vtanh.f32 %v9375_v20  ;;  %v7413_v23 = vmul.f32 -1.442695, %v9375_v20 }
 0x161   :  { %9523 = vpow2.f32 %v7413_v23 }
 0x169   :  { %v9522_v22 = vpop.eup %9521 }
 0x16a   :  { %321 = vrot.lane.b32.xlu0 %v9522_v22, %s9963_s1 }
 0x16b   :  { %v9524_v24 = vpop.eup %9523 }
 0x16c   :  { %v315_v25 = vadd.f32 1.0, %v9524_v24 }
 0x16e   :  { %9525 = vrcp.f32 %v315_v25 }
 0x178   :  { %v9526_v26 = vpop.eup %9525 }
 0x179   :  { %v319_v29 = vmul.f32 0.0, %v9526_v26 }
 0x1dc   :  { %v322_v27 = vpop.permute.xlu0 %321 }
 0x1dd   :  { %v324_v28 = vmul.f32 %v9526_v26, %v322_v27 }
 0x1df   :  { %326 = vrot.lane.b32.xlu0 %v324_v28, %s9954_s6 }
 0x251   :  { %v327_v30 = vpop.permute.xlu0 %326 }
 0x252   :  { %v329_v31 = vadd.f32 %v327_v30, %v319_v29 }
 0x254   :  { %9527 = vtanh.f32 %v329_v31  ;;  %v343_v50 = vsel %vm341_vm3, %v329_v31, 0.0 }
 0x25e   :  { %v9528_v33 = vpop.eup %9527 }
 0x25f   :  { %332 = vrot.lane.b32.xlu1 %v9528_v33, %s9963_s1 }
 0x2d1   :  { %v333_v35 = vpop.permute.xlu1 %332 }
 0x2d2   :  { %v335_v36 = vmul.f32 %v9526_v26, %v333_v35 }
 0x2d4   :  { %v342_v37 = vsel %vm341_vm3, %v335_v36, 0.0 }
 0x2d5   :  { %345 = vrot.lane.b32.xlu0 %v342_v37, %s9954_s6 }
 0x347   :  { %v346_v38 = vpop.permute.xlu0 %345 }
 0x348   :  { %349 = vst.msk [vmem:[#allocation2] sm:$0x3] %vm348_vm4, %v346_v38  ;;  %7989 = vmatmul.mubr.msk.f32.vlgmr.msra.gmra.mrb[0].mxu1 %vm164_vm1, %v346_v38 }
 0x349   :  { %8909 = vmatpush3.bf16.msra.mxu1 %v10154_v5  ;;  %8021 = vmatprep.mubr.msk.f32.mxu1 %vm9960_vm0, %v9961_v1 }
 0x34a   :  { %8910 = vmatprep.subr.bf16.mxu1 %v9959_v0 }
 0x34d   :  { %8912 = vmatpush3.bf16.msra.mxu1 %v10160_v7 }
 0x34e   :  { %8913 = vmatprep.subr.bf16.mxu1 %v9959_v0 }
 0x350   :  { %8022 = vmatmul.mubr.msk.f32.vlgmr.msra.gmra.mrb[2].mxu1 %vm164_vm1, %v723_v21 }
 0x351   :  { %8915 = vmatpush3.bf16.msra.mxu1 %v10166_v11  ;;  %8032 = vmatprep.mubr.msk.f32.mxu1 %vm9960_vm0, %v9961_v1 }
 0x352   :  { %8916 = vmatprep.subr.bf16.mxu1 %v9959_v0 }
 0x355   :  { %8918 = vmatpush3.bf16.msra.mxu1 %v10173_v14 }
 0x356   :  { %8931 = vmatprep.subr.bf16.mxu1 %v9959_v0 }
 0x41b   :  { %v493_v39 = vpop.f32.mrb[0].mxu1 }
 0x41c   :  { %v9376_v40 = vadd.f32 %v10199_v18, %v493_v39  ;;  %v7990_v41 = vpop.f32.mrb[1].mxu1 }
 0x41e   :  { %9529 = vtanh.f32 %v9376_v40  ;;  %v7416_v44 = vmul.f32 -1.442695, %v9376_v40 }
 0x420   :  { %9531 = vpow2.f32 %v7416_v44  ;;  %v909_v44 = vld [vmem:[#allocation4 + $0x8] sm:$0x3] }
 0x428   :  { %v9530_v42 = vpop.eup %9529 }
 0x429   :  { %507 = vrot.lane.b32.xlu1 %v9530_v42, %s9963_s1 }
 0x42a   :  { %v9532_v45 = vpop.eup %9531 }
 0x42b   :  { %v501_v46 = vadd.f32 1.0, %v9532_v45 }
 0x42d   :  { %525 = vperm.xlu1 %9519, %v523_v43   ;;  %9533 = vrcp.f32 %v501_v46 }
 0x437   :  { %v9534_v47 = vpop.eup %9533 }
 0x438   :  { %v505_v51 = vmul.f32 %v9534_v47, %v343_v50 }
 0x49b   :  { %v508_v48 = vpop.permute.xlu1 %507 }
 0x49c   :  { %v510_v49 = vmul.f32 %v9534_v47, %v508_v48 }
 0x49e   :  { %512 = vrot.lane.b32.xlu0 %v510_v49, %s9954_s6 }
 0x4ac   :  { %v10241_v56 = vpop.permute.xlu1 %525 }
 0x4ad   :  { %vm527_vm6 = vcmp.eq.s32.totalorder %v10241_v56, 1 }
 0x510   :  { %v513_v52 = vpop.permute.xlu0 %512 }
 0x511   :  { %v515_v53 = vadd.f32 %v513_v52, %v505_v51 }
 0x513   :  { %9535 = vtanh.f32 %v515_v53  ;;  %v529_v13 = vsel %vm527_vm6, %v515_v53, %v343_v50 }
 0x51d   :  { %v9536_v55 = vpop.eup %9535 }
 0x51e   :  { %518 = vrot.lane.b32.xlu0 %v9536_v55, %s9963_s1  ;;  %v1081_v55 = vsel %vm1080_vm11, 1, %v9962_v16 }
 0x590   :  { %v519_v57 = vpop.permute.xlu0 %518 }
 0x591   :  { %v521_v58 = vmul.f32 %v9534_v47, %v519_v57 }
 0x593   :  { %v528_v59 = vsel %vm527_vm6, %v521_v58, %v342_v37 }
 0x594   :  { %531 = vrot.lane.b32.xlu1 %v528_v59, %s9954_s6 }
 0x606   :  { %v532_v60 = vpop.permute.xlu1 %531 }
 0x607   :  { %535 = vst.msk [vmem:[#allocation2 + $0x2] sm:$0x3] %vm348_vm4, %v532_v60  ;;  %8011 = vmatmul.mubr.msk.f32.vlgmr.msra.gmra.mrb[2].mxu0 %vm164_vm1, %v532_v60 }
 0x608   :  { %8921 = vmatpush3.bf16.msra.mxu0 %v10154_v5  ;;  %8043 = vmatprep.mubr.msk.f32.mxu0 %vm9960_vm0, %v9961_v1 }
 0x609   :  { %8922 = vmatprep.subr.bf16.mxu0 %v9959_v0 }
 0x60c   :  { %8924 = vmatpush3.bf16.msra.mxu0 %v10160_v7 }
 0x60d   :  { %8925 = vmatprep.subr.bf16.mxu0 %v9959_v0 }
 0x60f   :  { %8044 = vmatmul.mubr.msk.f32.vlgmr.msra.gmra.mrb[4].mxu0 %vm164_vm1, %v909_v44  ;;  %v144_v44 = vld [vmem:[#allocation9 + $0x18] sm:$0xff] }
 0x610   :  { %8927 = vmatpush3.bf16.msra.mxu0 %v10166_v11  ;;  %8054 = vmatprep.mubr.msk.f32.mxu0 %vm9960_vm0, %v9961_v1 }
 0x611   :  { %8928 = vmatprep.subr.bf16.mxu0 %v9959_v0 }
 0x614   :  { %8930 = vmatpush3.bf16.msra.mxu0 %v10173_v14 }
 0x615   :  { %8943 = vmatprep.subr.bf16.mxu0 %v9959_v0 }
 0x6da   :  { %v679_v61 = vpop.f32.mrb[2].mxu0 }
 0x6db   :  { %v9377_v62 = vadd.f32 %v10199_v18, %v679_v61  ;;  %v8012_v63 = vpop.f32.mrb[3].mxu0 }
 0x6dd   :  { %9537 = vtanh.f32 %v9377_v62  ;;  %v7419_v4 = vmul.f32 -1.442695, %v9377_v62 }
 0x6df   :  { %9539 = vpow2.f32 %v7419_v4 }
 0x6e7   :  { %v9538_v2 = vpop.eup %9537 }
 0x6e8   :  { %693 = vrot.lane.b32.xlu0 %v9538_v2, %s9963_s1 }
 0x6e9   :  { %v9540_v6 = vpop.eup %9539 }
 0x6ea   :  { %v687_v8 = vadd.f32 1.0, %v9540_v6  ;;  %v1095_v6 = vld [vmem:[#allocation4 + $0xa] sm:$0x3] }
 0x6ec   :  { %711 = vperm.xlu0 %9520, %v709_v3   ;;  %9541 = vrcp.f32 %v687_v8 }
 0x6f6   :  { %v9542_v9 = vpop.eup %9541 }
 0x6f7   :  { %v691_v17 = vmul.f32 %v9542_v9, %v529_v13 }
 0x75a   :  { %v694_v10 = vpop.permute.xlu0 %693 }
 0x75b   :  { %v696_v12 = vmul.f32 %v9542_v9, %v694_v10 }
 0x75d   :  { %698 = vrot.lane.b32.xlu1 %v696_v12, %s9954_s6 }
 0x76b   :  { %v10270_v23 = vpop.permute.xlu0 %711 }
 0x76c   :  { %vm713_vm8 = vcmp.eq.s32.totalorder %v10270_v23, 1 }
 0x7cf   :  { %v699_v19 = vpop.permute.xlu1 %698 }
 0x7d0   :  { %v701_v20 = vadd.f32 %v699_v19, %v691_v17 }
 0x7d2   :  { %9543 = vtanh.f32 %v701_v20  ;;  %v715_v40 = vsel %vm713_vm8, %v701_v20, %v529_v13 }
 0x7dc   :  { %v9544_v22 = vpop.eup %9543 }
 0x7dd   :  { %704 = vrot.lane.b32.xlu1 %v9544_v22, %s9963_s1 }
 0x84f   :  { %v705_v24 = vpop.permute.xlu1 %704 }
 0x850   :  { %v707_v25 = vmul.f32 %v9542_v9, %v705_v24 }
 0x852   :  { %v714_v26 = vsel %vm713_vm8, %v707_v25, %v528_v59 }
 0x853   :  { %717 = vrot.lane.b32.xlu1 %v714_v26, %s9954_s6 }
 0x8c5   :  { %v718_v27 = vpop.permute.xlu1 %717 }
 0x8c6   :  { %721 = vst.msk [vmem:[#allocation2 + $0x4] sm:$0x3] %vm348_vm4, %v718_v27  ;;  %8033 = vmatmul.mubr.msk.f32.vlgmr.msra.gmra.mrb[2].mxu1 %vm164_vm1, %v718_v27 }
 0x8c7   :  { %8933 = vmatpush3.bf16.msra.mxu1 %v10154_v5  ;;  %8065 = vmatprep.mubr.msk.f32.mxu1 %vm9960_vm0, %v9961_v1 }
 0x8c8   :  { %8934 = vmatprep.subr.bf16.mxu1 %v9959_v0 }
 0x8cb   :  { %8936 = vmatpush3.bf16.msra.mxu1 %v10160_v7 }
 0x8cc   :  { %8937 = vmatprep.subr.bf16.mxu1 %v9959_v0 }
 0x8ce   :  { %8066 = vmatmul.mubr.msk.f32.vlgmr.msra.gmra.mrb[4].mxu1 %vm164_vm1, %v1095_v6 }
 0x8cf   :  { %8939 = vmatpush3.bf16.msra.mxu1 %v10166_v11  ;;  %8076 = vmatprep.mubr.msk.f32.mxu1 %vm9960_vm0, %v9961_v1 }
 0x8d0   :  { %8940 = vmatprep.subr.bf16.mxu1 %v9959_v0 }
 0x8d3   :  { %8942 = vmatpush3.bf16.msra.mxu1 %v10173_v14 }
 0x8d4   :  { %8955 = vmatprep.subr.bf16.mxu1 %v9959_v0 }
 0x999   :  { %v865_v28 = vpop.f32.mrb[2].mxu1 }
 0x99a   :  { %v9378_v29 = vadd.f32 %v10199_v18, %v865_v28  ;;  %v8034_v30 = vpop.f32.mrb[3].mxu1 }
 0x99c   :  { %9545 = vtanh.f32 %v9378_v29  ;;  %v7422_v33 = vmul.f32 -1.442695, %v9378_v29 }
 0x99e   :  { %9547 = vpow2.f32 %v7422_v33  ;;  %v1281_v33 = vld [vmem:[#allocation4 + $0xc] sm:$0x3] }
 0x9a6   :  { %v9546_v31 = vpop.eup %9545 }
 0x9a7   :  { %879 = vrot.lane.b32.xlu0 %v9546_v31, %s9963_s1 }
 0x9a8   :  { %v9548_v35 = vpop.eup %9547 }
 0x9a9   :  { %v873_v36 = vadd.f32 1.0, %v9548_v35 }
 0x9ab   :  { %897 = vperm.xlu0 %9520, %v895_v32   ;;  %9549 = vrcp.f32 %v873_v36 }
 0x9b5   :  { %v9550_v37 = vpop.eup %9549 }
 0x9b6   :  { %v877_v41 = vmul.f32 %v9550_v37, %v715_v40 }
 0xa19   :  { %v880_v38 = vpop.permute.xlu0 %879 }
 0xa1a   :  { %v882_v39 = vmul.f32 %v9550_v37, %v880_v38 }
 0xa1c   :  { %884 = vrot.lane.b32.xlu1 %v882_v39, %s9954_s6 }
 0xa2a   :  { %v10299_v46 = vpop.permute.xlu0 %897 }
 0xa2b   :  { %vm899_vm10 = vcmp.eq.s32.totalorder %v10299_v46, 1 }
 0xa8e   :  { %v885_v42 = vpop.permute.xlu1 %884 }
 0xa8f   :  { %v887_v43 = vadd.f32 %v885_v42, %v877_v41  ;;  %v142_v41 = vld [vmem:[#allocation9 + $0x8] sm:$0xff] }
 0xa91   :  { %9551 = vtanh.f32 %v887_v43  ;;  %v901_v63 = vsel %vm899_vm10, %v887_v43, %v715_v40  ;;  %v141_v40 = vld [vmem:[#allocation9] sm:$0xff]  ;;  %v143_v43 = vld [vmem:[#allocation9 + $0x10] sm:$0xff] }
 0xa92   :  { %v10372_v42 = vpack.c.bf16 %v142_v41, %v141_v40 }
 0xa9b   :  { %v9552_v45 = vpop.eup %9551 }
 0xa9c   :  { %890 = vrot.lane.b32.xlu1 %v9552_v45, %s9963_s1 }
 0xb0e   :  { %v891_v47 = vpop.permute.xlu1 %890 }
 0xb0f   :  { %v893_v48 = vmul.f32 %v9550_v37, %v891_v47  ;;  %v10377_v47 = vpack.c.bf16 %v144_v44, %v143_v43 }
 0xb11   :  { %v900_v49 = vsel %vm899_vm10, %v893_v48, %v714_v26  ;;  %v1651_v48 = vld [vmem:[#allocation10] sm:$0xff] }
 0xb12   :  { %903 = vrot.lane.b32.xlu0 %v900_v49, %s9954_s6 }
 0xb84   :  { %v904_v50 = vpop.permute.xlu0 %903 }
 0xb85   :  { %907 = vst.msk [vmem:[#allocation2 + $0x6] sm:$0x3] %vm348_vm4, %v904_v50  ;;  %8055 = vmatmul.mubr.msk.f32.vlgmr.msra.gmra.mrb[4].mxu0 %vm164_vm1, %v904_v50  ;;  %v1655_v50 = vld [vmem:[#allocation4 + $0xe] sm:$0x3] }
 0xb86   :  { %8945 = vmatpush3.bf16.msra.mxu0 %v10154_v5  ;;  %8087 = vmatprep.mubr.msk.f32.mxu0 %vm9960_vm0, %v9961_v1 }
 0xb87   :  { %8946 = vmatprep.subr.bf16.mxu0 %v9959_v0 }
 0xb8a   :  { %8948 = vmatpush3.bf16.msra.mxu0 %v10160_v7 }
 0xb8b   :  { %8949 = vmatprep.subr.bf16.mxu0 %v9959_v0 }
 0xb8d   :  { %8088 = vmatmul.mubr.msk.f32.vlgmr.msra.gmra.mrb[6].mxu0 %vm164_vm1, %v1281_v33 }
 0xb8e   :  { %8951 = vmatpush3.bf16.msra.mxu0 %v10166_v11  ;;  %8098 = vmatprep.mubr.msk.f32.mxu0 %vm9960_vm0, %v9961_v1 }
 0xb8f   :  { %8952 = vmatprep.subr.bf16.mxu0 %v9959_v0 }
 0xb92   :  { %8954 = vmatpush3.bf16.msra.mxu0 %v10173_v14 }
 0xb93   :  { %8967 = vmatprep.subr.bf16.mxu0 %v9959_v0 }
 0xc58   :  { %v1051_v51 = vpop.f32.mrb[4].mxu0 }
 0xc59   :  { %v9379_v52 = vadd.f32 %v10199_v18, %v1051_v51  ;;  %v8056_v53 = vpop.f32.mrb[5].mxu0 }
 0xc5a   :  { %v1654_v53 = vld [vmem:[#allocation10 + $0x18] sm:$0xff] }
 0xc5b   :  { %9553 = vtanh.f32 %v9379_v52  ;;  %v7425_v57 = vmul.f32 -1.442695, %v9379_v52  ;;  %v1653_v52 = vld [vmem:[#allocation10 + $0x10] sm:$0xff] }
 0xc5d   :  { %9555 = vpow2.f32 %v7425_v57 }
 0xc65   :  { %v9554_v54 = vpop.eup %9553 }
 0xc66   :  { %1065 = vrot.lane.b32.xlu1 %v9554_v54, %s9963_s1  ;;  %v10388_v54 = vpack.c.bf16 %v1654_v53, %v1653_v52 }
 0xc67   :  { %v9556_v58 = vpop.eup %9555 }
 0xc68   :  { %v1059_v59 = vadd.f32 1.0, %v9556_v58 }
 0xc6a   :  { %1083 = vperm.xlu1 %9519, %v1081_v55   ;;  %9557 = vrcp.f32 %v1059_v59 }
 0xc74   :  { %v9558_v60 = vpop.eup %9557 }
 0xc75   :  { %v1063_v2 = vmul.f32 %v9558_v60, %v901_v63 }
 0xcd8   :  { %v1066_v61 = vpop.permute.xlu1 %1065 }
 0xcd9   :  { %v1068_v62 = vmul.f32 %v9558_v60, %v1066_v61 }
 0xcdb   :  { %1070 = vrot.lane.b32.xlu0 %v1068_v62, %s9954_s6 }
 0xce9   :  { %v10328_v9 = vpop.permute.xlu1 %1083 }
 0xcea   :  { %vm1085_vm12 = vcmp.eq.s32.totalorder %v10328_v9, 1 }
 0xd4d   :  { %v1071_v3 = vpop.permute.xlu0 %1070 }
 0xd4e   :  { %v1073_v4 = vadd.f32 %v1071_v3, %v1063_v2 }
 0xd50   :  { %9559 = vtanh.f32 %v1073_v4  ;;  %v10349_v29 = vsel %vm1085_vm12, %v1073_v4, %v901_v63 }
 0xd5a   :  { %v9560_v8 = vpop.eup %9559 }
 0xd5b   :  { %1076 = vrot.lane.b32.xlu0 %v9560_v8, %s9963_s1 }
 0xdcd   :  { %v1077_v10 = vpop.permute.xlu0 %1076 }
 0xdce   :  { %v1079_v12 = vmul.f32 %v9558_v60, %v1077_v10  ;;  %v10407_v60 = vld [vmem:[%s11401_s7] ss:$0 sm:$0xff] }
 0xdd0   :  { %v1086_v13 = vsel %vm1085_vm12, %v1079_v12, %v900_v49  ;;  %v1652_v49 = vld [vmem:[#allocation10 + $0x8] sm:$0xff] }
 0xdd1   :  { %1089 = vrot.lane.b32.xlu1 %v1086_v13, %s9954_s6  ;;  %v10383_v51 = vpack.c.bf16 %v1652_v49, %v1651_v48 }
 0xe43   :  { %v1090_v17 = vpop.permute.xlu1 %1089 }
 0xe44   :  { %1093 = vst.msk [vmem:[#allocation2 + $0x8] sm:$0x3] %vm348_vm4, %v1090_v17  ;;  %8077 = vmatmul.mubr.msk.f32.vlgmr.msra.gmra.mrb[4].mxu1 %vm164_vm1, %v1090_v17 }
 0xe45   :  { %8957 = vmatpush3.bf16.msra.mxu1 %v10154_v5  ;;  %8109 = vmatprep.mubr.msk.f32.mxu1 %vm9960_vm0, %v9961_v1  ;;  %v1267_v5 = vsel %vm1266_vm13, 1, %v9962_v16 }
 0xe46   :  { %8958 = vmatprep.subr.bf16.mxu1 %v9959_v0 }
 0xe49   :  { %8960 = vmatpush3.bf16.msra.mxu1 %v10160_v7 }
 0xe4a   :  { %8961 = vmatprep.subr.bf16.mxu1 %v9959_v0 }
 0xf17   :  { %v1237_v19 = vpop.f32.mrb[4].mxu1 }
 0xf18   :  { %v9380_v20 = vadd.f32 %v10199_v18, %v1237_v19  ;;  %v8078_v21 = vpop.f32.mrb[5].mxu1  ;;  %v1453_v19 = vsel %vm1452_vm15, 1, %v9962_v16 }
 0xf1a   :  { %9561 = vtanh.f32 %v9380_v20  ;;  %v7428_v24 = vmul.f32 -1.442695, %v9380_v20  ;;  %v1639_v20 = vsel %vm1638_vm2, 1, %v9962_v16 }
 0xf1c   :  { %9563 = vpow2.f32 %v7428_v24 }
 0xf24   :  { %v9562_v22 = vpop.eup %9561 }
 0xf25   :  { %1251 = vrot.lane.b32.xlu0 %v9562_v22, %s9963_s1 }
 0xf26   :  { %v9564_v25 = vpop.eup %9563 }
 0xf27   :  { %v1245_v26 = vadd.f32 1.0, %v9564_v25 }
 0xf29   :  { %1269 = vperm.xlu0 %9520, %v1267_v5   ;;  %9565 = vrcp.f32 %v1245_v26 }
 0xf33   :  { %v9566_v7 = vpop.eup %9565 }
 0xf34   :  { %v1249_v30 = vmul.f32 %v9566_v7, %v10349_v29 }
 0xf97   :  { %v1252_v27 = vpop.permute.xlu0 %1251 }
 0xf98   :  { %v1254_v28 = vmul.f32 %v9566_v7, %v1252_v27 }
 0xf9a   :  { %1256 = vrot.lane.b32.xlu1 %v1254_v28, %s9954_s6 }
 0xfa8   :  { %v10363_v36 = vpop.permute.xlu0 %1269 }
 0xfa9   :  { %vm1271_vm14 = vcmp.eq.s32.totalorder %v10363_v36, 1 }
0x100c   :  { %v1257_v31 = vpop.permute.xlu1 %1256 }
0x100d   :  { %v10352_v32 = vadd.f32 %v1257_v31, %v1249_v30  ;;  %v1467_v30 = vld [vmem:[#allocation4 + $0xe] sm:$0x3] }
0x100e   :  { %8110 = vmatmul.mubr.msk.f32.vlgmr.msra.gmra.mrb[6].mxu1 %vm164_vm1, %v1467_v30  ;;  %v2190_v30 = vld [vmem:[#allocation4 + $0x8] sm:$0x3] }
0x100f   :  { %9567 = vtanh.f32 %v10352_v32  ;;  %v10421_v24 = vsel %vm1271_vm14, %v10352_v32, %v10349_v29  ;;  %8963 = vmatpush3.bf16.msra.mxu1 %v10166_v11  ;;  %8120 = vmatprep.mubr.msk.f32.mxu1 %vm9960_vm0, %v9961_v1 }
0x1010   :  { %8964 = vmatprep.subr.bf16.mxu1 %v9959_v0 }
0x1013   :  { %8966 = vmatpush3.bf16.msra.mxu1 %v10173_v14 }
0x1014   :  { %8979 = vmatprep.subr.bf16.mxu1 %v9959_v0 }
0x1019   :  { %v9568_v35 = vpop.eup %9567 }
0x101a   :  { %1262 = vrot.lane.b32.xlu1 %v9568_v35, %s9963_s1 }
0x108c   :  { %v1263_v37 = vpop.permute.xlu1 %1262 }
0x108d   :  { %v1265_v38 = vmul.f32 %v9566_v7, %v1263_v37 }
0x108f   :  { %v10368_v39 = vsel %vm1271_vm14, %v1265_v38, %v1086_v13 }
0x1090   :  { %1275 = vrot.lane.b32.xlu0 %v10368_v39, %s9954_s6 }
0x1102   :  { %v1276_v45 = vpop.permute.xlu0 %1275 }
0x1103   :  { %1279 = vst.msk [vmem:[#allocation2 + $0xa] sm:$0x3] %vm348_vm4, %v1276_v45  ;;  %8099 = vmatmul.mubr.msk.f32.vlgmr.msra.gmra.mrb[6].mxu0 %vm164_vm1, %v1276_v45 }
0x1104   :  { %8969 = vmatpush3.bf16.msra.mxu0 %v10372_v42  ;;  %8131 = vmatprep.mubr.msk.f32.mxu0 %vm9960_vm0, %v9961_v1 }
0x1105   :  { %8970 = vmatprep.subr.bf16.mxu0 %v9959_v0 }
0x1108   :  { %8972 = vmatpush3.bf16.msra.mxu0 %v10377_v47 }
0x1109   :  { %8973 = vmatprep.subr.bf16.mxu0 %v9959_v0 }
0x110b   :  { %8132 = vmatmul.mubr.msk.f32.vlgmr.msra.gmra.mrb[8].mxu0 %vm164_vm1, %v1655_v50 }
0x110c   :  { %8975 = vmatpush3.bf16.msra.mxu0 %v10383_v51  ;;  %8142 = vmatprep.mubr.msk.f32.mxu0 %vm9960_vm0, %v9961_v1 }
0x110d   :  { %8976 = vmatprep.subr.bf16.mxu0 %v9959_v0 }
0x1110   :  { %8978 = vmatpush3.bf16.msra.mxu0 %v10388_v54 }
0x1111   :  { %8991 = vmatprep.subr.bf16.mxu0 %v9959_v0 }
0x1113   :  { %8143 = vmatmul.mubr.f32.vlgmr.msra.gmra.mrb[8].mxu0 %v9961_v1 }
0x1114   :  { %8993 = vmatpush3.bf16.msra.mxu0 %v10372_v42  ;;  %8175 = vmatprep.mubr.msk.f32.mxu0 %vm9960_vm0, %v9961_v1 }
0x1115   :  { %8994 = vmatprep.subr.bf16.mxu0 %v9959_v0 }
0x1118   :  { %8996 = vmatpush3.bf16.msra.mxu0 %v10377_v47 }
0x1119   :  { %8997 = vmatprep.subr.bf16.mxu0 %v9959_v0 }
0x11d6   :  { %v1423_v55 = vpop.f32.mrb[6].mxu0 }
0x11d7   :  { %v9381_v57 = vadd.f32 %v10199_v18, %v1423_v55  ;;  %v8100_v58 = vpop.f32.mrb[7].mxu0 }
0x11d9   :  { %9569 = vtanh.f32 %v9381_v57  ;;  %v7431_v3 = vmul.f32 -1.442695, %v9381_v57 }
0x11e3   :  { %v9570_v59 = vpop.eup %9569 }
0x11e4   :  { %1437 = vrot.lane.b32.xlu1 %v9570_v59, %s9963_s1 }
0x11e6   :  { %v1795_v61 = vpop.f32.mrb[8].mxu0 }
0x11e7   :  { %v9383_v62 = vadd.f32 %v10407_v60, %v1795_v61  ;;  %v8144_v63 = vpop.f32.mrb[9].mxu0 }
0x11e9   :  { %9571 = vtanh.f32 %v9383_v62  ;;  %v7436_v4 = vmul.f32 -1.442695, %v9383_v62 }
0x11ea   :  { %9573 = vpow2.f32 %v7431_v3  ;;  %v2011_v3 = vld [vmem:[#allocation4 + $0xa] sm:$0x3] }
0x11eb   :  { %9575 = vpow2.f32 %v7436_v4  ;;  %8176 = vmatmul.mubr.msk.f32.vlgmr.msra.gmra.mrb[10].mxu0 %vm164_vm1, %v2011_v3 }
0x11ec   :  { %8999 = vmatpush3.bf16.msra.mxu0 %v10383_v51  ;;  %8186 = vmatprep.mubr.msk.f32.mxu0 %vm9960_vm0, %v9961_v1 }
0x11ed   :  { %9000 = vmatprep.subr.bf16.mxu0 %v9959_v0 }
0x11f0   :  { %9002 = vmatpush3.bf16.msra.mxu0 %v10388_v54 }
0x11f1   :  { %9015 = vmatprep.subr.bf16.mxu0 %v9959_v0 }
0x11f3   :  { %v9572_v2 = vpop.eup %9571 }
0x11f4   :  { %1809 = vrot.lane.b32.xlu0 %v9572_v2, %s9963_s1  ;;  %v9574_v18 = vpop.eup %9573 }
0x11f5   :  { %v1431_v6 = vadd.f32 1.0, %v9574_v18  ;;  %v9576_v8 = vpop.eup %9575 }
0x11f6   :  { %v1803_v17 = vadd.f32 1.0, %v9576_v8 }
0x11f7   :  { %9577 = vrcp.f32 %v1431_v6 }
0x11f8   :  { %9579 = vrcp.f32 %v1803_v17 }
0x1201   :  { %v9578_v10 = vpop.eup %9577 }
0x1202   :  { %v9580_v21 = vpop.eup %9579  ;;  %v1435_v25 = vmul.f32 %v9578_v10, %v10421_v24 }
0x1203   :  { %v1807_v7 = vmul.f32 0.0, %v9580_v21 }
0x1256   :  { %v1438_v12 = vpop.permute.xlu1 %1437 }
0x1257   :  { %v1440_v13 = vmul.f32 %v9578_v10, %v1438_v12 }
0x1259   :  { %1442 = vrot.lane.b32.xlu1 %v1440_v13, %s9954_s6 }
0x125d   :  { %1455 = vperm.xlu1 %9519, %v1453_v19  }
0x1261   :  { %1641 = vperm.xlu1 %9519, %v1639_v20  }
0x1266   :  { %v1810_v22 = vpop.permute.xlu0 %1809 }
0x1267   :  { %v1812_v5 = vmul.f32 %v9580_v21, %v1810_v22 }
0x1269   :  { %1814 = vrot.lane.b32.xlu0 %v1812_v5, %s9954_s6 }
0x12cb   :  { %v1443_v26 = vpop.permute.xlu1 %1442 }
0x12cc   :  { %v10424_v15 = vadd.f32 %v1443_v26, %v1435_v25 }
0x12ce   :  { %9581 = vtanh.f32 %v10424_v15 }
0x12d8   :  { %v9582_v16 = vpop.eup %9581 }
0x12d9   :  { %1448 = vrot.lane.b32.xlu0 %v9582_v16, %s9963_s1 }
0x12db   :  { %v1815_v27 = vpop.permute.xlu0 %1814 }
0x12dc   :  { %v10428_v28 = vadd.f32 %v1815_v27, %v1807_v7  ;;  %v10439_v31 = vpop.permute.xlu1 %1455 }
0x12dd   :  { %vm1457_vm5 = vcmp.eq.s32.totalorder %v10439_v31, 1 }
0x12de   :  { %9583 = vtanh.f32 %v10428_v28 }
0x12e0   :  { %v10449_v14 = vpop.permute.xlu1 %1641 }
0x12e1   :  { %vm1643_vm7 = vcmp.eq.s32.totalorder %v10449_v14, 1 }
0x12e2   :  { %v1825_v61 = vsel %vm1643_vm7, %v10428_v28, 0.0 }
0x12e8   :  { %v9584_v29 = vpop.eup %9583 }
0x12e9   :  { %1820 = vrot.lane.b32.xlu0 %v9584_v29, %s9963_s1 }
0x134b   :  { %v1449_v32 = vpop.permute.xlu0 %1448 }
0x134c   :  { %v1451_v33 = vmul.f32 %v9578_v10, %v1449_v32 }
0x134e   :  { %v10445_v11 = vsel %vm1457_vm5, %v1451_v33, %v10368_v39  ;;  %v1832_v39 = vld [vmem:[#allocation4 + $0xc] sm:$0x3] }
0x134f   :  { %1461 = vrot.lane.b32.xlu1 %v10445_v11, %s9954_s6 }
0x135b   :  { %v1821_v35 = vpop.permute.xlu0 %1820 }
0x135c   :  { %v1823_v37 = vmul.f32 %v9580_v21, %v1821_v35 }
0x135e   :  { %v1824_v38 = vsel %vm1643_vm7, %v1823_v37, 0.0 }
0x135f   :  { %1827 = vrot.lane.b32.xlu0 %v1824_v38, %s9954_s6 }
0x13c1   :  { %v1462_v40 = vpop.permute.xlu1 %1461 }
0x13c2   :  { %1465 = vst.msk [vmem:[#allocation2 + $0xc] sm:$0x3] %vm348_vm4, %v1462_v40  ;;  %8121 = vmatmul.mubr.msk.f32.vlgmr.msra.gmra.mrb[6].mxu1 %vm164_vm1, %v1462_v40 }
0x13c3   :  { %8981 = vmatpush3.bf16.msra.mxu1 %v10372_v42  ;;  %8153 = vmatprep.mubr.msk.f32.mxu1 %vm9960_vm0, %v9961_v1 }
0x13c4   :  { %8982 = vmatprep.subr.bf16.mxu1 %v9959_v0 }
0x13c7   :  { %8984 = vmatpush3.bf16.msra.mxu1 %v10377_v47 }
0x13c8   :  { %8985 = vmatprep.subr.bf16.mxu1 %v9959_v0 }
0x13ca   :  { %8154 = vmatmul.mubr.msk.f32.vlgmr.msra.gmra.mrb[8].mxu1 %vm164_vm1, %v1832_v39 }
0x13cb   :  { %8987 = vmatpush3.bf16.msra.mxu1 %v10383_v51  ;;  %8164 = vmatprep.mubr.msk.f32.mxu1 %vm9960_vm0, %v9961_v1 }
0x13cc   :  { %8988 = vmatprep.subr.bf16.mxu1 %v9959_v0 }
0x13cf   :  { %8990 = vmatpush3.bf16.msra.mxu1 %v10388_v54 }
0x13d0   :  { %9003 = vmatprep.subr.bf16.mxu1 %v9959_v0 }
0x13d1   :  { %v1828_v41 = vpop.permute.xlu0 %1827 }
0x13d2   :  { %1831 = vst.msk [vmem:[#allocation3 + $0xe] sm:$0x3] %vm348_vm4, %v1828_v41  ;;  %8165 = vmatmul.mubr.msk.f32.vlgmr.msra.gmra.mrb[8].mxu1 %vm164_vm1, %v1828_v41 }
0x13d3   :  { %9005 = vmatpush3.bf16.msra.mxu1 %v10372_v42  ;;  %8197 = vmatprep.mubr.msk.f32.mxu1 %vm9960_vm0, %v9961_v1 }
0x13d4   :  { %9006 = vmatprep.subr.bf16.mxu1 %v9959_v0 }
0x13d7   :  { %9008 = vmatpush3.bf16.msra.mxu1 %v10377_v47 }
0x13d8   :  { %9009 = vmatprep.subr.bf16.mxu1 %v9959_v0 }
0x13da   :  { %8198 = vmatmul.mubr.msk.f32.vlgmr.msra.gmra.mrb[10].mxu1 %vm164_vm1, %v2190_v30 }
0x13db   :  { %9011 = vmatpush3.bf16.msra.mxu1 %v10383_v51  ;;  %8208 = vmatprep.mubr.msk.f32.mxu1 %vm9960_vm0, %v9961_v1 }
0x13dc   :  { %9012 = vmatprep.subr.bf16.mxu1 %v9959_v0 }
0x13df   :  { %9014 = vmatpush3.bf16.msra.mxu1 %v10388_v54 }
0x13e0   :  { %9027 = vmatprep.subr.bf16.mxu1 %v9959_v0 }
0x1495   :  { %v10478_v43 = vpop.f32.mrb[6].mxu1 }
0x1496   :  { %v8122_v44 = vpop.f32.mrb[7].mxu1 }
0x14a5   :  { %v1974_v45 = vpop.f32.mrb[8].mxu1 }
0x14a6   :  { %v9384_v48 = vadd.f32 %v10407_v60, %v1974_v45  ;;  %v8166_v49 = vpop.f32.mrb[9].mxu1 }
0x14a8   :  { %9585 = vtanh.f32 %v9384_v48  ;;  %v7439_v52 = vmul.f32 -1.442695, %v9384_v48 }
0x14aa   :  { %9587 = vpow2.f32 %v7439_v52 }
0x14b2   :  { %v9586_v50 = vpop.eup %9585 }
0x14b3   :  { %1988 = vrot.lane.b32.xlu1 %v9586_v50, %s9963_s1 }
0x14b4   :  { %v9588_v53 = vpop.eup %9587 }
0x14b5   :  { %v1982_v55 = vadd.f32 1.0, %v9588_v53 }
0x14b7   :  { %9589 = vrcp.f32 %v1982_v55 }
0x14c1   :  { %v9590_v57 = vpop.eup %9589 }
0x14c2   :  { %v1986_v62 = vmul.f32 %v9590_v57, %v1825_v61 }
0x1525   :  { %v1989_v58 = vpop.permute.xlu1 %1988 }
0x1526   :  { %v1991_v59 = vmul.f32 %v9590_v57, %v1989_v58 }
0x1528   :  { %1993 = vrot.lane.b32.xlu0 %v1991_v59, %s9954_s6  ;;  %v2369_v59 = vld [vmem:[#allocation4 + $0x6] sm:$0x3] }
0x159a   :  { %v1994_v63 = vpop.permute.xlu0 %1993 }
0x159b   :  { %v1996_v2 = vadd.f32 %v1994_v63, %v1986_v62 }
0x159d   :  { %9591 = vtanh.f32 %v1996_v2  ;;  %v2004_v16 = vsel %vm1457_vm5, %v1996_v2, %v1825_v61 }
0x15a7   :  { %v9592_v18 = vpop.eup %9591 }
0x15a8   :  { %1999 = vrot.lane.b32.xlu1 %v9592_v18, %s9963_s1 }
0x161a   :  { %v2000_v4 = vpop.permute.xlu1 %1999 }
0x161b   :  { %v2002_v6 = vmul.f32 %v9590_v57, %v2000_v4 }
0x161d   :  { %v2003_v8 = vsel %vm1457_vm5, %v2002_v6, %v1824_v38 }
0x161e   :  { %2006 = vrot.lane.b32.xlu0 %v2003_v8, %s9954_s6 }
0x1690   :  { %v2007_v10 = vpop.permute.xlu0 %2006 }
0x1691   :  { %2010 = vst.msk [vmem:[#allocation3 + $0xc] sm:$0x3] %vm348_vm4, %v2007_v10  ;;  %8187 = vmatmul.mubr.msk.f32.vlgmr.msra.gmra.mrb[10].mxu0 %vm164_vm1, %v2007_v10 }
0x1692   :  { %9017 = vmatpush3.bf16.msra.mxu0 %v10372_v42  ;;  %8219 = vmatprep.mubr.msk.f32.mxu0 %vm9960_vm0, %v9961_v1 }
0x1693   :  { %9018 = vmatprep.subr.bf16.mxu0 %v9959_v0 }
0x1696   :  { %9020 = vmatpush3.bf16.msra.mxu0 %v10377_v47 }
0x1697   :  { %9021 = vmatprep.subr.bf16.mxu0 %v9959_v0 }
0x1699   :  { %8220 = vmatmul.mubr.msk.f32.vlgmr.msra.gmra.mrb[12].mxu0 %vm164_vm1, %v2369_v59 }
0x169a   :  { %9023 = vmatpush3.bf16.msra.mxu0 %v10383_v51  ;;  %8230 = vmatprep.mubr.msk.f32.mxu0 %vm9960_vm0, %v9961_v1 }
0x169b   :  { %9024 = vmatprep.subr.bf16.mxu0 %v9959_v0 }
0x169e   :  { %9026 = vmatpush3.bf16.msra.mxu0 %v10388_v54 }
0x169f   :  { %9039 = vmatprep.subr.bf16.mxu0 %v9959_v0 }
0x1764   :  { %v2153_v12 = vpop.f32.mrb[10].mxu0 }
0x1765   :  { %v9385_v13 = vadd.f32 %v10407_v60, %v2153_v12  ;;  %v8188_v17 = vpop.f32.mrb[11].mxu0 }
0x1767   :  { %9593 = vtanh.f32 %v9385_v13  ;;  %v7442_v20 = vmul.f32 -1.442695, %v9385_v13 }
0x1769   :  { %9595 = vpow2.f32 %v7442_v20 }
0x1771   :  { %v9594_v19 = vpop.eup %9593 }
0x1772   :  { %2167 = vrot.lane.b32.xlu1 %v9594_v19, %s9963_s1 }
0x1773   :  { %v9596_v21 = vpop.eup %9595 }
0x1774   :  { %v2161_v22 = vadd.f32 1.0, %v9596_v21 }
0x1776   :  { %9597 = vrcp.f32 %v2161_v22 }
0x1780   :  { %v9598_v5 = vpop.eup %9597 }
0x1781   :  { %v2165_v7 = vmul.f32 %v9598_v5, %v2004_v16 }
0x17e4   :  { %v2168_v25 = vpop.permute.xlu1 %2167 }
0x17e5   :  { %v2170_v26 = vmul.f32 %v9598_v5, %v2168_v25 }
0x17e7   :  { %2172 = vrot.lane.b32.xlu0 %v2170_v26, %s9954_s6  ;;  %v2548_v26 = vld [vmem:[#allocation4 + $0x4] sm:$0x3] }
0x1859   :  { %v2173_v27 = vpop.permute.xlu0 %2172 }
0x185a   :  { %v2175_v28 = vadd.f32 %v2173_v27, %v2165_v7 }
0x185c   :  { %9599 = vtanh.f32 %v2175_v28  ;;  %v2183_v53 = vsel %vm1271_vm14, %v2175_v28, %v2004_v16 }
0x1866   :  { %v9600_v29 = vpop.eup %9599 }
0x1867   :  { %2178 = vrot.lane.b32.xlu1 %v9600_v29, %s9963_s1 }
0x18d9   :  { %v2179_v32 = vpop.permute.xlu1 %2178 }
0x18da   :  { %v2181_v33 = vmul.f32 %v9598_v5, %v2179_v32 }
0x18dc   :  { %v2182_v35 = vsel %vm1271_vm14, %v2181_v33, %v2003_v8 }
0x18dd   :  { %2185 = vrot.lane.b32.xlu0 %v2182_v35, %s9954_s6 }
0x194f   :  { %v2186_v37 = vpop.permute.xlu0 %2185 }
0x1950   :  { %2189 = vst.msk [vmem:[#allocation3 + $0xa] sm:$0x3] %vm348_vm4, %v2186_v37  ;;  %8209 = vmatmul.mubr.msk.f32.vlgmr.msra.gmra.mrb[10].mxu1 %vm164_vm1, %v2186_v37 }
0x1951   :  { %9029 = vmatpush3.bf16.msra.mxu1 %v10372_v42  ;;  %8241 = vmatprep.mubr.msk.f32.mxu1 %vm9960_vm0, %v9961_v1 }
0x1952   :  { %9030 = vmatprep.subr.bf16.mxu1 %v9959_v0 }
0x1955   :  { %9032 = vmatpush3.bf16.msra.mxu1 %v10377_v47 }
0x1956   :  { %9033 = vmatprep.subr.bf16.mxu1 %v9959_v0 }
0x1958   :  { %8242 = vmatmul.mubr.msk.f32.vlgmr.msra.gmra.mrb[12].mxu1 %vm164_vm1, %v2548_v26 }
0x1959   :  { %9035 = vmatpush3.bf16.msra.mxu1 %v10383_v51  ;;  %8252 = vmatprep.mubr.msk.f32.mxu1 %vm9960_vm0, %v9961_v1 }
0x195a   :  { %9036 = vmatprep.subr.bf16.mxu1 %v9959_v0 }
0x195d   :  { %9038 = vmatpush3.bf16.msra.mxu1 %v10388_v54 }
0x195e   :  { %9051 = vmatprep.subr.bf16.mxu1 %v9959_v0 }
0x1a23   :  { %v2332_v38 = vpop.f32.mrb[10].mxu1 }
0x1a24   :  { %v9386_v40 = vadd.f32 %v10407_v60, %v2332_v38  ;;  %v8210_v39 = vpop.f32.mrb[11].mxu1 }
0x1a26   :  { %9601 = vtanh.f32 %v9386_v40  ;;  %v7445_v44 = vmul.f32 -1.442695, %v9386_v40 }
0x1a28   :  { %9603 = vpow2.f32 %v7445_v44 }
0x1a30   :  { %v9602_v41 = vpop.eup %9601 }
0x1a31   :  { %2346 = vrot.lane.b32.xlu1 %v9602_v41, %s9963_s1 }
0x1a32   :  { %v9604_v45 = vpop.eup %9603 }
0x1a33   :  { %v2340_v48 = vadd.f32 1.0, %v9604_v45 }
0x1a35   :  { %9605 = vrcp.f32 %v2340_v48 }
0x1a3f   :  { %v9606_v49 = vpop.eup %9605 }
0x1a40   :  { %v2344_v55 = vmul.f32 %v9606_v49, %v2183_v53 }
0x1aa3   :  { %v2347_v50 = vpop.permute.xlu1 %2346 }
0x1aa4   :  { %v2349_v52 = vmul.f32 %v9606_v49, %v2347_v50 }
0x1aa6   :  { %2351 = vrot.lane.b32.xlu0 %v2349_v52, %s9954_s6 }
0x1b18   :  { %v2352_v57 = vpop.permute.xlu0 %2351 }
0x1b19   :  { %v2354_v58 = vadd.f32 %v2352_v57, %v2344_v55 }
0x1b1b   :  { %9607 = vtanh.f32 %v2354_v58  ;;  %v2362_v21 = vsel %vm1085_vm12, %v2354_v58, %v2183_v53 }
0x1b25   :  { %v9608_v61 = vpop.eup %9607 }
0x1b26   :  { %2357 = vrot.lane.b32.xlu1 %v9608_v61, %s9963_s1 }
0x1b98   :  { %v2358_v62 = vpop.permute.xlu1 %2357 }
0x1b99   :  { %v2360_v63 = vmul.f32 %v9606_v49, %v2358_v62  ;;  %v2727_v49 = vld [vmem:[#allocation4 + $0x2] sm:$0x3] }
0x1b9b   :  { %v2361_v2 = vsel %vm1085_vm12, %v2360_v63, %v2182_v35 }
0x1b9c   :  { %2364 = vrot.lane.b32.xlu0 %v2361_v2, %s9954_s6 }
0x1c0e   :  { %v2365_v3 = vpop.permute.xlu0 %2364 }
0x1c0f   :  { %2368 = vst.msk [vmem:[#allocation3 + $0x8] sm:$0x3] %vm348_vm4, %v2365_v3  ;;  %8231 = vmatmul.mubr.msk.f32.vlgmr.msra.gmra.mrb[12].mxu0 %vm164_vm1, %v2365_v3 }
0x1c10   :  { %9041 = vmatpush3.bf16.msra.mxu0 %v10372_v42  ;;  %8263 = vmatprep.mubr.msk.f32.mxu0 %vm9960_vm0, %v9961_v1 }
0x1c11   :  { %9042 = vmatprep.subr.bf16.mxu0 %v9959_v0 }
0x1c14   :  { %9044 = vmatpush3.bf16.msra.mxu0 %v10377_v47 }
0x1c15   :  { %9045 = vmatprep.subr.bf16.mxu0 %v9959_v0 }
0x1c17   :  { %8264 = vmatmul.mubr.msk.f32.vlgmr.msra.gmra.mrb[14].mxu0 %vm164_vm1, %v2727_v49 }
0x1c18   :  { %9047 = vmatpush3.bf16.msra.mxu0 %v10383_v51  ;;  %8274 = vmatprep.mubr.msk.f32.mxu0 %vm9960_vm0, %v9961_v1 }
0x1c19   :  { %9048 = vmatprep.subr.bf16.mxu0 %v9959_v0 }
0x1c1c   :  { %9050 = vmatpush3.bf16.msra.mxu0 %v10388_v54 }
0x1c1d   :  { %9063 = vmatprep.subr.bf16.mxu0 %v9959_v0 }
0x1ce2   :  { %v2511_v18 = vpop.f32.mrb[12].mxu0 }
0x1ce3   :  { %v9387_v4 = vadd.f32 %v10407_v60, %v2511_v18  ;;  %v8232_v6 = vpop.f32.mrb[13].mxu0 }
0x1ce5   :  { %9609 = vtanh.f32 %v9387_v4  ;;  %v7448_v10 = vmul.f32 -1.442695, %v9387_v4 }
0x1ce7   :  { %9611 = vpow2.f32 %v7448_v10 }
0x1cef   :  { %v9610_v8 = vpop.eup %9609 }
0x1cf0   :  { %2525 = vrot.lane.b32.xlu1 %v9610_v8, %s9963_s1 }
0x1cf1   :  { %v9612_v12 = vpop.eup %9611 }
0x1cf2   :  { %v2519_v13 = vadd.f32 1.0, %v9612_v12 }
0x1cf4   :  { %9613 = vrcp.f32 %v2519_v13 }
0x1cfe   :  { %v9614_v17 = vpop.eup %9613 }
0x1cff   :  { %v2523_v22 = vmul.f32 %v9614_v17, %v2362_v21 }
0x1d62   :  { %v2526_v19 = vpop.permute.xlu1 %2525 }
0x1d63   :  { %v2528_v20 = vmul.f32 %v9614_v17, %v2526_v19 }
0x1d65   :  { %2530 = vrot.lane.b32.xlu0 %v2528_v20, %s9954_s6  ;;  %v3087_v20 = vld [vmem:[%s11402_s8 + $0x20] sm:$0xff] }
0x1dd7   :  { %v2531_v5 = vpop.permute.xlu0 %2530 }
0x1dd8   :  { %v2533_v25 = vadd.f32 %v2531_v5, %v2523_v22  ;;  %v3090_v22 = vld [vmem:[%s11402_s8 + $0x38] sm:$0xff] }
0x1dda   :  { %9615 = vtanh.f32 %v2533_v25 }
0x1de4   :  { %v9616_v16 = vpop.eup %9615 }
0x1de5   :  { %2536 = vrot.lane.b32.xlu1 %v9616_v16, %s9963_s1 }
0x1e57   :  { %v2537_v7 = vpop.permute.xlu1 %2536 }
0x1e58   :  { %v2539_v27 = vmul.f32 %v9614_v17, %v2537_v7  ;;  %v2906_v17 = vld [vmem:[#allocation4] sm:$0x3] }
0x1e5a   :  { %v2540_v28 = vsel %vm899_vm10, %v2539_v27, %v2361_v2  ;;  %v3083_v27 = vld [vmem:[%s11402_s8] sm:$0xff] }
0x1e5b   :  { %2543 = vrot.lane.b32.xlu0 %v2540_v28, %s9954_s6 }
0x1ecd   :  { %v2544_v30 = vpop.permute.xlu0 %2543 }
0x1ece   :  { %2547 = vst.msk [vmem:[#allocation3 + $0x6] sm:$0x3] %vm348_vm4, %v2544_v30  ;;  %8253 = vmatmul.mubr.msk.f32.vlgmr.msra.gmra.mrb[12].mxu1 %vm164_vm1, %v2544_v30 }
0x1ecf   :  { %9053 = vmatpush3.bf16.msra.mxu1 %v10372_v42  ;;  %8285 = vmatprep.mubr.msk.f32.mxu1 %vm9960_vm0, %v9961_v1 }
0x1ed0   :  { %9054 = vmatprep.subr.bf16.mxu1 %v9959_v0 }
0x1ed3   :  { %9056 = vmatpush3.bf16.msra.mxu1 %v10377_v47  ;;  %v2541_v47 = vsel %vm899_vm10, %v2533_v25, %v2362_v21 }
0x1ed4   :  { %9057 = vmatprep.subr.bf16.mxu1 %v9959_v0 }
0x1ed6   :  { %8286 = vmatmul.mubr.msk.f32.vlgmr.msra.gmra.mrb[14].mxu1 %vm164_vm1, %v2906_v17 }
0x1ed7   :  { %9059 = vmatpush3.bf16.msra.mxu1 %v10383_v51  ;;  %8296 = vmatprep.mubr.msk.f32.mxu1 %vm9960_vm0, %v9961_v1  ;;  %v3088_v51 = vld [vmem:[%s11402_s8 + $0x28] sm:$0xff] }
0x1ed8   :  { %9060 = vmatprep.subr.bf16.mxu1 %v9959_v0  ;;  %v10622_v21 = vpack.c.bf16 %v3088_v51, %v3087_v20 }
0x1edb   :  { %9062 = vmatpush3.bf16.msra.mxu1 %v10388_v54  ;;  %v3089_v54 = vld [vmem:[%s11402_s8 + $0x30] sm:$0xff] }
0x1edc   :  { %9081 = vmatprep.subr.bf16.mxu1 %v9959_v0  ;;  %v10632_v5 = vpack.c.bf16 %v3090_v22, %v3089_v54 }
0x1fa1   :  { %v2690_v29 = vpop.f32.mrb[12].mxu1 }
0x1fa2   :  { %v9388_v32 = vadd.f32 %v10407_v60, %v2690_v29  ;;  %v8254_v33 = vpop.f32.mrb[13].mxu1  ;;  %v3085_v29 = vld [vmem:[%s11402_s8 + $0x10] sm:$0xff] }
0x1fa4   :  { %9617 = vtanh.f32 %v9388_v32  ;;  %v7451_v37 = vmul.f32 -1.442695, %v9388_v32  ;;  %v3086_v32 = vld [vmem:[%s11402_s8 + $0x18] sm:$0xff] }
0x1fa6   :  { %9619 = vpow2.f32 %v7451_v37  ;;  %v3363_v37 = vld [vmem:[#allocation2 + $0x2] sm:$0x3] }
0x1fae   :  { %v9618_v35 = vpop.eup %9617 }
0x1faf   :  { %2704 = vrot.lane.b32.xlu1 %v9618_v35, %s9963_s1  ;;  %v10663_v35 = vpack.c.bf16 %v3086_v32, %v3085_v29 }
0x1fb0   :  { %v9620_v42 = vpop.eup %9619 }
0x1fb1   :  { %v2698_v38 = vadd.f32 1.0, %v9620_v42 }
0x1fb3   :  { %9621 = vrcp.f32 %v2698_v38 }
0x1fbd   :  { %v9622_v40 = vpop.eup %9621 }
0x1fbe   :  { %v2702_v44 = vmul.f32 %v9622_v40, %v2541_v47 }
0x2021   :  { %v2705_v39 = vpop.permute.xlu1 %2704 }
0x2022   :  { %v2707_v41 = vmul.f32 %v9622_v40, %v2705_v39 }
0x2024   :  { %2709 = vrot.lane.b32.xlu0 %v2707_v41, %s9954_s6 }
0x2096   :  { %v2710_v45 = vpop.permute.xlu0 %2709 }
0x2097   :  { %v2712_v48 = vadd.f32 %v2710_v45, %v2702_v44 }
0x2099   :  { %9623 = vtanh.f32 %v2712_v48  ;;  %v10602_v8 = vsel %vm713_vm8, %v2712_v48, %v2541_v47 }
0x20a3   :  { %v9624_v50 = vpop.eup %9623 }
0x20a4   :  { %2715 = vrot.lane.b32.xlu1 %v9624_v50, %s9963_s1 }
0x2116   :  { %v2716_v52 = vpop.permute.xlu1 %2715 }
0x2117   :  { %v2718_v53 = vmul.f32 %v9622_v40, %v2716_v52 }
0x2119   :  { %v2719_v55 = vsel %vm713_vm8, %v2718_v53, %v2540_v28  ;;  %v3084_v28 = vld [vmem:[%s11402_s8 + $0x8] sm:$0xff] }
0x211a   :  { %2722 = vrot.lane.b32.xlu0 %v2719_v55, %s9954_s6  ;;  %v10652_v30 = vpack.c.bf16 %v3084_v28, %v3083_v27 }
0x218c   :  { %v2723_v57 = vpop.permute.xlu0 %2722 }
0x218d   :  { %2726 = vst.msk [vmem:[#allocation3 + $0x4] sm:$0x3] %vm348_vm4, %v2723_v57  ;;  %8275 = vmatmul.mubr.msk.f32.vlgmr.msra.gmra.mrb[14].mxu0 %vm164_vm1, %v2723_v57 }
0x218e   :  { %8307 = vmatprep.mubr.msk.f32.mxu0 %vm9960_vm0, %v9961_v1  ;;  %9065 = vmatpush3.bf16.msra.mxu0 %v10622_v21 }
0x218f   :  { %9066 = vmatprep.subr.bf16.mxu0 %v9959_v0 }
0x2192   :  { %9068 = vmatpush3.bf16.msra.mxu0 %v10632_v5 }
0x2193   :  { %9069 = vmatprep.subr.bf16.mxu0 %v9959_v0 }
0x2260   :  { %v2869_v58 = vpop.f32.mrb[14].mxu0 }
0x2261   :  { %v9389_v59 = vadd.f32 %v10407_v60, %v2869_v58  ;;  %v8276_v61 = vpop.f32.mrb[15].mxu0 }
0x2262   :  { %v3113_v61 = vld [vmem:[#allocation12] sm:$0xff] }
0x2263   :  { %9625 = vtanh.f32 %v9389_v59  ;;  %v7454_v63 = vmul.f32 -1.442695, %v9389_v59 }
0x2265   :  { %9627 = vpow2.f32 %v7454_v63 }
0x226d   :  { %v9626_v62 = vpop.eup %9625 }
0x226e   :  { %2883 = vrot.lane.b32.xlu1 %v9626_v62, %s9963_s1  ;;  %v3114_v62 = vld [vmem:[#allocation12 + $0x8] sm:$0xff] }
0x226f   :  { %v9628_v2 = vpop.eup %9627  ;;  %v10687_v63 = vpack.c.bf16 %v3114_v62, %v3113_v61 }
0x2270   :  { %v2877_v3 = vadd.f32 1.0, %v9628_v2  ;;  %v3115_v2 = vld [vmem:[#allocation12 + $0x10] sm:$0xff] }
0x2272   :  { %9629 = vrcp.f32 %v2877_v3  ;;  %v3116_v3 = vld [vmem:[#allocation12 + $0x18] sm:$0xff] }
0x227c   :  { %v9630_v18 = vpop.eup %9629 }
0x227d   :  { %v2881_v10 = vmul.f32 %v9630_v18, %v10602_v8 }
0x22e0   :  { %v2884_v4 = vpop.permute.xlu1 %2883 }
0x22e1   :  { %v2886_v6 = vmul.f32 %v9630_v18, %v2884_v4 }
0x22e3   :  { %2888 = vrot.lane.b32.xlu0 %v2886_v6, %s9954_s6 }
0x2355   :  { %v2889_v12 = vpop.permute.xlu0 %2888 }
0x2356   :  { %v10605_v13 = vadd.f32 %v2889_v12, %v2881_v10  ;;  %v3615_v10 = vld [vmem:[#allocation3 + $0x4] sm:$0x3]  ;;  %v3614_v12 = vld [vmem:[#allocation2 + $0x4] sm:$0x3] }
0x2358   :  { %9631 = vtanh.f32 %v10605_v13 }
0x2362   :  { %v9632_v19 = vpop.eup %9631 }
0x2363   :  { %2894 = vrot.lane.b32.xlu1 %v9632_v19, %s9963_s1 }
0x23d5   :  { %v2895_v25 = vpop.permute.xlu1 %2894 }
0x23d6   :  { %v2897_v26 = vmul.f32 %v9630_v18, %v2895_v25  ;;  %v10691_v18 = vpack.c.bf16 %v3116_v3, %v3115_v2 }
0x23d8   :  { %v2898_v16 = vsel %vm527_vm6, %v2897_v26, %v2719_v55 }
0x23d9   :  { %2901 = vrot.lane.b32.xlu0 %v2898_v16, %s9954_s6 }
0x244b   :  { %v2902_v7 = vpop.permute.xlu0 %2901 }
0x244c   :  { %2905 = vst.msk [vmem:[#allocation3 + $0x2] sm:$0x3] %vm348_vm4, %v2902_v7  ;;  %8297 = vmatmul.mubr.msk.f32.vlgmr.msra.gmra.mrb[14].mxu1 %vm164_vm1, %v2902_v7 }
0x244d   :  { %9083 = vmatpush3.bf16.msra.mxu1 %v10622_v21  ;;  %8340 = vmatprep.mubr.msk.f32.mxu1 %vm9960_vm0, %v9961_v1 }
0x244e   :  { %9084 = vmatprep.subr.bf16.mxu1 %v9959_v0 }
0x2451   :  { %9086 = vmatpush3.bf16.msra.mxu1 %v10632_v5 }
0x2452   :  { %9087 = vmatprep.subr.bf16.mxu1 %v9959_v0 }
0x2453   :  { %v3364_v33 = vld [vmem:[#allocation3 + $0x2] sm:$0x3] }
0x2454   :  { %8341 = vmatmul.mubr.msk.f32.vlgmr.msra.gmra.mrb[16].mxu1 %vm164_vm1, %v3364_v33  ;;  %v9780_v36 = vld [vmem:[#allocation3 + $0x2] sm:$0x3] }
0x2455   :  { %9089 = vmatpush3.bf16.msra.mxu1 %v10652_v30  ;;  %8351 = vmatprep.mubr.msk.f32.mxu1 %vm9960_vm0, %v9961_v1 }
0x2456   :  { %9090 = vmatprep.subr.bf16.mxu1 %v9959_v0 }
0x2459   :  { %9092 = vmatpush3.bf16.msra.mxu1 %v10663_v35 }
0x245a   :  { %9093 = vmatprep.subr.bf16.mxu1 %v9959_v0 }
0x245c   :  { %8352 = vmatmul.mubr.msk.f32.vlgmr.msra.gmra.mrb[16].mxu1 %vm164_vm1, %v3363_v37 }
0x245d   :  { %8362 = vmatprep.mubr.msk.f32.mxu1 %vm9960_vm0, %v9961_v1  ;;  %9095 = vmatpush3.bf16.msra.mxu1 %v10687_v63 }
0x245e   :  { %9096 = vmatprep.subr.bf16.mxu1 %v9959_v0 }
0x2461   :  { %9098 = vmatpush3.bf16.msra.mxu1 %v10691_v18 }
0x2462   :  { %9117 = vmatprep.subr.bf16.mxu1 %v9959_v0 }
0x251f   :  { %v3048_v42 = vpop.f32.mrb[14].mxu1 }
0x2520   :  { %v9390_v38 = vadd.f32 %v10407_v60, %v3048_v42  ;;  %v8298_v40 = vpop.f32.mrb[15].mxu1  ;;  %v2899_v60 = vsel %vm527_vm6, %v10605_v13, %v10602_v8  ;;  %v3117_v8 = vld [vmem:[#allocation2] sm:$0x3] }
0x2521   :  { %v10734_v13 = vld [vmem:[%s11404_s10] ss:$0 sm:$0xff]  ;;  %v10750_v40 = vld [vmem:[#allocation3 + $0x6] sm:$0x3] }
0x2522   :  { %9633 = vtanh.f32 %v9390_v38  ;;  %v7457_v41 = vmul.f32 -1.442695, %v9390_v38 }
0x2524   :  { %9635 = vpow2.f32 %v7457_v41 }
0x252c   :  { %v9634_v39 = vpop.eup %9633 }
0x252d   :  { %3062 = vrot.lane.b32.xlu1 %v9634_v39, %s9963_s1  ;;  %v10760_v39 = vld [vmem:[#allocation2 + $0x6] sm:$0x3] }
0x252e   :  { %v9636_v47 = vpop.eup %9635 }
0x252f   :  { %v3056_v44 = vadd.f32 1.0, %v9636_v47 }
0x2531   :  { %9637 = vrcp.f32 %v3056_v44 }
0x253b   :  { %v9638_v45 = vpop.eup %9637 }
0x253c   :  { %v3060_v50 = vmul.f32 %v9638_v45, %v2899_v60 }
0x259f   :  { %v3063_v48 = vpop.permute.xlu1 %3062 }
0x25a0   :  { %v3065_v49 = vmul.f32 %v9638_v45, %v3063_v48 }
0x25a2   :  { %3067 = vrot.lane.b32.xlu0 %v3065_v49, %s9954_s6 }
0x2614   :  { %v3068_v52 = vpop.permute.xlu0 %3067 }
0x2615   :  { %v3070_v53 = vadd.f32 %v3068_v52, %v3060_v50 }
0x2617   :  { %9639 = vtanh.f32 %v3070_v53 }
0x2621   :  { %v9640_v55 = vpop.eup %9639 }
0x2622   :  { %3073 = vrot.lane.b32.xlu1 %v9640_v55, %s9963_s1 }
0x2694   :  { %v3074_v57 = vpop.permute.xlu1 %3073 }
0x2695   :  { %v3076_v58 = vmul.f32 %v9638_v45, %v3074_v57 }
0x2697   :  { %v10683_v59 = vsel %vm341_vm3, %v3076_v58, %v2898_v16 }
0x2698   :  { %3079 = vrot.lane.b32.xlu0 %v10683_v59, %s9954_s6 }
0x270a   :  { %v3080_v4 = vpop.permute.xlu0 %3079 }
0x270b   :  { %3082 = vst.msk [vmem:[#allocation3] sm:$0x3] %vm348_vm4, %v3080_v4 }
0x2712   :  { %v3118_v6 = vld [vmem:[#allocation3] sm:$0x3] }
0x2713   :  { %8308 = vmatmul.mubr.msk.f32.vlgmr.msra.gmra.mrb[16].mxu0 %vm164_vm1, %v3118_v6  ;;  %v9782_v9 = vld [vmem:[#allocation3] sm:$0x3] }
0x2714   :  { %9071 = vmatpush3.bf16.msra.mxu0 %v10652_v30  ;;  %8318 = vmatprep.mubr.msk.f32.mxu0 %vm9960_vm0, %v9961_v1 }
0x2715   :  { %9072 = vmatprep.subr.bf16.mxu0 %v9959_v0 }
0x2718   :  { %9074 = vmatpush3.bf16.msra.mxu0 %v10663_v35 }
0x2719   :  { %9075 = vmatprep.subr.bf16.mxu0 %v9959_v0 }
0x271b   :  { %8319 = vmatmul.mubr.msk.f32.vlgmr.msra.gmra.mrb[16].mxu0 %vm164_vm1, %v3117_v8  ;;  %v10786_v8 = vld [vmem:[#allocation3 + $0x8] sm:$0x3] }
0x271c   :  { %9077 = vmatpush3.bf16.msra.mxu0 %v10687_v63  ;;  %8329 = vmatprep.mubr.msk.f32.mxu0 %vm9960_vm0, %v9961_v1 }
0x271d   :  { %9078 = vmatprep.subr.bf16.mxu0 %v9959_v0 }
0x2720   :  { %9080 = vmatpush3.bf16.msra.mxu0 %v10691_v18 }
0x2721   :  { %9099 = vmatprep.subr.bf16.mxu0 %v9959_v0 }
0x2723   :  { %8330 = vmatmul.mubr.f32.vlgmr.msra.gmra.mrb[16].mxu0 %v9961_v1 }
0x2724   :  { %9101 = vmatpush3.bf16.msra.mxu0 %v10622_v21  ;;  %8373 = vmatprep.mubr.msk.f32.mxu0 %vm9960_vm0, %v9961_v1 }
0x2725   :  { %9102 = vmatprep.subr.bf16.mxu0 %v9959_v0 }
0x2728   :  { %9104 = vmatpush3.bf16.msra.mxu0 %v10632_v5 }
0x2729   :  { %9105 = vmatprep.subr.bf16.mxu0 %v9959_v0 }
0x272b   :  { %8374 = vmatmul.mubr.msk.f32.vlgmr.msra.gmra.mrb[18].mxu0 %vm164_vm1, %v3615_v10  ;;  %v10796_v10 = vld [vmem:[#allocation2 + $0x8] sm:$0x3] }
0x272c   :  { %9107 = vmatpush3.bf16.msra.mxu0 %v10652_v30  ;;  %8384 = vmatprep.mubr.msk.f32.mxu0 %vm9960_vm0, %v9961_v1 }
0x272d   :  { %9108 = vmatprep.subr.bf16.mxu0 %v9959_v0 }
0x2730   :  { %9110 = vmatpush3.bf16.msra.mxu0 %v10663_v35 }
0x2731   :  { %9111 = vmatprep.subr.bf16.mxu0 %v9959_v0 }
0x2733   :  { %8385 = vmatmul.mubr.msk.f32.vlgmr.msra.gmra.mrb[18].mxu0 %vm164_vm1, %v3614_v12 }
0x2734   :  { %9113 = vmatpush3.bf16.msra.mxu0 %v10687_v63  ;;  %8395 = vmatprep.mubr.msk.f32.mxu0 %vm9960_vm0, %v9961_v1 }
0x2735   :  { %9114 = vmatprep.subr.bf16.mxu0 %v9959_v0 }
0x2738   :  { %9116 = vmatpush3.bf16.msra.mxu0 %v10691_v18 }
0x2739   :  { %9135 = vmatprep.subr.bf16.mxu0 %v9959_v0 }
0x27f6   :  { %v3332_v17 = vpop.f32.mrb[16].mxu0 }
0x27f7   :  { %v9391_v19 = vadd.f32 %v10734_v13, %v3332_v17  ;;  %v8331_v20 = vpop.f32.mrb[17].mxu0 }
0x27f9   :  { %9641 = vtanh.f32 %v9391_v19  ;;  %v7462_v54 = vmul.f32 -1.442695, %v9391_v19 }
0x27fb   :  { %9643 = vpow2.f32 %v7462_v54 }
0x2803   :  { %v9642_v51 = vpop.eup %9641 }
0x2804   :  { %3346 = vrot.lane.b32.xlu1 %v9642_v51, %s9963_s1 }
0x2805   :  { %v9644_v22 = vpop.eup %9643 }
0x2806   :  { %v3340_v25 = vadd.f32 1.0, %v9644_v22 }
0x2808   :  { %9645 = vrcp.f32 %v3340_v25 }
0x2812   :  { %v9646_v26 = vpop.eup %9645 }
0x2813   :  { %v3344_v27 = vmul.f32 0.0, %v9646_v26 }
0x2876   :  { %v3347_v16 = vpop.permute.xlu1 %3346 }
0x2877   :  { %v3349_v7 = vmul.f32 %v9646_v26, %v3347_v16 }
0x2879   :  { %3351 = vrot.lane.b32.xlu0 %v3349_v7, %s9954_s6 }
0x28eb   :  { %v3352_v28 = vpop.permute.xlu0 %3351 }
0x28ec   :  { %v3354_v29 = vadd.f32 %v3352_v28, %v3344_v27 }
0x28ee   :  { %9647 = vtanh.f32 %v3354_v29  ;;  %v3362_v55 = vsel %vm341_vm3, %v3354_v29, 0.0 }
0x28f8   :  { %v9648_v32 = vpop.eup %9647 }
0x28f9   :  { %3357 = vrot.lane.b32.xlu1 %v9648_v32, %s9963_s1 }
0x296b   :  { %v3358_v33 = vpop.permute.xlu1 %3357 }
0x296c   :  { %v3360_v37 = vmul.f32 %v9646_v26, %v3358_v33 }
0x296e   :  { %v3361_v42 = vsel %vm341_vm3, %v3360_v37, 0.0 }
0x296f   :  { %3513 = vrot.lane.b32.xlu0 %v3361_v42, %s9954_s6 }
0x29e1   :  { %v3514_v38 = vpop.permute.xlu0 %3513 }
0x29e2   :  { %8363 = vmatmul.mubr.msk.f32.vlgmr.msra.gmra.mrb[16].mxu1 %vm164_vm1, %v3514_v38 }
0x29e3   :  { %9119 = vmatpush3.bf16.msra.mxu1 %v10622_v21  ;;  %8406 = vmatprep.mubr.msk.f32.mxu1 %vm9960_vm0, %v9961_v1 }
0x29e4   :  { %9120 = vmatprep.subr.bf16.mxu1 %v9959_v0 }
0x29e7   :  { %9122 = vmatpush3.bf16.msra.mxu1 %v10632_v5 }
0x29e8   :  { %9123 = vmatprep.subr.bf16.mxu1 %v9959_v0 }
0x29ea   :  { %8407 = vmatmul.mubr.msk.f32.vlgmr.msra.gmra.mrb[18].mxu1 %vm164_vm1, %v10750_v40 }
0x29eb   :  { %9125 = vmatpush3.bf16.msra.mxu1 %v10652_v30  ;;  %8417 = vmatprep.mubr.msk.f32.mxu1 %vm9960_vm0, %v9961_v1 }
0x29ec   :  { %9126 = vmatprep.subr.bf16.mxu1 %v9959_v0 }
0x29ef   :  { %9128 = vmatpush3.bf16.msra.mxu1 %v10663_v35 }
0x29f0   :  { %9129 = vmatprep.subr.bf16.mxu1 %v9959_v0 }
0x29f2   :  { %8418 = vmatmul.mubr.msk.f32.vlgmr.msra.gmra.mrb[18].mxu1 %vm164_vm1, %v10760_v39 }
0x29f3   :  { %9131 = vmatpush3.bf16.msra.mxu1 %v10687_v63  ;;  %8428 = vmatprep.mubr.msk.f32.mxu1 %vm9960_vm0, %v9961_v1 }
0x29f4   :  { %9132 = vmatprep.subr.bf16.mxu1 %v9959_v0 }
0x29f7   :  { %9134 = vmatpush3.bf16.msra.mxu1 %v10691_v18 }
0x29f8   :  { %9153 = vmatprep.subr.bf16.mxu1 %v9959_v0 }
0x2ab5   :  { %v3583_v41 = vpop.f32.mrb[16].mxu1 }
0x2ab6   :  { %v9392_v47 = vadd.f32 %v10734_v13, %v3583_v41  ;;  %v8364_v44 = vpop.f32.mrb[17].mxu1  ;;  %v10822_v41 = vld [vmem:[#allocation3 + $0xa] sm:$0x3] }
0x2ab8   :  { %9649 = vtanh.f32 %v9392_v47  ;;  %v7466_v48 = vmul.f32 -1.442695, %v9392_v47  ;;  %v10832_v47 = vld [vmem:[#allocation2 + $0xa] sm:$0x3] }
0x2aba   :  { %9651 = vpow2.f32 %v7466_v48 }
0x2ac2   :  { %v9650_v45 = vpop.eup %9649 }
0x2ac3   :  { %3597 = vrot.lane.b32.xlu1 %v9650_v45, %s9963_s1 }
0x2ac4   :  { %v9652_v49 = vpop.eup %9651 }
0x2ac5   :  { %v3591_v60 = vadd.f32 1.0, %v9652_v49 }
0x2ac7   :  { %9653 = vrcp.f32 %v3591_v60 }
0x2ad1   :  { %v9654_v50 = vpop.eup %9653 }
0x2ad2   :  { %v3595_v57 = vmul.f32 %v9654_v50, %v3362_v55 }
0x2b35   :  { %v3598_v52 = vpop.permute.xlu1 %3597 }
0x2b36   :  { %v3600_v53 = vmul.f32 %v9654_v50, %v3598_v52 }
0x2b38   :  { %3602 = vrot.lane.b32.xlu0 %v3600_v53, %s9954_s6 }
0x2baa   :  { %v3603_v58 = vpop.permute.xlu0 %3602 }
0x2bab   :  { %v3605_v61 = vadd.f32 %v3603_v58, %v3595_v57 }
0x2bad   :  { %9655 = vtanh.f32 %v3605_v61  ;;  %v3613_v7 = vsel %vm527_vm6, %v3605_v61, %v3362_v55 }
0x2bb7   :  { %v9656_v62 = vpop.eup %9655 }
0x2bb8   :  { %3608 = vrot.lane.b32.xlu1 %v9656_v62, %s9963_s1 }
0x2c2a   :  { %v3609_v2 = vpop.permute.xlu1 %3608 }
0x2c2b   :  { %v3611_v3 = vmul.f32 %v9654_v50, %v3609_v2 }
0x2c2d   :  { %v3612_v4 = vsel %vm527_vm6, %v3611_v3, %v3361_v42 }
0x2c2e   :  { %3764 = vrot.lane.b32.xlu0 %v3612_v4, %s9954_s6 }
0x2ca0   :  { %v3765_v6 = vpop.permute.xlu0 %3764 }
0x2ca1   :  { %8396 = vmatmul.mubr.msk.f32.vlgmr.msra.gmra.mrb[18].mxu0 %vm164_vm1, %v3765_v6 }
0x2ca2   :  { %9137 = vmatpush3.bf16.msra.mxu0 %v10622_v21  ;;  %8439 = vmatprep.mubr.msk.f32.mxu0 %vm9960_vm0, %v9961_v1 }
0x2ca3   :  { %9138 = vmatprep.subr.bf16.mxu0 %v9959_v0 }
0x2ca6   :  { %9140 = vmatpush3.bf16.msra.mxu0 %v10632_v5 }
0x2ca7   :  { %9141 = vmatprep.subr.bf16.mxu0 %v9959_v0 }
0x2ca9   :  { %8440 = vmatmul.mubr.msk.f32.vlgmr.msra.gmra.mrb[20].mxu0 %vm164_vm1, %v10786_v8 }
0x2caa   :  { %9143 = vmatpush3.bf16.msra.mxu0 %v10652_v30  ;;  %8450 = vmatprep.mubr.msk.f32.mxu0 %vm9960_vm0, %v9961_v1 }
0x2cab   :  { %9144 = vmatprep.subr.bf16.mxu0 %v9959_v0 }
0x2cae   :  { %9146 = vmatpush3.bf16.msra.mxu0 %v10663_v35 }
0x2caf   :  { %9147 = vmatprep.subr.bf16.mxu0 %v9959_v0 }
0x2cb1   :  { %8451 = vmatmul.mubr.msk.f32.vlgmr.msra.gmra.mrb[20].mxu0 %vm164_vm1, %v10796_v10 }
0x2cb2   :  { %9149 = vmatpush3.bf16.msra.mxu0 %v10687_v63  ;;  %8461 = vmatprep.mubr.msk.f32.mxu0 %vm9960_vm0, %v9961_v1 }
0x2cb3   :  { %9150 = vmatprep.subr.bf16.mxu0 %v9959_v0 }
0x2cb6   :  { %9152 = vmatpush3.bf16.msra.mxu0 %v10691_v18 }
0x2cb7   :  { %9171 = vmatprep.subr.bf16.mxu0 %v9959_v0 }
0x2d74   :  { %v3834_v12 = vpop.f32.mrb[18].mxu0 }
0x2d75   :  { %v9393_v17 = vadd.f32 %v10734_v13, %v3834_v12  ;;  %v8397_v19 = vpop.f32.mrb[19].mxu0 }
0x2d76   :  { %v10858_v19 = vld [vmem:[#allocation3 + $0xc] sm:$0x3] }
0x2d77   :  { %9657 = vtanh.f32 %v9393_v17  ;;  %v7470_v51 = vmul.f32 -1.442695, %v9393_v17 }
0x2d79   :  { %9659 = vpow2.f32 %v7470_v51 }
0x2d81   :  { %v9658_v20 = vpop.eup %9657 }
0x2d82   :  { %3848 = vrot.lane.b32.xlu1 %v9658_v20, %s9963_s1  ;;  %v10868_v20 = vld [vmem:[#allocation2 + $0xc] sm:$0x3] }
0x2d83   :  { %v9660_v54 = vpop.eup %9659 }
0x2d84   :  { %v3842_v22 = vadd.f32 1.0, %v9660_v54 }
0x2d86   :  { %9661 = vrcp.f32 %v3842_v22 }
0x2d90   :  { %v9662_v25 = vpop.eup %9661 }
0x2d91   :  { %v3846_v27 = vmul.f32 %v9662_v25, %v3613_v7 }
0x2df4   :  { %v3849_v26 = vpop.permute.xlu1 %3848 }
0x2df5   :  { %v3851_v16 = vmul.f32 %v9662_v25, %v3849_v26 }
0x2df7   :  { %3853 = vrot.lane.b32.xlu0 %v3851_v16, %s9954_s6 }
0x2e69   :  { %v3854_v28 = vpop.permute.xlu0 %3853 }
0x2e6a   :  { %v3856_v29 = vadd.f32 %v3854_v28, %v3846_v27 }
0x2e6c   :  { %9663 = vtanh.f32 %v3856_v29  ;;  %v3864_v58 = vsel %vm713_vm8, %v3856_v29, %v3613_v7 }
0x2e76   :  { %v9664_v32 = vpop.eup %9663 }
0x2e77   :  { %3859 = vrot.lane.b32.xlu1 %v9664_v32, %s9963_s1 }
0x2ee9   :  { %v3860_v33 = vpop.permute.xlu1 %3859 }
0x2eea   :  { %v3862_v37 = vmul.f32 %v9662_v25, %v3860_v33 }
0x2eec   :  { %v3863_v42 = vsel %vm713_vm8, %v3862_v37, %v3612_v4 }
0x2eed   :  { %4015 = vrot.lane.b32.xlu0 %v3863_v42, %s9954_s6 }
0x2f5f   :  { %v4016_v38 = vpop.permute.xlu0 %4015 }
0x2f60   :  { %8429 = vmatmul.mubr.msk.f32.vlgmr.msra.gmra.mrb[18].mxu1 %vm164_vm1, %v4016_v38 }
0x2f61   :  { %9155 = vmatpush3.bf16.msra.mxu1 %v10622_v21  ;;  %8472 = vmatprep.mubr.msk.f32.mxu1 %vm9960_vm0, %v9961_v1 }
0x2f62   :  { %9156 = vmatprep.subr.bf16.mxu1 %v9959_v0 }
0x2f65   :  { %9158 = vmatpush3.bf16.msra.mxu1 %v10632_v5 }
0x2f66   :  { %9159 = vmatprep.subr.bf16.mxu1 %v9959_v0 }
0x2f68   :  { %8473 = vmatmul.mubr.msk.f32.vlgmr.msra.gmra.mrb[20].mxu1 %vm164_vm1, %v10822_v41 }
0x2f69   :  { %9161 = vmatpush3.bf16.msra.mxu1 %v10652_v30  ;;  %8483 = vmatprep.mubr.msk.f32.mxu1 %vm9960_vm0, %v9961_v1 }
0x2f6a   :  { %9162 = vmatprep.subr.bf16.mxu1 %v9959_v0 }
0x2f6d   :  { %9164 = vmatpush3.bf16.msra.mxu1 %v10663_v35 }
0x2f6e   :  { %9165 = vmatprep.subr.bf16.mxu1 %v9959_v0 }
0x2f70   :  { %8484 = vmatmul.mubr.msk.f32.vlgmr.msra.gmra.mrb[20].mxu1 %vm164_vm1, %v10832_v47 }
0x2f71   :  { %9167 = vmatpush3.bf16.msra.mxu1 %v10687_v63  ;;  %8494 = vmatprep.mubr.msk.f32.mxu1 %vm9960_vm0, %v9961_v1 }
0x2f72   :  { %9168 = vmatprep.subr.bf16.mxu1 %v9959_v0 }
0x2f75   :  { %9170 = vmatpush3.bf16.msra.mxu1 %v10691_v18 }
0x2f76   :  { %9189 = vmatprep.subr.bf16.mxu1 %v9959_v0 }
0x3033   :  { %v4085_v44 = vpop.f32.mrb[18].mxu1 }
0x3034   :  { %v9394_v45 = vadd.f32 %v10734_v13, %v4085_v44  ;;  %v8430_v48 = vpop.f32.mrb[19].mxu1  ;;  %v9777_v44 = vld [vmem:[%s11398_s4] ss:$0 sm:$0xff] }
0x3036   :  { %9665 = vtanh.f32 %v9394_v45  ;;  %v7474_v60 = vmul.f32 -1.442695, %v9394_v45  ;;  %v9382_v45 = vadd.f32 %v9777_v44, %v10478_v43 }
0x3038   :  { %9667 = vpow2.f32 %v7474_v60 }
0x3040   :  { %v9666_v49 = vpop.eup %9665 }
0x3041   :  { %4099 = vrot.lane.b32.xlu1 %v9666_v49, %s9963_s1 }
0x3042   :  { %v9668_v50 = vpop.eup %9667 }
0x3043   :  { %v4093_v52 = vadd.f32 1.0, %v9668_v50 }
0x3045   :  { %9669 = vrcp.f32 %v4093_v52  ;;  %v7434_v52 = vmul.f32 -1.442695, %v9382_v45 }
0x304f   :  { %v9670_v53 = vpop.eup %9669 }
0x3050   :  { %v4097_v61 = vmul.f32 %v9670_v53, %v3864_v58 }
0x30b3   :  { %v4100_v55 = vpop.permute.xlu1 %4099 }
0x30b4   :  { %v4102_v57 = vmul.f32 %v9670_v53, %v4100_v55 }
0x30b6   :  { %4104 = vrot.lane.b32.xlu0 %v4102_v57, %s9954_s6 }
0x3128   :  { %v4105_v62 = vpop.permute.xlu0 %4104 }
0x3129   :  { %v4107_v2 = vadd.f32 %v4105_v62, %v4097_v61  ;;  %v10909_v62 = vld [vmem:[#allocation3 + $0xe] sm:$0x3] }
0x312b   :  { %9671 = vtanh.f32 %v4107_v2  ;;  %v10883_v32 = vsel %vm899_vm10, %v4107_v2, %v3864_v58 }
0x3135   :  { %v9672_v3 = vpop.eup %9671 }
0x3136   :  { %4110 = vrot.lane.b32.xlu1 %v9672_v3, %s9963_s1 }
0x31a8   :  { %v4111_v4 = vpop.permute.xlu1 %4110 }
0x31a9   :  { %v4113_v6 = vmul.f32 %v9670_v53, %v4111_v4 }
0x31ab   :  { %v4114_v12 = vsel %vm899_vm10, %v4113_v6, %v3863_v42 }
0x31ac   :  { %4266 = vrot.lane.b32.xlu0 %v4114_v12, %s9954_s6 }
0x321e   :  { %v4267_v17 = vpop.permute.xlu0 %4266 }
0x321f   :  { %8462 = vmatmul.mubr.msk.f32.vlgmr.msra.gmra.mrb[20].mxu0 %vm164_vm1, %v4267_v17 }
0x3220   :  { %9173 = vmatpush3.bf16.msra.mxu0 %v10622_v21  ;;  %8505 = vmatprep.mubr.msk.f32.mxu0 %vm9960_vm0, %v9961_v1 }
0x3221   :  { %9174 = vmatprep.subr.bf16.mxu0 %v9959_v0 }
0x3224   :  { %9176 = vmatpush3.bf16.msra.mxu0 %v10632_v5 }
0x3225   :  { %9177 = vmatprep.subr.bf16.mxu0 %v9959_v0 }
0x3227   :  { %8506 = vmatmul.mubr.msk.f32.vlgmr.msra.gmra.mrb[22].mxu0 %vm164_vm1, %v10858_v19 }
0x3228   :  { %9179 = vmatpush3.bf16.msra.mxu0 %v10652_v30  ;;  %8516 = vmatprep.mubr.msk.f32.mxu0 %vm9960_vm0, %v9961_v1 }
0x3229   :  { %9180 = vmatprep.subr.bf16.mxu0 %v9959_v0 }
0x322c   :  { %9182 = vmatpush3.bf16.msra.mxu0 %v10663_v35 }
0x322d   :  { %9183 = vmatprep.subr.bf16.mxu0 %v9959_v0 }
0x322f   :  { %8517 = vmatmul.mubr.msk.f32.vlgmr.msra.gmra.mrb[22].mxu0 %vm164_vm1, %v10868_v20 }
0x3230   :  { %9185 = vmatpush3.bf16.msra.mxu0 %v10687_v63  ;;  %8527 = vmatprep.mubr.msk.f32.mxu0 %vm9960_vm0, %v9961_v1 }
0x3231   :  { %9186 = vmatprep.subr.bf16.mxu0 %v9959_v0 }
0x3234   :  { %9188 = vmatpush3.bf16.msra.mxu0 %v10691_v18 }
0x3235   :  { %9207 = vmatprep.subr.bf16.mxu0 %v9959_v0 }
0x32f2   :  { %v4336_v51 = vpop.f32.mrb[20].mxu0 }
0x32f3   :  { %v9395_v54 = vadd.f32 %v10734_v13, %v4336_v51  ;;  %v8463_v22 = vpop.f32.mrb[21].mxu0 }
0x32f5   :  { %9673 = vtanh.f32 %v9395_v54  ;;  %v7478_v26 = vmul.f32 -1.442695, %v9395_v54 }
0x32f7   :  { %9675 = vpow2.f32 %v7478_v26 }
0x32ff   :  { %v9674_v25 = vpop.eup %9673 }
0x3300   :  { %4350 = vrot.lane.b32.xlu1 %v9674_v25, %s9963_s1 }
0x3301   :  { %v9676_v16 = vpop.eup %9675 }
0x3302   :  { %v4344_v7 = vadd.f32 1.0, %v9676_v16 }
0x3304   :  { %9677 = vrcp.f32 %v4344_v7 }
0x330e   :  { %v9678_v27 = vpop.eup %9677 }
0x330f   :  { %v4348_v33 = vmul.f32 %v9678_v27, %v10883_v32 }
0x3372   :  { %v4351_v28 = vpop.permute.xlu1 %4350 }
0x3373   :  { %v4353_v29 = vmul.f32 %v9678_v27, %v4351_v28 }
0x3375   :  { %4355 = vrot.lane.b32.xlu0 %v4353_v29, %s9954_s6 }
0x33e7   :  { %v4356_v37 = vpop.permute.xlu0 %4355 }
0x33e8   :  { %v10886_v42 = vadd.f32 %v4356_v37, %v4348_v33 }
0x33ea   :  { %9679 = vtanh.f32 %v10886_v42 }
0x33eb   :  { %9681 = vtanh.f32 %v9382_v45  ;;  %v3097_v45 = vld [vmem:[%s11405_s11 + $0x30] sm:$0xff] }
0x33ec   :  { %9683 = vpow2.f32 %v7434_v52  ;;  %v3092_v52 = vld [vmem:[%s11405_s11 + $0x8] sm:$0xff] }
0x33f4   :  { %v9680_v38 = vpop.eup %9679 }
0x33f5   :  { %4361 = vrot.lane.b32.xlu1 %v9680_v38, %s9963_s1  ;;  %v9682_v50 = vpop.eup %9681 }
0x33f6   :  { %v9684_v53 = vpop.eup %9683 }
0x33f7   :  { %v1617_v55 = vadd.f32 1.0, %v9684_v53 }
0x33f9   :  { %9685 = vrcp.f32 %v1617_v55  ;;  %v3093_v55 = vld [vmem:[%s11405_s11 + $0x10] sm:$0xff] }
0x3403   :  { %v9686_v43 = vpop.eup %9685 }
0x3467   :  { %v4362_v48 = vpop.permute.xlu1 %4361 }
0x3468   :  { %v4364_v49 = vmul.f32 %v9678_v27, %v4362_v48  ;;  %v3098_v48 = vld [vmem:[%s11405_s11 + $0x38] sm:$0xff] }
0x346a   :  { %v10896_v60 = vsel %vm1085_vm12, %v4364_v49, %v4114_v12 }
0x346b   :  { %4517 = vrot.lane.b32.xlu0 %v10896_v60, %s9954_s6 }
0x346f   :  { %1623 = vrot.lane.b32.xlu0 %v9682_v50, %s9963_s1  ;;  %v3091_v50 = vld [vmem:[%s11405_s11] sm:$0xff] }
0x3470   :  { %v10988_v53 = vpack.c.bf16 %v3092_v52, %v3091_v50 }
0x34dd   :  { %v4518_v57 = vpop.permute.xlu0 %4517 }
0x34de   :  { %8495 = vmatmul.mubr.msk.f32.vlgmr.msra.gmra.mrb[20].mxu1 %vm164_vm1, %v4518_v57  ;;  %v3094_v57 = vld [vmem:[%s11405_s11 + $0x18] sm:$0xff] }
0x34df   :  { %9191 = vmatpush3.bf16.msra.mxu1 %v10622_v21  ;;  %8538 = vmatprep.mubr.msk.f32.mxu1 %vm9960_vm0, %v9961_v1  ;;  %v1459_v21 = vsel %vm1457_vm5, %v10424_v15, %v10421_v24 }
0x34e0   :  { %9192 = vmatprep.subr.bf16.mxu1 %v9959_v0 }
0x34e1   :  { %v1624_v58 = vpop.permute.xlu0 %1623 }
0x34e2   :  { %v1626_v61 = vmul.f32 %v9686_v43, %v1624_v58  ;;  %v5119_v58 = vld [vmem:[#allocation13] sm:$0xff] }
0x34e3   :  { %9194 = vmatpush3.bf16.msra.mxu1 %v10632_v5  ;;  %v1621_v5 = vmul.f32 %v9686_v43, %v1459_v21 }
0x34e4   :  { %1628 = vrot.lane.b32.xlu0 %v1626_v61, %s9954_s6  ;;  %9195 = vmatprep.subr.bf16.mxu1 %v9959_v0  ;;  %v5120_v61 = vld [vmem:[#allocation13 + $0x8] sm:$0xff] }
0x34e5   :  { %v11006_v21 = vpack.c.bf16 %v5120_v61, %v5119_v58 }
0x34e6   :  { %8539 = vmatmul.mubr.msk.f32.vlgmr.msra.gmra.mrb[22].mxu1 %vm164_vm1, %v10909_v62 }
0x34e7   :  { %9197 = vmatpush3.bf16.msra.mxu1 %v10652_v30  ;;  %8549 = vmatprep.mubr.msk.f32.mxu1 %vm9960_vm0, %v9961_v1 }
0x34e8   :  { %9198 = vmatprep.subr.bf16.mxu1 %v9959_v0 }
0x34eb   :  { %9200 = vmatpush3.bf16.msra.mxu1 %v10663_v35 }
0x34ec   :  { %9201 = vmatprep.subr.bf16.mxu1 %v9959_v0 }
0x3556   :  { %v1629_v2 = vpop.permute.xlu0 %1628 }
0x3557   :  { %v1631_v3 = vadd.f32 %v1629_v2, %v1621_v5  ;;  %v5121_v5 = vld [vmem:[#allocation13 + $0x10] sm:$0xff]  ;;  %v5122_v2 = vld [vmem:[#allocation13 + $0x18] sm:$0xff] }
0x3559   :  { %9687 = vtanh.f32 %v1631_v3 }
0x3563   :  { %v9688_v4 = vpop.eup %9687 }
0x3564   :  { %1634 = vrot.lane.b32.xlu0 %v9688_v4, %s9963_s1 }
0x35b1   :  { %v4587_v30 = vpop.f32.mrb[20].mxu1 }
0x35b2   :  { %v9396_v6 = vadd.f32 %v10734_v13, %v4587_v30  ;;  %v8496_v12 = vpop.f32.mrb[21].mxu1 }
0x35b4   :  { %9689 = vtanh.f32 %v9396_v6  ;;  %v7482_v15 = vmul.f32 -1.442695, %v9396_v6 }
0x35b6   :  { %9691 = vpow2.f32 %v7482_v15 }
0x35be   :  { %v9690_v35 = vpop.eup %9689 }
0x35bf   :  { %4601 = vrot.lane.b32.xlu1 %v9690_v35, %s9963_s1 }
0x35c0   :  { %v9692_v54 = vpop.eup %9691 }
0x35c1   :  { %v4595_v22 = vadd.f32 1.0, %v9692_v54 }
0x35c3   :  { %9693 = vrcp.f32 %v4595_v22 }
0x35cd   :  { %v9694_v25 = vpop.eup %9693 }
0x35d6   :  { %v1635_v17 = vpop.permute.xlu0 %1634 }
0x35d7   :  { %v1637_v51 = vmul.f32 %v9686_v43, %v1635_v17  ;;  %v11000_v43 = vpack.c.bf16 %v3094_v57, %v3093_v55 }
0x35d9   :  { %v10929_v24 = vsel %vm1643_vm7, %v1637_v51, %v10445_v11  ;;  %v10946_v11 = vsel %vm1085_vm12, %v10886_v42, %v10883_v32  ;;  %v3095_v32 = vld [vmem:[%s11405_s11 + $0x20] sm:$0xff]  ;;  %v3096_v42 = vld [vmem:[%s11405_s11 + $0x28] sm:$0xff] }
0x35da   :  { %1646 = vrot.lane.b32.xlu0 %v10929_v24, %s9954_s6  ;;  %v4599_v28 = vmul.f32 %v9694_v25, %v10946_v11  ;;  %v10966_v44 = vpack.c.bf16 %v3096_v42, %v3095_v32 }
0x3631   :  { %v4602_v26 = vpop.permute.xlu1 %4601 }
0x3632   :  { %v4604_v16 = vmul.f32 %v9694_v25, %v4602_v26 }
0x3634   :  { %4606 = vrot.lane.b32.xlu1 %v4604_v16, %s9954_s6 }
0x364c   :  { %v1647_v7 = vpop.permute.xlu0 %1646 }
0x364d   :  { %1650 = vst.msk [vmem:[#allocation2 + $0xe] sm:$0x3] %vm348_vm4, %v1647_v7 }
0x3654   :  { %v4869_v27 = vld [vmem:[#allocation2 + $0xe] sm:$0x3] }
0x3655   :  { %8550 = vmatmul.mubr.msk.f32.vlgmr.msra.gmra.mrb[22].mxu1 %vm164_vm1, %v4869_v27 }
0x3656   :  { %9203 = vmatpush3.bf16.msra.mxu1 %v10687_v63  ;;  %8560 = vmatprep.mubr.msk.f32.mxu1 %vm9960_vm0, %v9961_v1 }
0x3657   :  { %9204 = vmatprep.subr.bf16.mxu1 %v9959_v0 }
0x365a   :  { %9206 = vmatpush3.bf16.msra.mxu1 %v10691_v18 }
0x365b   :  { %9225 = vmatprep.subr.bf16.mxu1 %v9959_v0 }
0x36a6   :  { %v4607_v29 = vpop.permute.xlu1 %4606 }
0x36a7   :  { %v10949_v33 = vadd.f32 %v4607_v29, %v4599_v28 }
0x36a9   :  { %9695 = vtanh.f32 %v10949_v33 }
0x36b3   :  { %v9696_v63 = vpop.eup %9695 }
0x36b4   :  { %4612 = vrot.lane.b32.xlu1 %v9696_v63, %s9963_s1  ;;  %v11056_v63 = vsel %vm1271_vm14, %v10949_v33, %v10946_v11 }
0x3726   :  { %v4613_v37 = vpop.permute.xlu1 %4612 }
0x3727   :  { %v4615_v18 = vmul.f32 %v9694_v25, %v4613_v37 }
0x3729   :  { %v10956_v38 = vsel %vm1271_vm14, %v4615_v18, %v10896_v60  ;;  %v10976_v60 = vpack.c.bf16 %v3098_v48, %v3097_v45 }
0x372a   :  { %4768 = vrot.lane.b32.xlu1 %v10956_v38, %s9954_s6 }
0x379c   :  { %v4769_v49 = vpop.permute.xlu1 %4768 }
0x379d   :  { %8528 = vmatmul.mubr.msk.f32.vlgmr.msra.gmra.mrb[22].mxu0 %vm164_vm1, %v4769_v49 }
0x379e   :  { %9209 = vmatpush3.bf16.msra.mxu0 %v10966_v44  ;;  %8571 = vmatprep.mubr.msk.f32.mxu0 %vm9960_vm0, %v9961_v1 }
0x379f   :  { %9210 = vmatprep.subr.bf16.mxu0 %v9959_v0 }
0x37a2   :  { %9212 = vmatpush3.bf16.msra.mxu0 %v10976_v60 }
0x37a3   :  { %9213 = vmatprep.subr.bf16.mxu0 %v9959_v0 }
0x37a5   :  { %8572 = vmatmul.mubr.msk.f32.vlgmr.msra.gmra.mrb[24].mxu0 %vm164_vm1, %v10909_v62  ;;  %v11011_v62 = vpack.c.bf16 %v5122_v2, %v5121_v5 }
0x37a6   :  { %9215 = vmatpush3.bf16.msra.mxu0 %v10988_v53  ;;  %8582 = vmatprep.mubr.msk.f32.mxu0 %vm9960_vm0, %v9961_v1 }
0x37a7   :  { %9216 = vmatprep.subr.bf16.mxu0 %v9959_v0 }
0x37aa   :  { %9218 = vmatpush3.bf16.msra.mxu0 %v11000_v43 }
0x37ab   :  { %9219 = vmatprep.subr.bf16.mxu0 %v9959_v0 }
0x37ad   :  { %8583 = vmatmul.mubr.msk.f32.vlgmr.msra.gmra.mrb[24].mxu0 %vm164_vm1, %v4869_v27 }
0x37ae   :  { %9221 = vmatpush3.bf16.msra.mxu0 %v11006_v21  ;;  %8593 = vmatprep.mubr.msk.f32.mxu0 %vm9960_vm0, %v9961_v1 }
0x37af   :  { %9222 = vmatprep.subr.bf16.mxu0 %v9959_v0 }
0x37b2   :  { %9224 = vmatpush3.bf16.msra.mxu0 %v11011_v62 }
0x37b3   :  { %9243 = vmatprep.subr.bf16.mxu0 %v9959_v0 }
0x37b5   :  { %8594 = vmatmul.mubr.f32.vlgmr.msra.gmra.mrb[24].mxu0 %v9961_v1 }
0x37b6   :  { %9245 = vmatpush3.bf16.msra.mxu0 %v10966_v44  ;;  %8637 = vmatprep.mubr.msk.f32.mxu0 %vm9960_vm0, %v9961_v1 }
0x37b7   :  { %9246 = vmatprep.subr.bf16.mxu0 %v9959_v0 }
0x37ba   :  { %9248 = vmatpush3.bf16.msra.mxu0 %v10976_v60 }
0x37bb   :  { %9249 = vmatprep.subr.bf16.mxu0 %v9959_v0 }
0x37bd   :  { %8638 = vmatmul.mubr.msk.f32.vlgmr.msra.gmra.mrb[26].mxu0 %vm164_vm1, %v10822_v41 }
0x37be   :  { %9251 = vmatpush3.bf16.msra.mxu0 %v10988_v53  ;;  %8648 = vmatprep.mubr.msk.f32.mxu0 %vm9960_vm0, %v9961_v1 }
0x37bf   :  { %9252 = vmatprep.subr.bf16.mxu0 %v9959_v0 }
0x37c2   :  { %9254 = vmatpush3.bf16.msra.mxu0 %v11000_v43 }
0x37c3   :  { %9255 = vmatprep.subr.bf16.mxu0 %v9959_v0 }
0x37c5   :  { %8649 = vmatmul.mubr.msk.f32.vlgmr.msra.gmra.mrb[26].mxu0 %vm164_vm1, %v10832_v47  ;;  %v11046_v47 = vld [vmem:[%s11407_s13] ss:$0 sm:$0xff] }
0x37c6   :  { %9257 = vmatpush3.bf16.msra.mxu0 %v11006_v21  ;;  %8659 = vmatprep.mubr.msk.f32.mxu0 %vm9960_vm0, %v9961_v1 }
0x37c7   :  { %9258 = vmatprep.subr.bf16.mxu0 %v9959_v0 }
0x37ca   :  { %9260 = vmatpush3.bf16.msra.mxu0 %v11011_v62 }
0x37cb   :  { %9279 = vmatprep.subr.bf16.mxu0 %v9959_v0 }
0x3870   :  { %v4838_v41 = vpop.f32.mrb[22].mxu0 }
0x3871   :  { %v9397_v3 = vadd.f32 %v10734_v13, %v4838_v41  ;;  %v8529_v4 = vpop.f32.mrb[23].mxu0 }
0x3873   :  { %9697 = vtanh.f32 %v9397_v3  ;;  %v7486_v51 = vmul.f32 -1.442695, %v9397_v3 }
0x387d   :  { %v9698_v30 = vpop.eup %9697 }
0x387e   :  { %4852 = vrot.lane.b32.xlu1 %v9698_v30, %s9963_s1 }
0x3888   :  { %v5330_v6 = vpop.f32.mrb[24].mxu0 }
0x3889   :  { %v9399_v12 = vadd.f32 %v11046_v47, %v5330_v6  ;;  %v8595_v35 = vpop.f32.mrb[25].mxu0 }
0x388b   :  { %9699 = vtanh.f32 %v9399_v12  ;;  %v7493_v54 = vmul.f32 -1.442695, %v9399_v12 }
0x388c   :  { %9701 = vpow2.f32 %v7486_v51 }
0x3895   :  { %v9700_v17 = vpop.eup %9699 }
0x3896   :  { %5344 = vrot.lane.b32.xlu0 %v9700_v17, %s9963_s1  ;;  %v9702_v13 = vpop.eup %9701 }
0x3897   :  { %v4846_v15 = vadd.f32 1.0, %v9702_v13 }
0x3899   :  { %9703 = vrcp.f32 %v4846_v15 }
0x389a   :  { %9705 = vpow2.f32 %v7493_v54 }
0x38a3   :  { %v9704_v22 = vpop.eup %9703 }
0x38a4   :  { %v9706_v16 = vpop.eup %9705  ;;  %v4850_v37 = vmul.f32 %v9704_v22, %v11056_v63 }
0x38a5   :  { %v5338_v7 = vadd.f32 1.0, %v9706_v16 }
0x38a7   :  { %9707 = vrcp.f32 %v5338_v7 }
0x38b1   :  { %v9708_v27 = vpop.eup %9707 }
0x38b2   :  { %v5342_v45 = vmul.f32 0.0, %v9708_v27 }
0x38f0   :  { %v4853_v25 = vpop.permute.xlu1 %4852 }
0x38f1   :  { %v4855_v26 = vmul.f32 %v9704_v22, %v4853_v25 }
0x38f3   :  { %4857 = vrot.lane.b32.xlu1 %v4855_v26, %s9954_s6 }
0x3908   :  { %v5345_v28 = vpop.permute.xlu0 %5344 }
0x3909   :  { %v5347_v29 = vmul.f32 %v9708_v27, %v5345_v28 }
0x390b   :  { %5349 = vrot.lane.b32.xlu0 %v5347_v29, %s9954_s6 }
0x3965   :  { %v4858_v18 = vpop.permute.xlu1 %4857 }
0x3966   :  { %v11059_v32 = vadd.f32 %v4858_v18, %v4850_v37 }
0x3968   :  { %9709 = vtanh.f32 %v11059_v32 }
0x3972   :  { %v9710_v42 = vpop.eup %9709 }
0x3973   :  { %4863 = vrot.lane.b32.xlu1 %v9710_v42, %s9963_s1 }
0x397d   :  { %v5350_v48 = vpop.permute.xlu0 %5349 }
0x397e   :  { %v11063_v49 = vadd.f32 %v5350_v48, %v5342_v45 }
0x3980   :  { %9711 = vtanh.f32 %v11063_v49  ;;  %v5360_v35 = vsel %vm1643_vm7, %v11063_v49, 0.0 }
0x398a   :  { %v9712_v50 = vpop.eup %9711 }
0x398b   :  { %5355 = vrot.lane.b32.xlu0 %v9712_v50, %s9963_s1 }
0x39e5   :  { %v4864_v11 = vpop.permute.xlu1 %4863 }
0x39e6   :  { %v4866_v33 = vmul.f32 %v9704_v22, %v4864_v11 }
0x39e8   :  { %v11070_v52 = vsel %vm1457_vm5, %v4866_v33, %v10956_v38 }
0x39e9   :  { %5019 = vrot.lane.b32.xlu1 %v11070_v52, %s9954_s6 }
0x39fd   :  { %v5356_v55 = vpop.permute.xlu0 %5355 }
0x39fe   :  { %v5358_v57 = vmul.f32 %v9708_v27, %v5356_v55 }
0x3a00   :  { %v11076_v58 = vsel %vm1643_vm7, %v5358_v57, 0.0 }
0x3a01   :  { %5503 = vrot.lane.b32.xlu0 %v11076_v58, %s9954_s6 }
0x3a5b   :  { %v5020_v61 = vpop.permute.xlu1 %5019 }
0x3a5c   :  { %8561 = vmatmul.mubr.msk.f32.vlgmr.msra.gmra.mrb[22].mxu1 %vm164_vm1, %v5020_v61  ;;  %v9778_v61 = vld [vmem:[#allocation3 + $0x4] sm:$0x3] }
0x3a5d   :  { %9227 = vmatpush3.bf16.msra.mxu1 %v10966_v44  ;;  %8604 = vmatprep.mubr.msk.f32.mxu1 %vm9960_vm0, %v9961_v1 }
0x3a5e   :  { %9228 = vmatprep.subr.bf16.mxu1 %v9959_v0 }
0x3a61   :  { %9230 = vmatpush3.bf16.msra.mxu1 %v10976_v60 }
0x3a62   :  { %9231 = vmatprep.subr.bf16.mxu1 %v9959_v0 }
0x3a64   :  { %8605 = vmatmul.mubr.msk.f32.vlgmr.msra.gmra.mrb[24].mxu1 %vm164_vm1, %v10858_v19 }
0x3a65   :  { %9233 = vmatpush3.bf16.msra.mxu1 %v10988_v53  ;;  %8615 = vmatprep.mubr.msk.f32.mxu1 %vm9960_vm0, %v9961_v1 }
0x3a66   :  { %9234 = vmatprep.subr.bf16.mxu1 %v9959_v0 }
0x3a69   :  { %9236 = vmatpush3.bf16.msra.mxu1 %v11000_v43 }
0x3a6a   :  { %9237 = vmatprep.subr.bf16.mxu1 %v9959_v0 }
0x3a6c   :  { %8616 = vmatmul.mubr.msk.f32.vlgmr.msra.gmra.mrb[24].mxu1 %vm164_vm1, %v10868_v20 }
0x3a6d   :  { %9239 = vmatpush3.bf16.msra.mxu1 %v11006_v21  ;;  %8626 = vmatprep.mubr.msk.f32.mxu1 %vm9960_vm0, %v9961_v1 }
0x3a6e   :  { %9240 = vmatprep.subr.bf16.mxu1 %v9959_v0 }
0x3a71   :  { %9242 = vmatpush3.bf16.msra.mxu1 %v11011_v62 }
0x3a72   :  { %9261 = vmatprep.subr.bf16.mxu1 %v9959_v0 }
0x3a73   :  { %v5504_v19 = vpop.permute.xlu0 %5503 }
0x3a74   :  { %8627 = vmatmul.mubr.msk.f32.vlgmr.msra.gmra.mrb[24].mxu1 %vm164_vm1, %v5504_v19  ;;  %v9779_v19 = vld [vmem:[#allocation2 + $0x4] sm:$0x3] }
0x3a75   :  { %9263 = vmatpush3.bf16.msra.mxu1 %v10966_v44  ;;  %8670 = vmatprep.mubr.msk.f32.mxu1 %vm9960_vm0, %v9961_v1 }
0x3a76   :  { %9264 = vmatprep.subr.bf16.mxu1 %v9959_v0 }
0x3a79   :  { %9266 = vmatpush3.bf16.msra.mxu1 %v10976_v60 }
0x3a7a   :  { %9267 = vmatprep.subr.bf16.mxu1 %v9959_v0 }
0x3a7c   :  { %8671 = vmatmul.mubr.msk.f32.vlgmr.msra.gmra.mrb[26].mxu1 %vm164_vm1, %v10786_v8 }
0x3a7d   :  { %9269 = vmatpush3.bf16.msra.mxu1 %v10988_v53  ;;  %8681 = vmatprep.mubr.msk.f32.mxu1 %vm9960_vm0, %v9961_v1 }
0x3a7e   :  { %9270 = vmatprep.subr.bf16.mxu1 %v9959_v0 }
0x3a81   :  { %9272 = vmatpush3.bf16.msra.mxu1 %v11000_v43 }
0x3a82   :  { %9273 = vmatprep.subr.bf16.mxu1 %v9959_v0 }
0x3a84   :  { %8682 = vmatmul.mubr.msk.f32.vlgmr.msra.gmra.mrb[26].mxu1 %vm164_vm1, %v10796_v10 }
0x3a85   :  { %9275 = vmatpush3.bf16.msra.mxu1 %v11006_v21  ;;  %8692 = vmatprep.mubr.msk.f32.mxu1 %vm9960_vm0, %v9961_v1 }
0x3a86   :  { %9276 = vmatprep.subr.bf16.mxu1 %v9959_v0 }
0x3a89   :  { %9278 = vmatpush3.bf16.msra.mxu1 %v11011_v62 }
0x3a8a   :  { %9297 = vmatprep.subr.bf16.mxu1 %v9959_v0 }
0x3b2f   :  { %v11126_v8 = vpop.f32.mrb[22].mxu1 }
0x3b30   :  { %v8562_v20 = vpop.f32.mrb[23].mxu1 }
0x3b47   :  { %v5573_v38 = vpop.f32.mrb[24].mxu1 }
0x3b48   :  { %v9400_v5 = vadd.f32 %v11046_v47, %v5573_v38  ;;  %v8628_v2 = vpop.f32.mrb[25].mxu1 }
0x3b4a   :  { %9713 = vtanh.f32 %v9400_v5  ;;  %v7497_v41 = vmul.f32 -1.442695, %v9400_v5 }
0x3b4c   :  { %9715 = vpow2.f32 %v7497_v41 }
0x3b54   :  { %v9714_v10 = vpop.eup %9713 }
0x3b55   :  { %5587 = vrot.lane.b32.xlu1 %v9714_v10, %s9963_s1 }
0x3b56   :  { %v9716_v3 = vpop.eup %9715 }
0x3b57   :  { %v5581_v4 = vadd.f32 1.0, %v9716_v3 }
0x3b59   :  { %9717 = vrcp.f32 %v5581_v4 }
0x3b63   :  { %v9718_v30 = vpop.eup %9717 }
0x3b64   :  { %v5585_v17 = vmul.f32 %v9718_v30, %v5360_v35 }
0x3bc7   :  { %v5588_v6 = vpop.permute.xlu1 %5587 }
0x3bc8   :  { %v5590_v12 = vmul.f32 %v9718_v30, %v5588_v6 }
0x3bca   :  { %5592 = vrot.lane.b32.xlu0 %v5590_v12, %s9954_s6 }
0x3c3c   :  { %v5593_v51 = vpop.permute.xlu0 %5592 }
0x3c3d   :  { %v5595_v13 = vadd.f32 %v5593_v51, %v5585_v17 }
0x3c3f   :  { %9719 = vtanh.f32 %v5595_v13  ;;  %v5603_v45 = vsel %vm1457_vm5, %v5595_v13, %v5360_v35 }
0x3c49   :  { %v9720_v15 = vpop.eup %9719 }
0x3c4a   :  { %5598 = vrot.lane.b32.xlu1 %v9720_v15, %s9963_s1 }
0x3cbc   :  { %v5599_v54 = vpop.permute.xlu1 %5598 }
0x3cbd   :  { %v5601_v22 = vmul.f32 %v9718_v30, %v5599_v54 }
0x3cbf   :  { %v5602_v25 = vsel %vm1457_vm5, %v5601_v22, %v11076_v58 }
0x3cc0   :  { %5746 = vrot.lane.b32.xlu0 %v5602_v25, %s9954_s6 }
0x3d32   :  { %v5747_v26 = vpop.permute.xlu0 %5746 }
0x3d33   :  { %8660 = vmatmul.mubr.msk.f32.vlgmr.msra.gmra.mrb[26].mxu0 %vm164_vm1, %v5747_v26  ;;  %v9781_v26 = vld [vmem:[#allocation2 + $0x2] sm:$0x3] }
0x3d34   :  { %9281 = vmatpush3.bf16.msra.mxu0 %v10966_v44  ;;  %8703 = vmatprep.mubr.msk.f32.mxu0 %vm9960_vm0, %v9961_v1 }
0x3d35   :  { %9282 = vmatprep.subr.bf16.mxu0 %v9959_v0 }
0x3d38   :  { %9284 = vmatpush3.bf16.msra.mxu0 %v10976_v60 }
0x3d39   :  { %9285 = vmatprep.subr.bf16.mxu0 %v9959_v0 }
0x3d3b   :  { %8704 = vmatmul.mubr.msk.f32.vlgmr.msra.gmra.mrb[28].mxu0 %vm164_vm1, %v10750_v40 }
0x3d3c   :  { %9287 = vmatpush3.bf16.msra.mxu0 %v10988_v53  ;;  %8714 = vmatprep.mubr.msk.f32.mxu0 %vm9960_vm0, %v9961_v1 }
0x3d3d   :  { %9288 = vmatprep.subr.bf16.mxu0 %v9959_v0 }
0x3d40   :  { %9290 = vmatpush3.bf16.msra.mxu0 %v11000_v43 }
0x3d41   :  { %9291 = vmatprep.subr.bf16.mxu0 %v9959_v0 }
0x3d43   :  { %8715 = vmatmul.mubr.msk.f32.vlgmr.msra.gmra.mrb[28].mxu0 %vm164_vm1, %v10760_v39 }
0x3d44   :  { %9293 = vmatpush3.bf16.msra.mxu0 %v11006_v21  ;;  %8725 = vmatprep.mubr.msk.f32.mxu0 %vm9960_vm0, %v9961_v1 }
0x3d45   :  { %9294 = vmatprep.subr.bf16.mxu0 %v9959_v0 }
0x3d48   :  { %9296 = vmatpush3.bf16.msra.mxu0 %v11011_v62 }
0x3d49   :  { %9315 = vmatprep.subr.bf16.mxu0 %v9959_v0 }
0x3e06   :  { %v5816_v40 = vpop.f32.mrb[26].mxu0 }
0x3e07   :  { %v9401_v16 = vadd.f32 %v11046_v47, %v5816_v40  ;;  %v8661_v7 = vpop.f32.mrb[27].mxu0 }
0x3e09   :  { %9721 = vtanh.f32 %v9401_v16  ;;  %v7501_v39 = vmul.f32 -1.442695, %v9401_v16 }
0x3e0b   :  { %9723 = vpow2.f32 %v7501_v39 }
0x3e13   :  { %v9722_v27 = vpop.eup %9721 }
0x3e14   :  { %5830 = vrot.lane.b32.xlu1 %v9722_v27, %s9963_s1 }
0x3e15   :  { %v9724_v28 = vpop.eup %9723 }
0x3e16   :  { %v5824_v29 = vadd.f32 1.0, %v9724_v28 }
0x3e18   :  { %9725 = vrcp.f32 %v5824_v29 }
0x3e22   :  { %v9726_v37 = vpop.eup %9725 }
0x3e23   :  { %v5828_v48 = vmul.f32 %v9726_v37, %v5603_v45 }
0x3e86   :  { %v5831_v18 = vpop.permute.xlu1 %5830 }
0x3e87   :  { %v5833_v42 = vmul.f32 %v9726_v37, %v5831_v18 }
0x3e89   :  { %5835 = vrot.lane.b32.xlu0 %v5833_v42, %s9954_s6 }
0x3efb   :  { %v5836_v49 = vpop.permute.xlu0 %5835 }
0x3efc   :  { %v5838_v50 = vadd.f32 %v5836_v49, %v5828_v48 }
0x3efe   :  { %9727 = vtanh.f32 %v5838_v50  ;;  %v5846_v12 = vsel %vm1271_vm14, %v5838_v50, %v5603_v45 }
0x3f08   :  { %v9728_v11 = vpop.eup %9727 }
0x3f09   :  { %5841 = vrot.lane.b32.xlu1 %v9728_v11, %s9963_s1 }
0x3f7b   :  { %v5842_v33 = vpop.permute.xlu1 %5841 }
0x3f7c   :  { %v5844_v55 = vmul.f32 %v9726_v37, %v5842_v33 }
0x3f7e   :  { %v5845_v57 = vsel %vm1271_vm14, %v5844_v55, %v5602_v25 }
0x3f7f   :  { %5989 = vrot.lane.b32.xlu0 %v5845_v57, %s9954_s6 }
0x3ff1   :  { %v5990_v58 = vpop.permute.xlu0 %5989 }
0x3ff2   :  { %8693 = vmatmul.mubr.msk.f32.vlgmr.msra.gmra.mrb[26].mxu1 %vm164_vm1, %v5990_v58 }
0x3ff3   :  { %9299 = vmatpush3.bf16.msra.mxu1 %v10966_v44  ;;  %8736 = vmatprep.mubr.msk.f32.mxu1 %vm9960_vm0, %v9961_v1 }
0x3ff4   :  { %9300 = vmatprep.subr.bf16.mxu1 %v9959_v0 }
0x3ff7   :  { %9302 = vmatpush3.bf16.msra.mxu1 %v10976_v60 }
0x3ff8   :  { %9303 = vmatprep.subr.bf16.mxu1 %v9959_v0 }
0x3ffa   :  { %8737 = vmatmul.mubr.msk.f32.vlgmr.msra.gmra.mrb[28].mxu1 %vm164_vm1, %v9778_v61 }
0x3ffb   :  { %9305 = vmatpush3.bf16.msra.mxu1 %v10988_v53  ;;  %8747 = vmatprep.mubr.msk.f32.mxu1 %vm9960_vm0, %v9961_v1 }
0x3ffc   :  { %9306 = vmatprep.subr.bf16.mxu1 %v9959_v0 }
0x3fff   :  { %9308 = vmatpush3.bf16.msra.mxu1 %v11000_v43 }
0x4000   :  { %9309 = vmatprep.subr.bf16.mxu1 %v9959_v0 }
0x4002   :  { %8748 = vmatmul.mubr.msk.f32.vlgmr.msra.gmra.mrb[28].mxu1 %vm164_vm1, %v9779_v19 }
0x4003   :  { %9311 = vmatpush3.bf16.msra.mxu1 %v11006_v21  ;;  %8758 = vmatprep.mubr.msk.f32.mxu1 %vm9960_vm0, %v9961_v1 }
0x4004   :  { %9312 = vmatprep.subr.bf16.mxu1 %v9959_v0 }
0x4007   :  { %9314 = vmatpush3.bf16.msra.mxu1 %v11011_v62 }
0x4008   :  { %9333 = vmatprep.subr.bf16.mxu1 %v9959_v0 }
0x40c5   :  { %v6059_v20 = vpop.f32.mrb[26].mxu1 }
0x40c6   :  { %v9402_v38 = vadd.f32 %v11046_v47, %v6059_v20  ;;  %v8694_v5 = vpop.f32.mrb[27].mxu1 }
0x40c8   :  { %9729 = vtanh.f32 %v9402_v38  ;;  %v7505_v10 = vmul.f32 -1.442695, %v9402_v38 }
0x40ca   :  { %9731 = vpow2.f32 %v7505_v10 }
0x40d2   :  { %v9730_v2 = vpop.eup %9729 }
0x40d3   :  { %6073 = vrot.lane.b32.xlu1 %v9730_v2, %s9963_s1 }
0x40d4   :  { %v9732_v41 = vpop.eup %9731 }
0x40d5   :  { %v6067_v3 = vadd.f32 1.0, %v9732_v41 }
0x40d7   :  { %9733 = vrcp.f32 %v6067_v3 }
0x40e1   :  { %v9734_v4 = vpop.eup %9733 }
0x40e2   :  { %v6071_v35 = vmul.f32 %v9734_v4, %v5846_v12 }
0x4145   :  { %v6074_v30 = vpop.permute.xlu1 %6073 }
0x4146   :  { %v6076_v6 = vmul.f32 %v9734_v4, %v6074_v30 }
0x4148   :  { %6078 = vrot.lane.b32.xlu0 %v6076_v6, %s9954_s6 }
0x41ba   :  { %v6079_v17 = vpop.permute.xlu0 %6078 }
0x41bb   :  { %v6081_v51 = vadd.f32 %v6079_v17, %v6071_v35 }
0x41bd   :  { %9735 = vtanh.f32 %v6081_v51  ;;  %v6089_v45 = vsel %vm1085_vm12, %v6081_v51, %v5846_v12 }
0x41c7   :  { %v9736_v13 = vpop.eup %9735 }
0x41c8   :  { %6084 = vrot.lane.b32.xlu1 %v9736_v13, %s9963_s1 }
0x423a   :  { %v6085_v15 = vpop.permute.xlu1 %6084 }
0x423b   :  { %v6087_v54 = vmul.f32 %v9734_v4, %v6085_v15 }
0x423d   :  { %v6088_v22 = vsel %vm1085_vm12, %v6087_v54, %v5845_v57 }
0x423e   :  { %6232 = vrot.lane.b32.xlu0 %v6088_v22, %s9954_s6 }
0x42b0   :  { %v6233_v25 = vpop.permute.xlu0 %6232 }
0x42b1   :  { %8726 = vmatmul.mubr.msk.f32.vlgmr.msra.gmra.mrb[28].mxu0 %vm164_vm1, %v6233_v25 }
0x42b2   :  { %9317 = vmatpush3.bf16.msra.mxu0 %v10966_v44  ;;  %8769 = vmatprep.mubr.msk.f32.mxu0 %vm9960_vm0, %v9961_v1 }
0x42b3   :  { %9318 = vmatprep.subr.bf16.mxu0 %v9959_v0 }
0x42b6   :  { %9320 = vmatpush3.bf16.msra.mxu0 %v10976_v60 }
0x42b7   :  { %9321 = vmatprep.subr.bf16.mxu0 %v9959_v0 }
0x42b9   :  { %8770 = vmatmul.mubr.msk.f32.vlgmr.msra.gmra.mrb[30].mxu0 %vm164_vm1, %v9780_v36 }
0x42ba   :  { %9323 = vmatpush3.bf16.msra.mxu0 %v10988_v53  ;;  %8780 = vmatprep.mubr.msk.f32.mxu0 %vm9960_vm0, %v9961_v1 }
0x42bb   :  { %9324 = vmatprep.subr.bf16.mxu0 %v9959_v0 }
0x42be   :  { %9326 = vmatpush3.bf16.msra.mxu0 %v11000_v43 }
0x42bf   :  { %9327 = vmatprep.subr.bf16.mxu0 %v9959_v0 }
0x42c1   :  { %8781 = vmatmul.mubr.msk.f32.vlgmr.msra.gmra.mrb[30].mxu0 %vm164_vm1, %v9781_v26 }
0x42c2   :  { %9329 = vmatpush3.bf16.msra.mxu0 %v11006_v21  ;;  %8791 = vmatprep.mubr.msk.f32.mxu0 %vm9960_vm0, %v9961_v1 }
0x42c3   :  { %9330 = vmatprep.subr.bf16.mxu0 %v9959_v0 }
0x42c6   :  { %9332 = vmatpush3.bf16.msra.mxu0 %v11011_v62 }
0x42c7   :  { %9351 = vmatprep.subr.bf16.mxu0 %v9959_v0 }
0x4384   :  { %v6302_v40 = vpop.f32.mrb[28].mxu0 }
0x4385   :  { %v9403_v16 = vadd.f32 %v11046_v47, %v6302_v40  ;;  %v8727_v7 = vpop.f32.mrb[29].mxu0 }
0x4387   :  { %9737 = vtanh.f32 %v9403_v16  ;;  %v7509_v39 = vmul.f32 -1.442695, %v9403_v16 }
0x4389   :  { %9739 = vpow2.f32 %v7509_v39  ;;  %v9784_v39 = vld [vmem:[%s11404_s10] ss:$0 sm:$0xff] }
0x4391   :  { %v9738_v27 = vpop.eup %9737 }
0x4392   :  { %6316 = vrot.lane.b32.xlu1 %v9738_v27, %s9963_s1 }
0x4393   :  { %v9740_v28 = vpop.eup %9739 }
0x4394   :  { %v6310_v29 = vadd.f32 1.0, %v9740_v28  ;;  %v9398_v28 = vadd.f32 %v9784_v39, %v11126_v8  ;;  %v7064_v39 = vld [vmem:[%s11408_s14 + $0x18] sm:$0xff] }
0x4396   :  { %9741 = vrcp.f32 %v6310_v29 }
0x43a0   :  { %v9742_v37 = vpop.eup %9741 }
0x43a1   :  { %v6314_v48 = vmul.f32 %v9742_v37, %v6089_v45 }
0x4404   :  { %v6317_v18 = vpop.permute.xlu1 %6316 }
0x4405   :  { %v6319_v42 = vmul.f32 %v9742_v37, %v6317_v18 }
0x4407   :  { %6321 = vrot.lane.b32.xlu0 %v6319_v42, %s9954_s6 }
0x4479   :  { %v6322_v49 = vpop.permute.xlu0 %6321 }
0x447a   :  { %v6324_v50 = vadd.f32 %v6322_v49, %v6314_v48 }
0x447c   :  { %9743 = vtanh.f32 %v6324_v50 }
0x4486   :  { %v9744_v11 = vpop.eup %9743 }
0x4487   :  { %6327 = vrot.lane.b32.xlu1 %v9744_v11, %s9963_s1 }
0x44f9   :  { %v6328_v33 = vpop.permute.xlu1 %6327 }
0x44fa   :  { %v6330_v55 = vmul.f32 %v9742_v37, %v6328_v33  ;;  %v7490_v37 = vmul.f32 -1.442695, %v9398_v28  ;;  %v7065_v33 = vld [vmem:[%s11408_s14 + $0x20] sm:$0xff] }
0x44fc   :  { %v6331_v57 = vsel %vm899_vm10, %v6330_v55, %v6088_v22  ;;  %v7066_v55 = vld [vmem:[%s11408_s14 + $0x28] sm:$0xff] }
0x44fd   :  { %6475 = vrot.lane.b32.xlu0 %v6331_v57, %s9954_s6 }
0x456f   :  { %v6476_v58 = vpop.permute.xlu0 %6475 }
0x4570   :  { %8759 = vmatmul.mubr.msk.f32.vlgmr.msra.gmra.mrb[28].mxu1 %vm164_vm1, %v6476_v58 }
0x4571   :  { %9335 = vmatpush3.bf16.msra.mxu1 %v10966_v44  ;;  %8802 = vmatprep.mubr.msk.f32.mxu1 %vm9960_vm0, %v9961_v1  ;;  %v9783_v44 = vld [vmem:[#allocation2] sm:$0x3] }
0x4572   :  { %9336 = vmatprep.subr.bf16.mxu1 %v9959_v0 }
0x4575   :  { %9338 = vmatpush3.bf16.msra.mxu1 %v10976_v60 }
0x4576   :  { %9339 = vmatprep.subr.bf16.mxu1 %v9959_v0 }
0x4578   :  { %8803 = vmatmul.mubr.msk.f32.vlgmr.msra.gmra.mrb[30].mxu1 %vm164_vm1, %v9782_v9  ;;  %v4868_v9 = vsel %vm1457_vm5, %v11059_v32, %v11056_v63  ;;  %v7078_v63 = vmax.f32 %v10683_v59, 0.0  ;;  %v7069_v32 = vld [vmem:[%s11408_s14 + $0x40] sm:$0xff]  ;;  %v7071_v59 = vld [vmem:[%s11408_s14 + $0x50] sm:$0xff] }
0x4579   :  { %9341 = vmatpush3.bf16.msra.mxu1 %v10988_v53  ;;  %8813 = vmatprep.mubr.msk.f32.mxu1 %vm9960_vm0, %v9961_v1 }
0x457a   :  { %9342 = vmatprep.subr.bf16.mxu1 %v9959_v0 }
0x457d   :  { %9344 = vmatpush3.bf16.msra.mxu1 %v11000_v43 }
0x457e   :  { %9345 = vmatprep.subr.bf16.mxu1 %v9959_v0 }
0x4580   :  { %8814 = vmatmul.mubr.msk.f32.vlgmr.msra.gmra.mrb[30].mxu1 %vm164_vm1, %v9783_v44 }
0x4581   :  { %9347 = vmatpush3.bf16.msra.mxu1 %v11006_v21  ;;  %8824 = vmatprep.mubr.msk.f32.mxu1 %vm9960_vm0, %v9961_v1 }
0x4582   :  { %9348 = vmatprep.subr.bf16.mxu1 %v9959_v0 }
0x4585   :  { %9350 = vmatpush3.bf16.msra.mxu1 %v11011_v62  ;;  %v6332_v62 = vsel %vm899_vm10, %v6324_v50, %v6089_v45 }
0x4586   :  { %9357 = vmatprep.subr.bf16.mxu1 %v9959_v0 }
0x4643   :  { %v6545_v60 = vpop.f32.mrb[28].mxu1 }
0x4644   :  { %v9404_v53 = vadd.f32 %v11046_v47, %v6545_v60  ;;  %v8760_v43 = vpop.f32.mrb[29].mxu1 }
0x4645   :  { %v7068_v43 = vld [vmem:[%s11408_s14 + $0x38] sm:$0xff] }
0x4646   :  { %9745 = vtanh.f32 %v9404_v53  ;;  %v7513_v19 = vmul.f32 -1.442695, %v9404_v53  ;;  %v7067_v53 = vld [vmem:[%s11408_s14 + $0x30] sm:$0xff] }
0x4648   :  { %9747 = vpow2.f32 %v7513_v19  ;;  %v9355_v19 = vpack.c.bf16 %v7068_v43, %v7067_v53 }
0x4650   :  { %v9746_v61 = vpop.eup %9745 }
0x4651   :  { %6559 = vrot.lane.b32.xlu1 %v9746_v61, %s9963_s1 }
0x4652   :  { %v9748_v21 = vpop.eup %9747 }
0x4653   :  { %v6553_v20 = vadd.f32 1.0, %v9748_v21  ;;  %v7070_v21 = vld [vmem:[%s11408_s14 + $0x48] sm:$0xff] }
0x4655   :  { %9749 = vrcp.f32 %v6553_v20 }
0x465f   :  { %v9750_v38 = vpop.eup %9749 }
0x4660   :  { %v6557_v10 = vmul.f32 %v9750_v38, %v6332_v62 }
0x46c3   :  { %v6560_v5 = vpop.permute.xlu1 %6559 }
0x46c4   :  { %v6562_v2 = vmul.f32 %v9750_v38, %v6560_v5  ;;  %v9364_v5 = vpack.c.bf16 %v7070_v21, %v7069_v32 }
0x46c6   :  { %6564 = vrot.lane.b32.xlu0 %v6562_v2, %s9954_s6 }
0x4738   :  { %v6565_v41 = vpop.permute.xlu0 %6564 }
0x4739   :  { %v6567_v3 = vadd.f32 %v6565_v41, %v6557_v10 }
0x473b   :  { %9751 = vtanh.f32 %v6567_v3  ;;  %v11269_v40 = vsel %vm713_vm8, %v6567_v3, %v6332_v62  ;;  %v7072_v62 = vld [vmem:[%s11408_s14 + $0x58] sm:$0xff] }
0x473c   :  { %v9367_v3 = vpack.c.bf16 %v7072_v62, %v7071_v59 }
0x4745   :  { %v9752_v4 = vpop.eup %9751 }
0x4746   :  { %6570 = vrot.lane.b32.xlu1 %v9752_v4, %s9963_s1 }
0x47b8   :  { %v6571_v30 = vpop.permute.xlu1 %6570 }
0x47b9   :  { %v6573_v6 = vmul.f32 %v9750_v38, %v6571_v30 }
0x47bb   :  { %v6574_v12 = vsel %vm713_vm8, %v6573_v6, %v6331_v57  ;;  %v9352_v57 = vpack.c.bf16 %v7066_v55, %v7065_v33 }
0x47bc   :  { %6718 = vrot.lane.b32.xlu0 %v6574_v12, %s9954_s6 }
0x482e   :  { %v6719_v35 = vpop.permute.xlu0 %6718 }
0x482f   :  { %8792 = vmatmul.mubr.msk.f32.vlgmr.msra.gmra.mrb[30].mxu0 %vm164_vm1, %v6719_v35 }
0x4830   :  { %8835 = vmatprep.mubr.msk.f32.mxu0 %vm9960_vm0, %v9961_v1  ;;  %9353 = vmatpush3.bf16.msra.mxu0 %v9352_v57 }
0x4831   :  { %9354 = vmatprep.subr.bf16.mxu0 %v9959_v0 }
0x4834   :  { %9356 = vmatpush3.bf16.msra.mxu0 %v9355_v19 }
0x4835   :  { %9363 = vmatprep.subr.bf16.mxu0 %v9959_v0 }
0x4902   :  { %v6788_v46 = vpop.f32.mrb[30].mxu0 }
0x4903   :  { %v9405_v17 = vadd.f32 %v11046_v47, %v6788_v46  ;;  %v8793_v51 = vpop.f32.mrb[31].mxu0 }
0x4905   :  { %9753 = vtanh.f32 %v9405_v17  ;;  %v7517_v15 = vmul.f32 -1.442695, %v9405_v17 }
0x4907   :  { %9755 = vpow2.f32 %v7517_v15 }
0x490f   :  { %v9754_v13 = vpop.eup %9753 }
0x4910   :  { %6802 = vrot.lane.b32.xlu1 %v9754_v13, %s9963_s1 }
0x4911   :  { %v9756_v54 = vpop.eup %9755 }
0x4912   :  { %v6796_v22 = vadd.f32 1.0, %v9756_v54  ;;  %v7062_v54 = vld [vmem:[%s11408_s14 + $0x8] sm:$0xff] }
0x4914   :  { %9757 = vrcp.f32 %v6796_v22 }
0x491e   :  { %v9758_v25 = vpop.eup %9757 }
0x491f   :  { %v6800_v16 = vmul.f32 %v9758_v25, %v11269_v40 }
0x4982   :  { %v6803_v36 = vpop.permute.xlu1 %6802 }
0x4983   :  { %v6805_v26 = vmul.f32 %v9758_v25, %v6803_v36 }
0x4985   :  { %6807 = vrot.lane.b32.xlu0 %v6805_v26, %s9954_s6 }
0x49f7   :  { %v6808_v7 = vpop.permute.xlu0 %6807 }
0x49f8   :  { %v11272_v27 = vadd.f32 %v6808_v7, %v6800_v16  ;;  %v7063_v7 = vld [vmem:[%s11408_s14 + $0x10] sm:$0xff] }
0x49fa   :  { %9759 = vtanh.f32 %v11272_v27  ;;  %v6818_v36 = vsel %vm527_vm6, %v11272_v27, %v11269_v40  ;;  %v7077_v40 = vmax.f32 %v10929_v24, 0.0  ;;  %v7073_v27 = vld [vmem:[%s11408_s14 + $0x60] sm:$0xff]  ;;  %v7075_v24 = vld [vmem:[%s11408_s14 + $0x70] sm:$0xff] }
0x49fb   :  { %9761 = vtanh.f32 %v9398_v28 }
0x49fc   :  { %9763 = vpow2.f32 %v7490_v37 }
0x4a04   :  { %v9760_v29 = vpop.eup %9759 }
0x4a05   :  { %6813 = vrot.lane.b32.xlu1 %v9760_v29, %s9963_s1  ;;  %v9762_v23 = vpop.eup %9761  ;;  %v9361_v29 = vpack.c.bf16 %v7064_v39, %v7063_v7 }
0x4a06   :  { %v9764_v18 = vpop.eup %9763 }
0x4a07   :  { %v5097_v42 = vadd.f32 1.0, %v9764_v18  ;;  %v7074_v18 = vld [vmem:[%s11408_s14 + $0x68] sm:$0xff] }
0x4a09   :  { %5103 = vrot.lane.b32.xlu1 %v9762_v23, %s9963_s1  ;;  %9765 = vrcp.f32 %v5097_v42 }
0x4a13   :  { %v9766_v8 = vpop.eup %9765 }
0x4a14   :  { %v5101_v44 = vmul.f32 %v9766_v8, %v4868_v9 }
0x4a77   :  { %v6814_v45 = vpop.permute.xlu1 %6813 }
0x4a78   :  { %v6816_v48 = vmul.f32 %v9758_v25, %v6814_v45 }
0x4a7a   :  { %v11283_v49 = vsel %vm527_vm6, %v6816_v48, %v6574_v12  ;;  %v9370_v48 = vpack.c.bf16 %v7074_v18, %v7073_v27 }
0x4a7b   :  { %6961 = vrot.lane.b32.xlu0 %v11283_v49, %s9954_s6  ;;  %v5104_v50 = vpop.permute.xlu1 %5103 }
0x4a7c   :  { %v5106_v11 = vmul.f32 %v9766_v8, %v5104_v50  ;;  %v7076_v50 = vld [vmem:[%s11408_s14 + $0x78] sm:$0xff] }
0x4a7d   :  { %v9373_v55 = vpack.c.bf16 %v7076_v50, %v7075_v24 }
0x4a7e   :  { %5108 = vrot.lane.b32.xlu1 %v5106_v11, %s9954_s6 }
0x4aed   :  { %v6962_v58 = vpop.permute.xlu0 %6961 }
0x4aee   :  { %8825 = vmatmul.mubr.msk.f32.vlgmr.msra.gmra.mrb[30].mxu1 %vm164_vm1, %v6962_v58 }
0x4aef   :  { %8846 = vmatprep.mubr.msk.f32.mxu1 %vm9960_vm0, %v9961_v1 }
0x4af0   :  { %v5109_v60 = vpop.permute.xlu1 %5108 }
0x4af1   :  { %v5111_v61 = vadd.f32 %v5109_v60, %v5101_v44  ;;  %v7526_v60 = vld [vmem:[%s11409_s15] ss:$0 sm:$0xff] }
0x4af3   :  { %9767 = vtanh.f32 %v5111_v61 }
0x4afd   :  { %v9768_v31 = vpop.eup %9767 }
0x4afe   :  { %5114 = vrot.lane.b32.xlu1 %v9768_v31, %s9963_s1 }
0x4b02   :  { %7080 = vrot.lane.b32.xlu1 %v7078_v63, %s9954_s6 }
0x4b70   :  { %v5115_v20 = vpop.permute.xlu1 %5114 }
0x4b71   :  { %v5117_v38 = vmul.f32 %v9766_v8, %v5115_v20 }
0x4b73   :  { %v5118_v2 = vsel %vm1643_vm7, %v5117_v38, %v11070_v52 }
0x4b74   :  { %v7081_v10 = vpop.permute.xlu1 %7080  ;;  %v7229_v41 = vmax.f32 %v5118_v2, 0.0 }
0x4b75   :  { %8836 = vmatmul.mubr.msk.f32.vlgmr.msra.gmra.mrb[32].mxu0 %vm164_vm1, %v7081_v10 }
0x4b76   :  { %7231 = vrot.lane.b32.xlu1 %v7229_v41, %s9954_s6  ;;  %9365 = vmatpush3.bf16.msra.mxu0 %v9364_v5 }
0x4b77   :  { %9366 = vmatprep.subr.bf16.mxu0 %v9959_v0  ;;  %8857 = vmatprep.mubr.msk.f32.mxu0 %vm9960_vm0, %v9961_v1 }
0x4b7a   :  { %9368 = vmatpush3.bf16.msra.mxu0 %v9367_v3 }
0x4bc1   :  { %v7031_v14 = vpop.f32.mrb[30].mxu1 }
0x4bc2   :  { %v9406_v52 = vadd.f32 %v11046_v47, %v7031_v14  ;;  %v8826_v4 = vpop.f32.mrb[31].mxu1  ;;  %v7061_v47 = vld [vmem:[%s11408_s14] sm:$0xff] }
0x4bc3   :  { %v9358_v25 = vpack.c.bf16 %v7062_v54, %v7061_v47 }
0x4bc4   :  { %9769 = vtanh.f32 %v9406_v52  ;;  %v7521_v12 = vmul.f32 -1.442695, %v9406_v52 }
0x4bc5   :  { %9359 = vmatpush3.bf16.msra.mxu1 %v9358_v25 }
0x4bc6   :  { %9771 = vpow2.f32 %v7521_v12  ;;  %9360 = vmatprep.subr.bf16.mxu1 %v9959_v0 }
0x4bc9   :  { %9362 = vmatpush3.bf16.msra.mxu1 %v9361_v29 }
0x4bca   :  { %9369 = vmatprep.subr.bf16.mxu1 %v9959_v0 }
0x4bce   :  { %v9770_v30 = vpop.eup %9769 }
0x4bcf   :  { %7045 = vrot.lane.b32.xlu0 %v9770_v30, %s9963_s1 }
0x4bd0   :  { %v9772_v35 = vpop.eup %9771 }
0x4bd1   :  { %v7039_v46 = vadd.f32 1.0, %v9772_v35 }
0x4bd3   :  { %9773 = vrcp.f32 %v7039_v46 }
0x4bdd   :  { %v9774_v17 = vpop.eup %9773 }
0x4bde   :  { %v7043_v26 = vmul.f32 %v9774_v17, %v6818_v36 }
0x4be8   :  { %v7232_v6 = vpop.permute.xlu1 %7231 }
0x4be9   :  { %8858 = vmatmul.mubr.msk.f32.vlgmr.msra.gmra.mrb[34].mxu0 %vm164_vm1, %v7232_v6 }
0x4c41   :  { %v7046_v51 = vpop.permute.xlu0 %7045 }
0x4c42   :  { %v7048_v13 = vmul.f32 %v9774_v17, %v7046_v51 }
0x4c44   :  { %7050 = vrot.lane.b32.xlu0 %v7048_v13, %s9954_s6 }
0x4c48   :  { %v7150_v15 = vpop.f32.mrb[32].mxu0 }
0x4c49   :  { %v8837_v22 = vpop.f32.mrb[33].mxu0 }
0x4cb6   :  { %v7051_v16 = vpop.permute.xlu0 %7050 }
0x4cb7   :  { %v7053_v28 = vadd.f32 %v7051_v16, %v7043_v26 }
0x4cb9   :  { %9775 = vtanh.f32 %v7053_v28 }
0x4cbc   :  { %v7301_v23 = vpop.f32.mrb[34].mxu0 }
0x4cbd   :  { %v8859_v37 = vpop.f32.mrb[35].mxu0 }
0x4cc3   :  { %v9776_v56 = vpop.eup %9775 }
0x4cc4   :  { %7056 = vrot.lane.b32.xlu0 %v9776_v56, %s9963_s1 }
0x4cc8   :  { %7155 = vrot.lane.b32.xlu0 %v7077_v40, %s9954_s6 }
0x4d36   :  { %v7057_v42 = vpop.permute.xlu0 %7056 }
0x4d37   :  { %v7059_v45 = vmul.f32 %v9774_v17, %v7057_v42 }
0x4d39   :  { %v7060_v8 = vsel %vm341_vm3, %v7059_v45, %v11283_v49 }
0x4d3a   :  { %v7156_v11 = vpop.permute.xlu0 %7155  ;;  %v7306_v33 = vmax.f32 %v7060_v8, 0.0 }
0x4d3b   :  { %8847 = vmatmul.mubr.msk.f32.vlgmr.msra.gmra.mrb[32].mxu1 %vm164_vm1, %v7156_v11 }
0x4d3c   :  { %7308 = vrot.lane.b32.xlu0 %v7306_v33, %s9954_s6  ;;  %9371 = vmatpush3.bf16.msra.mxu1 %v9370_v48  ;;  %s9964_s6 = smov [#allocation15]  }
0x4d3d   :  { %9372 = vmatprep.subr.bf16.mxu1 %v9959_v0  ;;  %8868 = vmatprep.mubr.msk.f32.mxu1 %vm9960_vm0, %v9961_v1  ;;  %s7398_s28 = sshll.u32 %s9964_s6, 4  ;;  %s7399_s28 = int_to_ptr.vmem [resolvable:$true] %s7398_s28 }
0x4d3e   :  { %s9917_s29 = scalar_lea.vmem %s7399_s28, 32  ;;  %p9922_p7 = scmp.lt.s32.totalorder %s7399_s28, %s7399_s28 }
0x4d3f   :  { %p9918_p6 = scmp.ne.s32.totalorder %s7399_s28, %s9917_s29  ;;  %p9923_p8 = scmp.lt.s32.totalorder %s9917_s29, %s9917_s29 }
0x4d40   :  { %9374 = vmatpush3.bf16.msra.mxu1 %v9373_v55 }
0x4d41   :  { %p9924_p9 = por %p9923_p8, %p9922_p7 }
0x4d43   :  { %p9925_p10 = pnand %p9924_p9, %p9918_p6 }
0x4dae   :  { %v7309_v34 = vpop.permute.xlu0 %7308 }
0x4daf   :  { %8869 = vmatmul.mubr.msk.f32.vlgmr.msra.gmra.mrb[34].mxu1 %vm164_vm1, %v7309_v34 }
0x4e0e   :  { %v7225_v49 = vpop.f32.mrb[32].mxu1 }
0x4e0f   :  { %v7226_v57 = vadd.f32 %v7225_v49, %v7150_v15  ;;  %v8848_v58 = vpop.f32.mrb[33].mxu1 }
0x4e11   :  { %v7305_v9 = vadd.f32 %v7301_v23, %v7226_v57 }
0x4e82   :  { %v7378_v44 = vpop.f32.mrb[34].mxu1 }
0x4e83   :  { %v7382_v53 = vadd.f32 %v7378_v44, %v7305_v9  ;;  %v8870_v0 = vpop.f32.mrb[35].mxu1 }
0x4e85   :  { %v7390_v43 = vadd.f32 %v7526_v60, %v7382_v53 }
0x4e87   :  { %7391 = vst.msk [vmem:[#allocation15] sm:$0x3] %vm348_vm4, %v7390_v43 }
0x4e88   :  { %9928 = shalt.err (!%p9925_p10)
}
0x4e89   :  { %s11419_s21 = sld [smem:[#allocation22_spill]] }
0x4e8f   :  { %s9929_s30 = scalar_lea.hbm %s11419_s21, 32 }
0x4e90   :  { %p9930_p11 = scmp.ne.s32.totalorder %s11419_s21, %s9929_s30  ;;  %p9933_p12 = scmp.lt.u32.totalorder %s9929_s30, %s11419_s21 }
0x4e92   :  { %p9935_p13 = pnand %p9933_p12, %p9930_p11 }
0x4e94   :  { %9938 = shalt.err (!%p9935_p13)
}
0x4e95   :  { %7401 = dma.vmem_to_hbm [thread:$0]  %s7399_s28, 32, %s11419_s21, [#allocation6]  }
0x4e96   :  { %9947 = dma.done.wait [#allocation6], 32  }
0x4e97   :  { %9948 = vsyncadd [#allocation6], 4294967264 }
0x4e98   :  { %7405 = vsyncpa [#allocation5], 1 }
0x4e99   :  { %7406 = vsyncpa [#allocation8], 1 }
0x4e9a   :  { %7407 = vsyncpa [#allocation11], 1 }
0x4e9b   :  { %7408 = vsyncpa [#allocation14], 1 }
0x4e9c   :  { %7409 = vsyncpa [#allocation6], 1 }

</bundles_post_ra>
